<compile_context>
chip_gen: v7x
topology: tpu7x:2x2x1
jax: 0.10.0
libtpu: 0.0.40
codegen_flags: <defaults>
</compile_context>

<pallas_src>
import jax
import jax.numpy as jnp
from jax.experimental import pallas as pl
from jax.experimental.pallas import tpu as pltpu

EMBED = 50          # embedding dim
HIDDEN = 40         # LSTM hidden size
LIN = 16            # first linear out features
NOUT = 9            # final out features
VOCAB = 1000        # synthetic vocab (tokenizer num_words=1000)

LANE = 128
GATEW = 4 * LANE    # each gate (i,f,g,o) gets its own 128-lane block -> 512 lanes

# Row layout of the single packed weight operand (all section starts 8-aligned).
ROW_WHH = 0         # rows [0, 40):    W_hh^T, gate k in lanes [k*128, k*128+H)
ROW_WLIN = 40       # rows [40, 80):   W_lin^T in lanes [0, 16)
ROW_BLIN = 80       # row 80:          b_lin   in lanes [0, 16)
ROW_WOUT = 88       # rows [88, 104):  W_out^T in lanes [0, 9)
ROW_BOUT = 104      # row 104:         b_out   in lanes [0, 9)
W_ROWS = 112


def _sigmoid(x):
    # sigmoid(x) = 0.5 * tanh(0.5 * x) + 0.5  -- single EUP op (vs exp + divide).
    return 0.5 * jnp.tanh(0.5 * x) + 0.5


def lstm_head_kernel(tok_ref,    # SMEM (T*B,) int32 token ids, seq-major
                     proj_ref,   # HBM  (VOCAB, 4*128) pre-baked input proj + biases
                     w_ref,      # VMEM (112, 4*128)  packed Whh / head weights
                     out_ref,    # VMEM (T, NOUT)
                     xbuf,       # VMEM scratch (T*B, 4*128)
                     sem):       # DMA semaphores (T*B,)
    T = out_ref.shape[0]
    TB = xbuf.shape[0]
    B = TB // T

    # Fused embedding + input-projection gather: DMA the T*B needed rows of the
    # pre-baked table straight from HBM into a sublane-dense VMEM slab.
    copies = []
    for i in range(TB):
        cp = pltpu.make_async_copy(proj_ref.at[tok_ref[i]], xbuf.at[i], sem.at[i])
        cp.start()
        copies.append(cp)

    whh = w_ref[ROW_WHH:ROW_WHH + HIDDEN, :]           # (H, 4*128), loop-invariant

    for cp in copies:
        cp.wait()

    h = jnp.zeros((B, HIDDEN), jnp.float32)
    c = jnp.zeros((B, HIDDEN), jnp.float32)
    pooled_rows = []
    for t in range(T):                                  # T static -> fully unrolled
        xg = xbuf[t * B:(t + 1) * B, :]                 # (B, 4*128)
        gates = xg + jnp.dot(h, whh, preferred_element_type=jnp.float32)
        # Gate slices start at 128-lane boundaries -> free vreg sub-selections.
        i_g = _sigmoid(gates[:, 0 * LANE:0 * LANE + HIDDEN])
        f_g = _sigmoid(gates[:, 1 * LANE:1 * LANE + HIDDEN])
        g_g = jnp.tanh(gates[:, 2 * LANE:2 * LANE + HIDDEN])
        o_g = _sigmoid(gates[:, 3 * LANE:3 * LANE + HIDDEN])
        c = f_g * c + i_g * g_g
        h = o_g * jnp.tanh(c)
        # torch.max(h_lstm, 1): reduce over batch axis; off the h->h chain.
        pooled_rows.append(jnp.max(h, axis=0, keepdims=True))   # (1, H)

    pooled = jnp.concatenate(pooled_rows, axis=0)       # (T, H), no per-step store

    wlin = w_ref[ROW_WLIN:ROW_WLIN + HIDDEN, 0:LIN]     # (H, LIN)
    blin = w_ref[ROW_BLIN:ROW_BLIN + 1, 0:LIN]          # (1, LIN)
    wout = w_ref[ROW_WOUT:ROW_WOUT + LIN, 0:NOUT]       # (LIN, NOUT)
    bout = w_ref[ROW_BOUT:ROW_BOUT + 1, 0:NOUT]         # (1, NOUT)
    lin = jnp.maximum(
        jnp.dot(pooled, wlin, preferred_element_type=jnp.float32) + blin, 0.0)
    out_ref[...] = (jnp.dot(lin, wout, preferred_element_type=jnp.float32)
                    + bout)                             # (T, NOUT)


def pack_params(params):
    """One-time packing of PyTorch-convention weights for the kernel."""
    # Frozen embedding => pre-bake the input projection + both biases:
    #   (VOCAB, E) @ (E, 4H) + b_ih + b_hh  ->  (VOCAB, 4H), then scatter each
    # gate's 40 columns into its own 128-lane block -> (VOCAB, 512).
    proj = (params["emb_table"] @ params["w_ih"].T
            + params["b_ih"] + params["b_hh"]).astype(jnp.float32)   # (VOCAB, 4H)
    whh_t = params["w_hh"].T.astype(jnp.float32)                     # (H, 4H)

    proj_table = jnp.zeros((VOCAB, GATEW), jnp.float32)
    whh_packed = jnp.zeros((HIDDEN, GATEW), jnp.float32)
    for k in range(4):
        proj_table = proj_table.at[:, k * LANE:k * LANE + HIDDEN].set(
            proj[:, k * HIDDEN:(k + 1) * HIDDEN])
        whh_packed = whh_packed.at[:, k * LANE:k * LANE + HIDDEN].set(
            whh_t[:, k * HIDDEN:(k + 1) * HIDDEN])

    # Single packed weight operand: Whh + head linears + biases.
    weights = jnp.zeros((W_ROWS, GATEW), jnp.float32)
    weights = weights.at[ROW_WHH:ROW_WHH + HIDDEN, :].set(whh_packed)
    weights = weights.at[ROW_WLIN:ROW_WLIN + HIDDEN, 0:LIN].set(
        params["w_lin"].T.astype(jnp.float32))
    weights = weights.at[ROW_BLIN, 0:LIN].set(params["b_lin"].astype(jnp.float32))
    weights = weights.at[ROW_WOUT:ROW_WOUT + LIN, 0:NOUT].set(
        params["w_out"].T.astype(jnp.float32))
    weights = weights.at[ROW_BOUT, 0:NOUT].set(params["b_out"].astype(jnp.float32))

    return {"proj_table": proj_table, "weights": weights}


@jax.jit
def model_forward(x_tokens, packed):
    """x_tokens: (T, B) int32 token ids; packed: output of pack_params."""
    T, B = x_tokens.shape
    tok_flat = x_tokens.reshape(T * B).astype(jnp.int32)   # bitcast reshape, free

    smem = pl.BlockSpec(memory_space=pltpu.MemorySpace.SMEM)
    hbm = pl.BlockSpec(memory_space=pl.ANY)
    vmem = pl.BlockSpec(memory_space=pltpu.MemorySpace.VMEM)

    return pl.pallas_call(
        lstm_head_kernel,
        out_shape=jax.ShapeDtypeStruct((T, NOUT), jnp.float32),
        in_specs=[smem, hbm, vmem],
        out_specs=vmem,
        scratch_shapes=[pltpu.VMEM((T * B, GATEW), jnp.float32),
                        pltpu.SemaphoreType.DMA((T * B,))],
    )(tok_flat, packed["proj_table"], packed["weights"])


def reference_forward(x_tokens, params):
    """Pure-JAX reference mirroring the PyTorch forward exactly."""
    emb = params["emb_table"][x_tokens]                 # (T, B, E)
    T, B, _ = emb.shape
    h = jnp.zeros((B, HIDDEN), jnp.float32)
    c = jnp.zeros((B, HIDDEN), jnp.float32)
    hs = []
    for t in range(T):
        gates = (emb[t] @ params["w_ih"].T + params["b_ih"]
                 + h @ params["w_hh"].T + params["b_hh"])           # (B, 4H)
        i_g = jax.nn.sigmoid(gates[:, 0 * HIDDEN:1 * HIDDEN])
        f_g = jax.nn.sigmoid(gates[:, 1 * HIDDEN:2 * HIDDEN])
        g_g = jnp.tanh(gates[:, 2 * HIDDEN:3 * HIDDEN])
        o_g = jax.nn.sigmoid(gates[:, 3 * HIDDEN:4 * HIDDEN])
        c = f_g * c + i_g * g_g
        h = o_g * jnp.tanh(c)
        hs.append(h)
    h_lstm = jnp.stack(hs)                              # (T, B, H)
    pooled = jnp.max(h_lstm, axis=1)                    # (T, H)
    lin = jax.nn.relu(pooled @ params["w_lin"].T + params["b_lin"])
    return lin @ params["w_out"].T + params["b_out"]    # (T, NOUT)


def make_params(key):
    ks = jax.random.split(key, 9)
    s_lstm = 1.0 / jnp.sqrt(HIDDEN)
    s_lin = 1.0 / jnp.sqrt(HIDDEN)
    s_out = 1.0 / jnp.sqrt(LIN)
    # Note: the reference module loads a (frozen) pretrained embedding matrix;
    # here it is synthesized deterministically instead of being all-zeros.
    return {
        "emb_table": jax.random.normal(ks[0], (VOCAB, EMBED), jnp.float32) * 0.1,
        "w_ih": jax.random.uniform(ks[1], (4 * HIDDEN, EMBED), jnp.float32, -s_lstm, s_lstm),
        "w_hh": jax.random.uniform(ks[2], (4 * HIDDEN, HIDDEN), jnp.float32, -s_lstm, s_lstm),
        "b_ih": jax.random.uniform(ks[3], (4 * HIDDEN,), jnp.float32, -s_lstm, s_lstm),
        "b_hh": jax.random.uniform(ks[4], (4 * HIDDEN,), jnp.float32, -s_lstm, s_lstm),
        "w_lin": jax.random.uniform(ks[5], (LIN, HIDDEN), jnp.float32, -s_lin, s_lin),
        "b_lin": jax.random.uniform(ks[6], (LIN,), jnp.float32, -s_lin, s_lin),
        "w_out": jax.random.uniform(ks[7], (NOUT, LIN), jnp.float32, -s_out, s_out),
        "b_out": jax.random.uniform(ks[8], (NOUT,), jnp.float32, -s_out, s_out),
    }


if __name__ == "__main__":
    key = jax.random.PRNGKey(0)
    k_param, k_x = jax.random.split(key)
    params = make_params(k_param)
    packed = pack_params(params)   # one-time weight packing (not per forward)

    T, B = 8, 2  # (seq_len, batch) — seq-major as PyTorch's default nn.LSTM
    x = jax.random.randint(k_x, (T, B), 0, VOCAB, dtype=jnp.int32)

    out = jax.block_until_ready(model_forward(x, packed))
    ref = jax.block_until_ready(reference_forward(x, params))

    assert out.shape == (T, NOUT), out.shape
    assert jnp.allclose(out, ref, atol=1e-4, rtol=1e-4), (
        "mismatch vs reference:\n" + str(jnp.max(jnp.abs(out - ref))))
    print("KERNEL_OK")
</pallas_src>

<mosaic_0001>
module attributes {stable_mosaic.version = 11 : i64} {
  func.func @lstm_head_kernel(%arg0: memref<16xi32, #tpu.memory_space<smem>>, %arg1: memref<1000x512xf32, #tpu.memory_space<any>>, %arg2: memref<112x512xf32, #tpu.memory_space<vmem>>, %arg3: memref<8x9xf32, #tpu.memory_space<vmem>>, %arg4: memref<16x512xf32, #tpu.memory_space<vmem>>, %arg5: memref<16x!tpu.dma_semaphore, #tpu.memory_space<semaphore_mem>>) attributes {dimension_semantics = [], scalar_prefetch = 0 : i64, scratch_operands = 2 : i64, tpu.core_type = #tpu.core_type<tc>} {
    %c0 = arith.constant 0 : index
    %0 = memref.load %arg0[%c0] : memref<16xi32, #tpu.memory_space<smem>>
    %c0_i32 = arith.constant 0 : i32
    %c0_i32_0 = arith.constant 0 : i32
    %c0_i32_1 = arith.constant 0 : i32
    %1 = tpu.memref_slice %arg1[%0, %c0_i32_1] : memref<1000x512xf32, #tpu.memory_space<any>> -> memref<1x512xf32, #tpu.memory_space<any>>
    %2 = tpu.memref_squeeze %1 : memref<1x512xf32, #tpu.memory_space<any>> -> memref<512xf32, #tpu.memory_space<any>>
    %c0_i32_2 = arith.constant 0 : i32
    %3 = tpu.memref_slice %arg4[%c0_i32, %c0_i32_2] : memref<16x512xf32, #tpu.memory_space<vmem>> -> memref<1x512xf32, #tpu.memory_space<vmem>>
    %4 = tpu.memref_squeeze %3 : memref<1x512xf32, #tpu.memory_space<vmem>> -> memref<512xf32, #tpu.memory_space<vmem>>
    %5 = tpu.memref_slice %arg5[%c0_i32_0] : memref<16x!tpu.dma_semaphore, #tpu.memory_space<semaphore_mem>> -> memref<1x!tpu.dma_semaphore, #tpu.memory_space<semaphore_mem>>
    %6 = tpu.memref_squeeze %5 : memref<1x!tpu.dma_semaphore, #tpu.memory_space<semaphore_mem>> -> memref<!tpu.dma_semaphore, #tpu.memory_space<semaphore_mem>>
    tpu.enqueue_dma source(%2 : memref<512xf32, #tpu.memory_space<any>>) target(%4 : memref<512xf32, #tpu.memory_space<vmem>>) target_semaphore(%6 : memref<!tpu.dma_semaphore, #tpu.memory_space<semaphore_mem>>)
    %c1 = arith.constant 1 : index
    %7 = memref.load %arg0[%c1] : memref<16xi32, #tpu.memory_space<smem>>
    %c1_i32 = arith.constant 1 : i32
    %c1_i32_3 = arith.constant 1 : i32
    %c0_i32_4 = arith.constant 0 : i32
    %8 = tpu.memref_slice %arg1[%7, %c0_i32_4] : memref<1000x512xf32, #tpu.memory_space<any>> -> memref<1x512xf32, #tpu.memory_space<any>>
    %9 = tpu.memref_squeeze %8 : memref<1x512xf32, #tpu.memory_space<any>> -> memref<512xf32, #tpu.memory_space<any>>
    %c0_i32_5 = arith.constant 0 : i32
    %10 = tpu.memref_slice %arg4[%c1_i32, %c0_i32_5] : memref<16x512xf32, #tpu.memory_space<vmem>> -> memref<1x512xf32, #tpu.memory_space<vmem>>
    %11 = tpu.memref_squeeze %10 : memref<1x512xf32, #tpu.memory_space<vmem>> -> memref<512xf32, #tpu.memory_space<vmem>>
    %12 = tpu.memref_slice %arg5[%c1_i32_3] : memref<16x!tpu.dma_semaphore, #tpu.memory_space<semaphore_mem>> -> memref<1x!tpu.dma_semaphore, #tpu.memory_space<semaphore_mem>>
    %13 = tpu.memref_squeeze %12 : memref<1x!tpu.dma_semaphore, #tpu.memory_space<semaphore_mem>> -> memref<!tpu.dma_semaphore, #tpu.memory_space<semaphore_mem>>
    tpu.enqueue_dma source(%9 : memref<512xf32, #tpu.memory_space<any>>) target(%11 : memref<512xf32, #tpu.memory_space<vmem>>) target_semaphore(%13 : memref<!tpu.dma_semaphore, #tpu.memory_space<semaphore_mem>>)
    %c2 = arith.constant 2 : index
    %14 = memref.load %arg0[%c2] : memref<16xi32, #tpu.memory_space<smem>>
    %c2_i32 = arith.constant 2 : i32
    %c2_i32_6 = arith.constant 2 : i32
    %c0_i32_7 = arith.constant 0 : i32
    %15 = tpu.memref_slice %arg1[%14, %c0_i32_7] : memref<1000x512xf32, #tpu.memory_space<any>> -> memref<1x512xf32, #tpu.memory_space<any>>
    %16 = tpu.memref_squeeze %15 : memref<1x512xf32, #tpu.memory_space<any>> -> memref<512xf32, #tpu.memory_space<any>>
    %c0_i32_8 = arith.constant 0 : i32
    %17 = tpu.memref_slice %arg4[%c2_i32, %c0_i32_8] : memref<16x512xf32, #tpu.memory_space<vmem>> -> memref<1x512xf32, #tpu.memory_space<vmem>>
    %18 = tpu.memref_squeeze %17 : memref<1x512xf32, #tpu.memory_space<vmem>> -> memref<512xf32, #tpu.memory_space<vmem>>
    %19 = tpu.memref_slice %arg5[%c2_i32_6] : memref<16x!tpu.dma_semaphore, #tpu.memory_space<semaphore_mem>> -> memref<1x!tpu.dma_semaphore, #tpu.memory_space<semaphore_mem>>
    %20 = tpu.memref_squeeze %19 : memref<1x!tpu.dma_semaphore, #tpu.memory_space<semaphore_mem>> -> memref<!tpu.dma_semaphore, #tpu.memory_space<semaphore_mem>>
    tpu.enqueue_dma source(%16 : memref<512xf32, #tpu.memory_space<any>>) target(%18 : memref<512xf32, #tpu.memory_space<vmem>>) target_semaphore(%20 : memref<!tpu.dma_semaphore, #tpu.memory_space<semaphore_mem>>)
    %c3 = arith.constant 3 : index
    %21 = memref.load %arg0[%c3] : memref<16xi32, #tpu.memory_space<smem>>
    %c3_i32 = arith.constant 3 : i32
    %c3_i32_9 = arith.constant 3 : i32
    %c0_i32_10 = arith.constant 0 : i32
    %22 = tpu.memref_slice %arg1[%21, %c0_i32_10] : memref<1000x512xf32, #tpu.memory_space<any>> -> memref<1x512xf32, #tpu.memory_space<any>>
    %23 = tpu.memref_squeeze %22 : memref<1x512xf32, #tpu.memory_space<any>> -> memref<512xf32, #tpu.memory_space<any>>
    %c0_i32_11 = arith.constant 0 : i32
    %24 = tpu.memref_slice %arg4[%c3_i32, %c0_i32_11] : memref<16x512xf32, #tpu.memory_space<vmem>> -> memref<1x512xf32, #tpu.memory_space<vmem>>
    %25 = tpu.memref_squeeze %24 : memref<1x512xf32, #tpu.memory_space<vmem>> -> memref<512xf32, #tpu.memory_space<vmem>>
    %26 = tpu.memref_slice %arg5[%c3_i32_9] : memref<16x!tpu.dma_semaphore, #tpu.memory_space<semaphore_mem>> -> memref<1x!tpu.dma_semaphore, #tpu.memory_space<semaphore_mem>>
    %27 = tpu.memref_squeeze %26 : memref<1x!tpu.dma_semaphore, #tpu.memory_space<semaphore_mem>> -> memref<!tpu.dma_semaphore, #tpu.memory_space<semaphore_mem>>
    tpu.enqueue_dma source(%23 : memref<512xf32, #tpu.memory_space<any>>) target(%25 : memref<512xf32, #tpu.memory_space<vmem>>) target_semaphore(%27 : memref<!tpu.dma_semaphore, #tpu.memory_space<semaphore_mem>>)
    %c4 = arith.constant 4 : index
    %28 = memref.load %arg0[%c4] : memref<16xi32, #tpu.memory_space<smem>>
    %c4_i32 = arith.constant 4 : i32
    %c4_i32_12 = arith.constant 4 : i32
    %c0_i32_13 = arith.constant 0 : i32
    %29 = tpu.memref_slice %arg1[%28, %c0_i32_13] : memref<1000x512xf32, #tpu.memory_space<any>> -> memref<1x512xf32, #tpu.memory_space<any>>
    %30 = tpu.memref_squeeze %29 : memref<1x512xf32, #tpu.memory_space<any>> -> memref<512xf32, #tpu.memory_space<any>>
    %c0_i32_14 = arith.constant 0 : i32
    %31 = tpu.memref_slice %arg4[%c4_i32, %c0_i32_14] : memref<16x512xf32, #tpu.memory_space<vmem>> -> memref<1x512xf32, #tpu.memory_space<vmem>>
    %32 = tpu.memref_squeeze %31 : memref<1x512xf32, #tpu.memory_space<vmem>> -> memref<512xf32, #tpu.memory_space<vmem>>
    %33 = tpu.memref_slice %arg5[%c4_i32_12] : memref<16x!tpu.dma_semaphore, #tpu.memory_space<semaphore_mem>> -> memref<1x!tpu.dma_semaphore, #tpu.memory_space<semaphore_mem>>
    %34 = tpu.memref_squeeze %33 : memref<1x!tpu.dma_semaphore, #tpu.memory_space<semaphore_mem>> -> memref<!tpu.dma_semaphore, #tpu.memory_space<semaphore_mem>>
    tpu.enqueue_dma source(%30 : memref<512xf32, #tpu.memory_space<any>>) target(%32 : memref<512xf32, #tpu.memory_space<vmem>>) target_semaphore(%34 : memref<!tpu.dma_semaphore, #tpu.memory_space<semaphore_mem>>)
    %c5 = arith.constant 5 : index
    %35 = memref.load %arg0[%c5] : memref<16xi32, #tpu.memory_space<smem>>
    %c5_i32 = arith.constant 5 : i32
    %c5_i32_15 = arith.constant 5 : i32
    %c0_i32_16 = arith.constant 0 : i32
    %36 = tpu.memref_slice %arg1[%35, %c0_i32_16] : memref<1000x512xf32, #tpu.memory_space<any>> -> memref<1x512xf32, #tpu.memory_space<any>>
    %37 = tpu.memref_squeeze %36 : memref<1x512xf32, #tpu.memory_space<any>> -> memref<512xf32, #tpu.memory_space<any>>
    %c0_i32_17 = arith.constant 0 : i32
    %38 = tpu.memref_slice %arg4[%c5_i32, %c0_i32_17] : memref<16x512xf32, #tpu.memory_space<vmem>> -> memref<1x512xf32, #tpu.memory_space<vmem>>
    %39 = tpu.memref_squeeze %38 : memref<1x512xf32, #tpu.memory_space<vmem>> -> memref<512xf32, #tpu.memory_space<vmem>>
    %40 = tpu.memref_slice %arg5[%c5_i32_15] : memref<16x!tpu.dma_semaphore, #tpu.memory_space<semaphore_mem>> -> memref<1x!tpu.dma_semaphore, #tpu.memory_space<semaphore_mem>>
    %41 = tpu.memref_squeeze %40 : memref<1x!tpu.dma_semaphore, #tpu.memory_space<semaphore_mem>> -> memref<!tpu.dma_semaphore, #tpu.memory_space<semaphore_mem>>
    tpu.enqueue_dma source(%37 : memref<512xf32, #tpu.memory_space<any>>) target(%39 : memref<512xf32, #tpu.memory_space<vmem>>) target_semaphore(%41 : memref<!tpu.dma_semaphore, #tpu.memory_space<semaphore_mem>>)
    %c6 = arith.constant 6 : index
    %42 = memref.load %arg0[%c6] : memref<16xi32, #tpu.memory_space<smem>>
    %c6_i32 = arith.constant 6 : i32
    %c6_i32_18 = arith.constant 6 : i32
    %c0_i32_19 = arith.constant 0 : i32
    %43 = tpu.memref_slice %arg1[%42, %c0_i32_19] : memref<1000x512xf32, #tpu.memory_space<any>> -> memref<1x512xf32, #tpu.memory_space<any>>
    %44 = tpu.memref_squeeze %43 : memref<1x512xf32, #tpu.memory_space<any>> -> memref<512xf32, #tpu.memory_space<any>>
    %c0_i32_20 = arith.constant 0 : i32
    %45 = tpu.memref_slice %arg4[%c6_i32, %c0_i32_20] : memref<16x512xf32, #tpu.memory_space<vmem>> -> memref<1x512xf32, #tpu.memory_space<vmem>>
    %46 = tpu.memref_squeeze %45 : memref<1x512xf32, #tpu.memory_space<vmem>> -> memref<512xf32, #tpu.memory_space<vmem>>
    %47 = tpu.memref_slice %arg5[%c6_i32_18] : memref<16x!tpu.dma_semaphore, #tpu.memory_space<semaphore_mem>> -> memref<1x!tpu.dma_semaphore, #tpu.memory_space<semaphore_mem>>
    %48 = tpu.memref_squeeze %47 : memref<1x!tpu.dma_semaphore, #tpu.memory_space<semaphore_mem>> -> memref<!tpu.dma_semaphore, #tpu.memory_space<semaphore_mem>>
    tpu.enqueue_dma source(%44 : memref<512xf32, #tpu.memory_space<any>>) target(%46 : memref<512xf32, #tpu.memory_space<vmem>>) target_semaphore(%48 : memref<!tpu.dma_semaphore, #tpu.memory_space<semaphore_mem>>)
    %c7 = arith.constant 7 : index
    %49 = memref.load %arg0[%c7] : memref<16xi32, #tpu.memory_space<smem>>
    %c7_i32 = arith.constant 7 : i32
    %c7_i32_21 = arith.constant 7 : i32
    %c0_i32_22 = arith.constant 0 : i32
    %50 = tpu.memref_slice %arg1[%49, %c0_i32_22] : memref<1000x512xf32, #tpu.memory_space<any>> -> memref<1x512xf32, #tpu.memory_space<any>>
    %51 = tpu.memref_squeeze %50 : memref<1x512xf32, #tpu.memory_space<any>> -> memref<512xf32, #tpu.memory_space<any>>
    %c0_i32_23 = arith.constant 0 : i32
    %52 = tpu.memref_slice %arg4[%c7_i32, %c0_i32_23] : memref<16x512xf32, #tpu.memory_space<vmem>> -> memref<1x512xf32, #tpu.memory_space<vmem>>
    %53 = tpu.memref_squeeze %52 : memref<1x512xf32, #tpu.memory_space<vmem>> -> memref<512xf32, #tpu.memory_space<vmem>>
    %54 = tpu.memref_slice %arg5[%c7_i32_21] : memref<16x!tpu.dma_semaphore, #tpu.memory_space<semaphore_mem>> -> memref<1x!tpu.dma_semaphore, #tpu.memory_space<semaphore_mem>>
    %55 = tpu.memref_squeeze %54 : memref<1x!tpu.dma_semaphore, #tpu.memory_space<semaphore_mem>> -> memref<!tpu.dma_semaphore, #tpu.memory_space<semaphore_mem>>
    tpu.enqueue_dma source(%51 : memref<512xf32, #tpu.memory_space<any>>) target(%53 : memref<512xf32, #tpu.memory_space<vmem>>) target_semaphore(%55 : memref<!tpu.dma_semaphore, #tpu.memory_space<semaphore_mem>>)
    %c8 = arith.constant 8 : index
    %56 = memref.load %arg0[%c8] : memref<16xi32, #tpu.memory_space<smem>>
    %c8_i32 = arith.constant 8 : i32
    %c8_i32_24 = arith.constant 8 : i32
    %c0_i32_25 = arith.constant 0 : i32
    %57 = tpu.memref_slice %arg1[%56, %c0_i32_25] : memref<1000x512xf32, #tpu.memory_space<any>> -> memref<1x512xf32, #tpu.memory_space<any>>
    %58 = tpu.memref_squeeze %57 : memref<1x512xf32, #tpu.memory_space<any>> -> memref<512xf32, #tpu.memory_space<any>>
    %c0_i32_26 = arith.constant 0 : i32
    %59 = tpu.memref_slice %arg4[%c8_i32, %c0_i32_26] : memref<16x512xf32, #tpu.memory_space<vmem>> -> memref<1x512xf32, #tpu.memory_space<vmem>>
    %60 = tpu.memref_squeeze %59 : memref<1x512xf32, #tpu.memory_space<vmem>> -> memref<512xf32, #tpu.memory_space<vmem>>
    %61 = tpu.memref_slice %arg5[%c8_i32_24] : memref<16x!tpu.dma_semaphore, #tpu.memory_space<semaphore_mem>> -> memref<1x!tpu.dma_semaphore, #tpu.memory_space<semaphore_mem>>
    %62 = tpu.memref_squeeze %61 : memref<1x!tpu.dma_semaphore, #tpu.memory_space<semaphore_mem>> -> memref<!tpu.dma_semaphore, #tpu.memory_space<semaphore_mem>>
    tpu.enqueue_dma source(%58 : memref<512xf32, #tpu.memory_space<any>>) target(%60 : memref<512xf32, #tpu.memory_space<vmem>>) target_semaphore(%62 : memref<!tpu.dma_semaphore, #tpu.memory_space<semaphore_mem>>)
    %c9 = arith.constant 9 : index
    %63 = memref.load %arg0[%c9] : memref<16xi32, #tpu.memory_space<smem>>
    %c9_i32 = arith.constant 9 : i32
    %c9_i32_27 = arith.constant 9 : i32
    %c0_i32_28 = arith.constant 0 : i32
    %64 = tpu.memref_slice %arg1[%63, %c0_i32_28] : memref<1000x512xf32, #tpu.memory_space<any>> -> memref<1x512xf32, #tpu.memory_space<any>>
    %65 = tpu.memref_squeeze %64 : memref<1x512xf32, #tpu.memory_space<any>> -> memref<512xf32, #tpu.memory_space<any>>
    %c0_i32_29 = arith.constant 0 : i32
    %66 = tpu.memref_slice %arg4[%c9_i32, %c0_i32_29] : memref<16x512xf32, #tpu.memory_space<vmem>> -> memref<1x512xf32, #tpu.memory_space<vmem>>
    %67 = tpu.memref_squeeze %66 : memref<1x512xf32, #tpu.memory_space<vmem>> -> memref<512xf32, #tpu.memory_space<vmem>>
    %68 = tpu.memref_slice %arg5[%c9_i32_27] : memref<16x!tpu.dma_semaphore, #tpu.memory_space<semaphore_mem>> -> memref<1x!tpu.dma_semaphore, #tpu.memory_space<semaphore_mem>>
    %69 = tpu.memref_squeeze %68 : memref<1x!tpu.dma_semaphore, #tpu.memory_space<semaphore_mem>> -> memref<!tpu.dma_semaphore, #tpu.memory_space<semaphore_mem>>
    tpu.enqueue_dma source(%65 : memref<512xf32, #tpu.memory_space<any>>) target(%67 : memref<512xf32, #tpu.memory_space<vmem>>) target_semaphore(%69 : memref<!tpu.dma_semaphore, #tpu.memory_space<semaphore_mem>>)
    %c10 = arith.constant 10 : index
    %70 = memref.load %arg0[%c10] : memref<16xi32, #tpu.memory_space<smem>>
    %c10_i32 = arith.constant 10 : i32
    %c10_i32_30 = arith.constant 10 : i32
    %c0_i32_31 = arith.constant 0 : i32
    %71 = tpu.memref_slice %arg1[%70, %c0_i32_31] : memref<1000x512xf32, #tpu.memory_space<any>> -> memref<1x512xf32, #tpu.memory_space<any>>
    %72 = tpu.memref_squeeze %71 : memref<1x512xf32, #tpu.memory_space<any>> -> memref<512xf32, #tpu.memory_space<any>>
    %c0_i32_32 = arith.constant 0 : i32
    %73 = tpu.memref_slice %arg4[%c10_i32, %c0_i32_32] : memref<16x512xf32, #tpu.memory_space<vmem>> -> memref<1x512xf32, #tpu.memory_space<vmem>>
    %74 = tpu.memref_squeeze %73 : memref<1x512xf32, #tpu.memory_space<vmem>> -> memref<512xf32, #tpu.memory_space<vmem>>
    %75 = tpu.memref_slice %arg5[%c10_i32_30] : memref<16x!tpu.dma_semaphore, #tpu.memory_space<semaphore_mem>> -> memref<1x!tpu.dma_semaphore, #tpu.memory_space<semaphore_mem>>
    %76 = tpu.memref_squeeze %75 : memref<1x!tpu.dma_semaphore, #tpu.memory_space<semaphore_mem>> -> memref<!tpu.dma_semaphore, #tpu.memory_space<semaphore_mem>>
    tpu.enqueue_dma source(%72 : memref<512xf32, #tpu.memory_space<any>>) target(%74 : memref<512xf32, #tpu.memory_space<vmem>>) target_semaphore(%76 : memref<!tpu.dma_semaphore, #tpu.memory_space<semaphore_mem>>)
    %c11 = arith.constant 11 : index
    %77 = memref.load %arg0[%c11] : memref<16xi32, #tpu.memory_space<smem>>
    %c11_i32 = arith.constant 11 : i32
    %c11_i32_33 = arith.constant 11 : i32
    %c0_i32_34 = arith.constant 0 : i32
    %78 = tpu.memref_slice %arg1[%77, %c0_i32_34] : memref<1000x512xf32, #tpu.memory_space<any>> -> memref<1x512xf32, #tpu.memory_space<any>>
    %79 = tpu.memref_squeeze %78 : memref<1x512xf32, #tpu.memory_space<any>> -> memref<512xf32, #tpu.memory_space<any>>
    %c0_i32_35 = arith.constant 0 : i32
    %80 = tpu.memref_slice %arg4[%c11_i32, %c0_i32_35] : memref<16x512xf32, #tpu.memory_space<vmem>> -> memref<1x512xf32, #tpu.memory_space<vmem>>
    %81 = tpu.memref_squeeze %80 : memref<1x512xf32, #tpu.memory_space<vmem>> -> memref<512xf32, #tpu.memory_space<vmem>>
    %82 = tpu.memref_slice %arg5[%c11_i32_33] : memref<16x!tpu.dma_semaphore, #tpu.memory_space<semaphore_mem>> -> memref<1x!tpu.dma_semaphore, #tpu.memory_space<semaphore_mem>>
    %83 = tpu.memref_squeeze %82 : memref<1x!tpu.dma_semaphore, #tpu.memory_space<semaphore_mem>> -> memref<!tpu.dma_semaphore, #tpu.memory_space<semaphore_mem>>
    tpu.enqueue_dma source(%79 : memref<512xf32, #tpu.memory_space<any>>) target(%81 : memref<512xf32, #tpu.memory_space<vmem>>) target_semaphore(%83 : memref<!tpu.dma_semaphore, #tpu.memory_space<semaphore_mem>>)
    %c12 = arith.constant 12 : index
    %84 = memref.load %arg0[%c12] : memref<16xi32, #tpu.memory_space<smem>>
    %c12_i32 = arith.constant 12 : i32
    %c12_i32_36 = arith.constant 12 : i32
    %c0_i32_37 = arith.constant 0 : i32
    %85 = tpu.memref_slice %arg1[%84, %c0_i32_37] : memref<1000x512xf32, #tpu.memory_space<any>> -> memref<1x512xf32, #tpu.memory_space<any>>
    %86 = tpu.memref_squeeze %85 : memref<1x512xf32, #tpu.memory_space<any>> -> memref<512xf32, #tpu.memory_space<any>>
    %c0_i32_38 = arith.constant 0 : i32
    %87 = tpu.memref_slice %arg4[%c12_i32, %c0_i32_38] : memref<16x512xf32, #tpu.memory_space<vmem>> -> memref<1x512xf32, #tpu.memory_space<vmem>>
    %88 = tpu.memref_squeeze %87 : memref<1x512xf32, #tpu.memory_space<vmem>> -> memref<512xf32, #tpu.memory_space<vmem>>
    %89 = tpu.memref_slice %arg5[%c12_i32_36] : memref<16x!tpu.dma_semaphore, #tpu.memory_space<semaphore_mem>> -> memref<1x!tpu.dma_semaphore, #tpu.memory_space<semaphore_mem>>
    %90 = tpu.memref_squeeze %89 : memref<1x!tpu.dma_semaphore, #tpu.memory_space<semaphore_mem>> -> memref<!tpu.dma_semaphore, #tpu.memory_space<semaphore_mem>>
    tpu.enqueue_dma source(%86 : memref<512xf32, #tpu.memory_space<any>>) target(%88 : memref<512xf32, #tpu.memory_space<vmem>>) target_semaphore(%90 : memref<!tpu.dma_semaphore, #tpu.memory_space<semaphore_mem>>)
    %c13 = arith.constant 13 : index
    %91 = memref.load %arg0[%c13] : memref<16xi32, #tpu.memory_space<smem>>
    %c13_i32 = arith.constant 13 : i32
    %c13_i32_39 = arith.constant 13 : i32
    %c0_i32_40 = arith.constant 0 : i32
    %92 = tpu.memref_slice %arg1[%91, %c0_i32_40] : memref<1000x512xf32, #tpu.memory_space<any>> -> memref<1x512xf32, #tpu.memory_space<any>>
    %93 = tpu.memref_squeeze %92 : memref<1x512xf32, #tpu.memory_space<any>> -> memref<512xf32, #tpu.memory_space<any>>
    %c0_i32_41 = arith.constant 0 : i32
    %94 = tpu.memref_slice %arg4[%c13_i32, %c0_i32_41] : memref<16x512xf32, #tpu.memory_space<vmem>> -> memref<1x512xf32, #tpu.memory_space<vmem>>
    %95 = tpu.memref_squeeze %94 : memref<1x512xf32, #tpu.memory_space<vmem>> -> memref<512xf32, #tpu.memory_space<vmem>>
    %96 = tpu.memref_slice %arg5[%c13_i32_39] : memref<16x!tpu.dma_semaphore, #tpu.memory_space<semaphore_mem>> -> memref<1x!tpu.dma_semaphore, #tpu.memory_space<semaphore_mem>>
    %97 = tpu.memref_squeeze %96 : memref<1x!tpu.dma_semaphore, #tpu.memory_space<semaphore_mem>> -> memref<!tpu.dma_semaphore, #tpu.memory_space<semaphore_mem>>
    tpu.enqueue_dma source(%93 : memref<512xf32, #tpu.memory_space<any>>) target(%95 : memref<512xf32, #tpu.memory_space<vmem>>) target_semaphore(%97 : memref<!tpu.dma_semaphore, #tpu.memory_space<semaphore_mem>>)
    %c14 = arith.constant 14 : index
    %98 = memref.load %arg0[%c14] : memref<16xi32, #tpu.memory_space<smem>>
    %c14_i32 = arith.constant 14 : i32
    %c14_i32_42 = arith.constant 14 : i32
    %c0_i32_43 = arith.constant 0 : i32
    %99 = tpu.memref_slice %arg1[%98, %c0_i32_43] : memref<1000x512xf32, #tpu.memory_space<any>> -> memref<1x512xf32, #tpu.memory_space<any>>
    %100 = tpu.memref_squeeze %99 : memref<1x512xf32, #tpu.memory_space<any>> -> memref<512xf32, #tpu.memory_space<any>>
    %c0_i32_44 = arith.constant 0 : i32
    %101 = tpu.memref_slice %arg4[%c14_i32, %c0_i32_44] : memref<16x512xf32, #tpu.memory_space<vmem>> -> memref<1x512xf32, #tpu.memory_space<vmem>>
    %102 = tpu.memref_squeeze %101 : memref<1x512xf32, #tpu.memory_space<vmem>> -> memref<512xf32, #tpu.memory_space<vmem>>
    %103 = tpu.memref_slice %arg5[%c14_i32_42] : memref<16x!tpu.dma_semaphore, #tpu.memory_space<semaphore_mem>> -> memref<1x!tpu.dma_semaphore, #tpu.memory_space<semaphore_mem>>
    %104 = tpu.memref_squeeze %103 : memref<1x!tpu.dma_semaphore, #tpu.memory_space<semaphore_mem>> -> memref<!tpu.dma_semaphore, #tpu.memory_space<semaphore_mem>>
    tpu.enqueue_dma source(%100 : memref<512xf32, #tpu.memory_space<any>>) target(%102 : memref<512xf32, #tpu.memory_space<vmem>>) target_semaphore(%104 : memref<!tpu.dma_semaphore, #tpu.memory_space<semaphore_mem>>)
    %c15 = arith.constant 15 : index
    %105 = memref.load %arg0[%c15] : memref<16xi32, #tpu.memory_space<smem>>
    %c15_i32 = arith.constant 15 : i32
    %c15_i32_45 = arith.constant 15 : i32
    %c0_i32_46 = arith.constant 0 : i32
    %106 = tpu.memref_slice %arg1[%105, %c0_i32_46] : memref<1000x512xf32, #tpu.memory_space<any>> -> memref<1x512xf32, #tpu.memory_space<any>>
    %107 = tpu.memref_squeeze %106 : memref<1x512xf32, #tpu.memory_space<any>> -> memref<512xf32, #tpu.memory_space<any>>
    %c0_i32_47 = arith.constant 0 : i32
    %108 = tpu.memref_slice %arg4[%c15_i32, %c0_i32_47] : memref<16x512xf32, #tpu.memory_space<vmem>> -> memref<1x512xf32, #tpu.memory_space<vmem>>
    %109 = tpu.memref_squeeze %108 : memref<1x512xf32, #tpu.memory_space<vmem>> -> memref<512xf32, #tpu.memory_space<vmem>>
    %110 = tpu.memref_slice %arg5[%c15_i32_45] : memref<16x!tpu.dma_semaphore, #tpu.memory_space<semaphore_mem>> -> memref<1x!tpu.dma_semaphore, #tpu.memory_space<semaphore_mem>>
    %111 = tpu.memref_squeeze %110 : memref<1x!tpu.dma_semaphore, #tpu.memory_space<semaphore_mem>> -> memref<!tpu.dma_semaphore, #tpu.memory_space<semaphore_mem>>
    tpu.enqueue_dma source(%107 : memref<512xf32, #tpu.memory_space<any>>) target(%109 : memref<512xf32, #tpu.memory_space<vmem>>) target_semaphore(%111 : memref<!tpu.dma_semaphore, #tpu.memory_space<semaphore_mem>>)
    %c0_48 = arith.constant 0 : index
    %c0_49 = arith.constant 0 : index
    %112 = vector.load %arg2[%c0_48, %c0_49] : memref<112x512xf32, #tpu.memory_space<vmem>>, vector<40x512xf32>
    %c0_i32_50 = arith.constant 0 : i32
    %c0_i32_51 = arith.constant 0 : i32
    %c0_i32_52 = arith.constant 0 : i32
    %113 = tpu.memref_slice %arg1[%0, %c0_i32_52] : memref<1000x512xf32, #tpu.memory_space<any>> -> memref<1x512xf32, #tpu.memory_space<any>>
    %114 = tpu.memref_squeeze %113 : memref<1x512xf32, #tpu.memory_space<any>> -> memref<512xf32, #tpu.memory_space<any>>
    %c0_i32_53 = arith.constant 0 : i32
    %115 = tpu.memref_slice %arg4[%c0_i32_50, %c0_i32_53] : memref<16x512xf32, #tpu.memory_space<vmem>> -> memref<1x512xf32, #tpu.memory_space<vmem>>
    %116 = tpu.memref_squeeze %115 : memref<1x512xf32, #tpu.memory_space<vmem>> -> memref<512xf32, #tpu.memory_space<vmem>>
    %117 = tpu.memref_slice %arg5[%c0_i32_51] : memref<16x!tpu.dma_semaphore, #tpu.memory_space<semaphore_mem>> -> memref<1x!tpu.dma_semaphore, #tpu.memory_space<semaphore_mem>>
    %118 = tpu.memref_squeeze %117 : memref<1x!tpu.dma_semaphore, #tpu.memory_space<semaphore_mem>> -> memref<!tpu.dma_semaphore, #tpu.memory_space<semaphore_mem>>
    tpu.wait_dma2 semaphore(%118 : memref<!tpu.dma_semaphore, #tpu.memory_space<semaphore_mem>>) src(%114 : memref<512xf32, #tpu.memory_space<any>>) dst(%116 : memref<512xf32, #tpu.memory_space<vmem>>)
    %c1_i32_54 = arith.constant 1 : i32
    %c1_i32_55 = arith.constant 1 : i32
    %c0_i32_56 = arith.constant 0 : i32
    %119 = tpu.memref_slice %arg1[%7, %c0_i32_56] : memref<1000x512xf32, #tpu.memory_space<any>> -> memref<1x512xf32, #tpu.memory_space<any>>
    %120 = tpu.memref_squeeze %119 : memref<1x512xf32, #tpu.memory_space<any>> -> memref<512xf32, #tpu.memory_space<any>>
    %c0_i32_57 = arith.constant 0 : i32
    %121 = tpu.memref_slice %arg4[%c1_i32_54, %c0_i32_57] : memref<16x512xf32, #tpu.memory_space<vmem>> -> memref<1x512xf32, #tpu.memory_space<vmem>>
    %122 = tpu.memref_squeeze %121 : memref<1x512xf32, #tpu.memory_space<vmem>> -> memref<512xf32, #tpu.memory_space<vmem>>
    %123 = tpu.memref_slice %arg5[%c1_i32_55] : memref<16x!tpu.dma_semaphore, #tpu.memory_space<semaphore_mem>> -> memref<1x!tpu.dma_semaphore, #tpu.memory_space<semaphore_mem>>
    %124 = tpu.memref_squeeze %123 : memref<1x!tpu.dma_semaphore, #tpu.memory_space<semaphore_mem>> -> memref<!tpu.dma_semaphore, #tpu.memory_space<semaphore_mem>>
    tpu.wait_dma2 semaphore(%124 : memref<!tpu.dma_semaphore, #tpu.memory_space<semaphore_mem>>) src(%120 : memref<512xf32, #tpu.memory_space<any>>) dst(%122 : memref<512xf32, #tpu.memory_space<vmem>>)
    %c2_i32_58 = arith.constant 2 : i32
    %c2_i32_59 = arith.constant 2 : i32
    %c0_i32_60 = arith.constant 0 : i32
    %125 = tpu.memref_slice %arg1[%14, %c0_i32_60] : memref<1000x512xf32, #tpu.memory_space<any>> -> memref<1x512xf32, #tpu.memory_space<any>>
    %126 = tpu.memref_squeeze %125 : memref<1x512xf32, #tpu.memory_space<any>> -> memref<512xf32, #tpu.memory_space<any>>
    %c0_i32_61 = arith.constant 0 : i32
    %127 = tpu.memref_slice %arg4[%c2_i32_58, %c0_i32_61] : memref<16x512xf32, #tpu.memory_space<vmem>> -> memref<1x512xf32, #tpu.memory_space<vmem>>
    %128 = tpu.memref_squeeze %127 : memref<1x512xf32, #tpu.memory_space<vmem>> -> memref<512xf32, #tpu.memory_space<vmem>>
    %129 = tpu.memref_slice %arg5[%c2_i32_59] : memref<16x!tpu.dma_semaphore, #tpu.memory_space<semaphore_mem>> -> memref<1x!tpu.dma_semaphore, #tpu.memory_space<semaphore_mem>>
    %130 = tpu.memref_squeeze %129 : memref<1x!tpu.dma_semaphore, #tpu.memory_space<semaphore_mem>> -> memref<!tpu.dma_semaphore, #tpu.memory_space<semaphore_mem>>
    tpu.wait_dma2 semaphore(%130 : memref<!tpu.dma_semaphore, #tpu.memory_space<semaphore_mem>>) src(%126 : memref<512xf32, #tpu.memory_space<any>>) dst(%128 : memref<512xf32, #tpu.memory_space<vmem>>)
    %c3_i32_62 = arith.constant 3 : i32
    %c3_i32_63 = arith.constant 3 : i32
    %c0_i32_64 = arith.constant 0 : i32
    %131 = tpu.memref_slice %arg1[%21, %c0_i32_64] : memref<1000x512xf32, #tpu.memory_space<any>> -> memref<1x512xf32, #tpu.memory_space<any>>
    %132 = tpu.memref_squeeze %131 : memref<1x512xf32, #tpu.memory_space<any>> -> memref<512xf32, #tpu.memory_space<any>>
    %c0_i32_65 = arith.constant 0 : i32
    %133 = tpu.memref_slice %arg4[%c3_i32_62, %c0_i32_65] : memref<16x512xf32, #tpu.memory_space<vmem>> -> memref<1x512xf32, #tpu.memory_space<vmem>>
    %134 = tpu.memref_squeeze %133 : memref<1x512xf32, #tpu.memory_space<vmem>> -> memref<512xf32, #tpu.memory_space<vmem>>
    %135 = tpu.memref_slice %arg5[%c3_i32_63] : memref<16x!tpu.dma_semaphore, #tpu.memory_space<semaphore_mem>> -> memref<1x!tpu.dma_semaphore, #tpu.memory_space<semaphore_mem>>
    %136 = tpu.memref_squeeze %135 : memref<1x!tpu.dma_semaphore, #tpu.memory_space<semaphore_mem>> -> memref<!tpu.dma_semaphore, #tpu.memory_space<semaphore_mem>>
    tpu.wait_dma2 semaphore(%136 : memref<!tpu.dma_semaphore, #tpu.memory_space<semaphore_mem>>) src(%132 : memref<512xf32, #tpu.memory_space<any>>) dst(%134 : memref<512xf32, #tpu.memory_space<vmem>>)
    %c4_i32_66 = arith.constant 4 : i32
    %c4_i32_67 = arith.constant 4 : i32
    %c0_i32_68 = arith.constant 0 : i32
    %137 = tpu.memref_slice %arg1[%28, %c0_i32_68] : memref<1000x512xf32, #tpu.memory_space<any>> -> memref<1x512xf32, #tpu.memory_space<any>>
    %138 = tpu.memref_squeeze %137 : memref<1x512xf32, #tpu.memory_space<any>> -> memref<512xf32, #tpu.memory_space<any>>
    %c0_i32_69 = arith.constant 0 : i32
    %139 = tpu.memref_slice %arg4[%c4_i32_66, %c0_i32_69] : memref<16x512xf32, #tpu.memory_space<vmem>> -> memref<1x512xf32, #tpu.memory_space<vmem>>
    %140 = tpu.memref_squeeze %139 : memref<1x512xf32, #tpu.memory_space<vmem>> -> memref<512xf32, #tpu.memory_space<vmem>>
    %141 = tpu.memref_slice %arg5[%c4_i32_67] : memref<16x!tpu.dma_semaphore, #tpu.memory_space<semaphore_mem>> -> memref<1x!tpu.dma_semaphore, #tpu.memory_space<semaphore_mem>>
    %142 = tpu.memref_squeeze %141 : memref<1x!tpu.dma_semaphore, #tpu.memory_space<semaphore_mem>> -> memref<!tpu.dma_semaphore, #tpu.memory_space<semaphore_mem>>
    tpu.wait_dma2 semaphore(%142 : memref<!tpu.dma_semaphore, #tpu.memory_space<semaphore_mem>>) src(%138 : memref<512xf32, #tpu.memory_space<any>>) dst(%140 : memref<512xf32, #tpu.memory_space<vmem>>)
    %c5_i32_70 = arith.constant 5 : i32
    %c5_i32_71 = arith.constant 5 : i32
    %c0_i32_72 = arith.constant 0 : i32
    %143 = tpu.memref_slice %arg1[%35, %c0_i32_72] : memref<1000x512xf32, #tpu.memory_space<any>> -> memref<1x512xf32, #tpu.memory_space<any>>
    %144 = tpu.memref_squeeze %143 : memref<1x512xf32, #tpu.memory_space<any>> -> memref<512xf32, #tpu.memory_space<any>>
    %c0_i32_73 = arith.constant 0 : i32
    %145 = tpu.memref_slice %arg4[%c5_i32_70, %c0_i32_73] : memref<16x512xf32, #tpu.memory_space<vmem>> -> memref<1x512xf32, #tpu.memory_space<vmem>>
    %146 = tpu.memref_squeeze %145 : memref<1x512xf32, #tpu.memory_space<vmem>> -> memref<512xf32, #tpu.memory_space<vmem>>
    %147 = tpu.memref_slice %arg5[%c5_i32_71] : memref<16x!tpu.dma_semaphore, #tpu.memory_space<semaphore_mem>> -> memref<1x!tpu.dma_semaphore, #tpu.memory_space<semaphore_mem>>
    %148 = tpu.memref_squeeze %147 : memref<1x!tpu.dma_semaphore, #tpu.memory_space<semaphore_mem>> -> memref<!tpu.dma_semaphore, #tpu.memory_space<semaphore_mem>>
    tpu.wait_dma2 semaphore(%148 : memref<!tpu.dma_semaphore, #tpu.memory_space<semaphore_mem>>) src(%144 : memref<512xf32, #tpu.memory_space<any>>) dst(%146 : memref<512xf32, #tpu.memory_space<vmem>>)
    %c6_i32_74 = arith.constant 6 : i32
    %c6_i32_75 = arith.constant 6 : i32
    %c0_i32_76 = arith.constant 0 : i32
    %149 = tpu.memref_slice %arg1[%42, %c0_i32_76] : memref<1000x512xf32, #tpu.memory_space<any>> -> memref<1x512xf32, #tpu.memory_space<any>>
    %150 = tpu.memref_squeeze %149 : memref<1x512xf32, #tpu.memory_space<any>> -> memref<512xf32, #tpu.memory_space<any>>
    %c0_i32_77 = arith.constant 0 : i32
    %151 = tpu.memref_slice %arg4[%c6_i32_74, %c0_i32_77] : memref<16x512xf32, #tpu.memory_space<vmem>> -> memref<1x512xf32, #tpu.memory_space<vmem>>
    %152 = tpu.memref_squeeze %151 : memref<1x512xf32, #tpu.memory_space<vmem>> -> memref<512xf32, #tpu.memory_space<vmem>>
    %153 = tpu.memref_slice %arg5[%c6_i32_75] : memref<16x!tpu.dma_semaphore, #tpu.memory_space<semaphore_mem>> -> memref<1x!tpu.dma_semaphore, #tpu.memory_space<semaphore_mem>>
    %154 = tpu.memref_squeeze %153 : memref<1x!tpu.dma_semaphore, #tpu.memory_space<semaphore_mem>> -> memref<!tpu.dma_semaphore, #tpu.memory_space<semaphore_mem>>
    tpu.wait_dma2 semaphore(%154 : memref<!tpu.dma_semaphore, #tpu.memory_space<semaphore_mem>>) src(%150 : memref<512xf32, #tpu.memory_space<any>>) dst(%152 : memref<512xf32, #tpu.memory_space<vmem>>)
    %c7_i32_78 = arith.constant 7 : i32
    %c7_i32_79 = arith.constant 7 : i32
    %c0_i32_80 = arith.constant 0 : i32
    %155 = tpu.memref_slice %arg1[%49, %c0_i32_80] : memref<1000x512xf32, #tpu.memory_space<any>> -> memref<1x512xf32, #tpu.memory_space<any>>
    %156 = tpu.memref_squeeze %155 : memref<1x512xf32, #tpu.memory_space<any>> -> memref<512xf32, #tpu.memory_space<any>>
    %c0_i32_81 = arith.constant 0 : i32
    %157 = tpu.memref_slice %arg4[%c7_i32_78, %c0_i32_81] : memref<16x512xf32, #tpu.memory_space<vmem>> -> memref<1x512xf32, #tpu.memory_space<vmem>>
    %158 = tpu.memref_squeeze %157 : memref<1x512xf32, #tpu.memory_space<vmem>> -> memref<512xf32, #tpu.memory_space<vmem>>
    %159 = tpu.memref_slice %arg5[%c7_i32_79] : memref<16x!tpu.dma_semaphore, #tpu.memory_space<semaphore_mem>> -> memref<1x!tpu.dma_semaphore, #tpu.memory_space<semaphore_mem>>
    %160 = tpu.memref_squeeze %159 : memref<1x!tpu.dma_semaphore, #tpu.memory_space<semaphore_mem>> -> memref<!tpu.dma_semaphore, #tpu.memory_space<semaphore_mem>>
    tpu.wait_dma2 semaphore(%160 : memref<!tpu.dma_semaphore, #tpu.memory_space<semaphore_mem>>) src(%156 : memref<512xf32, #tpu.memory_space<any>>) dst(%158 : memref<512xf32, #tpu.memory_space<vmem>>)
    %c8_i32_82 = arith.constant 8 : i32
    %c8_i32_83 = arith.constant 8 : i32
    %c0_i32_84 = arith.constant 0 : i32
    %161 = tpu.memref_slice %arg1[%56, %c0_i32_84] : memref<1000x512xf32, #tpu.memory_space<any>> -> memref<1x512xf32, #tpu.memory_space<any>>
    %162 = tpu.memref_squeeze %161 : memref<1x512xf32, #tpu.memory_space<any>> -> memref<512xf32, #tpu.memory_space<any>>
    %c0_i32_85 = arith.constant 0 : i32
    %163 = tpu.memref_slice %arg4[%c8_i32_82, %c0_i32_85] : memref<16x512xf32, #tpu.memory_space<vmem>> -> memref<1x512xf32, #tpu.memory_space<vmem>>
    %164 = tpu.memref_squeeze %163 : memref<1x512xf32, #tpu.memory_space<vmem>> -> memref<512xf32, #tpu.memory_space<vmem>>
    %165 = tpu.memref_slice %arg5[%c8_i32_83] : memref<16x!tpu.dma_semaphore, #tpu.memory_space<semaphore_mem>> -> memref<1x!tpu.dma_semaphore, #tpu.memory_space<semaphore_mem>>
    %166 = tpu.memref_squeeze %165 : memref<1x!tpu.dma_semaphore, #tpu.memory_space<semaphore_mem>> -> memref<!tpu.dma_semaphore, #tpu.memory_space<semaphore_mem>>
    tpu.wait_dma2 semaphore(%166 : memref<!tpu.dma_semaphore, #tpu.memory_space<semaphore_mem>>) src(%162 : memref<512xf32, #tpu.memory_space<any>>) dst(%164 : memref<512xf32, #tpu.memory_space<vmem>>)
    %c9_i32_86 = arith.constant 9 : i32
    %c9_i32_87 = arith.constant 9 : i32
    %c0_i32_88 = arith.constant 0 : i32
    %167 = tpu.memref_slice %arg1[%63, %c0_i32_88] : memref<1000x512xf32, #tpu.memory_space<any>> -> memref<1x512xf32, #tpu.memory_space<any>>
    %168 = tpu.memref_squeeze %167 : memref<1x512xf32, #tpu.memory_space<any>> -> memref<512xf32, #tpu.memory_space<any>>
    %c0_i32_89 = arith.constant 0 : i32
    %169 = tpu.memref_slice %arg4[%c9_i32_86, %c0_i32_89] : memref<16x512xf32, #tpu.memory_space<vmem>> -> memref<1x512xf32, #tpu.memory_space<vmem>>
    %170 = tpu.memref_squeeze %169 : memref<1x512xf32, #tpu.memory_space<vmem>> -> memref<512xf32, #tpu.memory_space<vmem>>
    %171 = tpu.memref_slice %arg5[%c9_i32_87] : memref<16x!tpu.dma_semaphore, #tpu.memory_space<semaphore_mem>> -> memref<1x!tpu.dma_semaphore, #tpu.memory_space<semaphore_mem>>
    %172 = tpu.memref_squeeze %171 : memref<1x!tpu.dma_semaphore, #tpu.memory_space<semaphore_mem>> -> memref<!tpu.dma_semaphore, #tpu.memory_space<semaphore_mem>>
    tpu.wait_dma2 semaphore(%172 : memref<!tpu.dma_semaphore, #tpu.memory_space<semaphore_mem>>) src(%168 : memref<512xf32, #tpu.memory_space<any>>) dst(%170 : memref<512xf32, #tpu.memory_space<vmem>>)
    %c10_i32_90 = arith.constant 10 : i32
    %c10_i32_91 = arith.constant 10 : i32
    %c0_i32_92 = arith.constant 0 : i32
    %173 = tpu.memref_slice %arg1[%70, %c0_i32_92] : memref<1000x512xf32, #tpu.memory_space<any>> -> memref<1x512xf32, #tpu.memory_space<any>>
    %174 = tpu.memref_squeeze %173 : memref<1x512xf32, #tpu.memory_space<any>> -> memref<512xf32, #tpu.memory_space<any>>
    %c0_i32_93 = arith.constant 0 : i32
    %175 = tpu.memref_slice %arg4[%c10_i32_90, %c0_i32_93] : memref<16x512xf32, #tpu.memory_space<vmem>> -> memref<1x512xf32, #tpu.memory_space<vmem>>
    %176 = tpu.memref_squeeze %175 : memref<1x512xf32, #tpu.memory_space<vmem>> -> memref<512xf32, #tpu.memory_space<vmem>>
    %177 = tpu.memref_slice %arg5[%c10_i32_91] : memref<16x!tpu.dma_semaphore, #tpu.memory_space<semaphore_mem>> -> memref<1x!tpu.dma_semaphore, #tpu.memory_space<semaphore_mem>>
    %178 = tpu.memref_squeeze %177 : memref<1x!tpu.dma_semaphore, #tpu.memory_space<semaphore_mem>> -> memref<!tpu.dma_semaphore, #tpu.memory_space<semaphore_mem>>
    tpu.wait_dma2 semaphore(%178 : memref<!tpu.dma_semaphore, #tpu.memory_space<semaphore_mem>>) src(%174 : memref<512xf32, #tpu.memory_space<any>>) dst(%176 : memref<512xf32, #tpu.memory_space<vmem>>)
    %c11_i32_94 = arith.constant 11 : i32
    %c11_i32_95 = arith.constant 11 : i32
    %c0_i32_96 = arith.constant 0 : i32
    %179 = tpu.memref_slice %arg1[%77, %c0_i32_96] : memref<1000x512xf32, #tpu.memory_space<any>> -> memref<1x512xf32, #tpu.memory_space<any>>
    %180 = tpu.memref_squeeze %179 : memref<1x512xf32, #tpu.memory_space<any>> -> memref<512xf32, #tpu.memory_space<any>>
    %c0_i32_97 = arith.constant 0 : i32
    %181 = tpu.memref_slice %arg4[%c11_i32_94, %c0_i32_97] : memref<16x512xf32, #tpu.memory_space<vmem>> -> memref<1x512xf32, #tpu.memory_space<vmem>>
    %182 = tpu.memref_squeeze %181 : memref<1x512xf32, #tpu.memory_space<vmem>> -> memref<512xf32, #tpu.memory_space<vmem>>
    %183 = tpu.memref_slice %arg5[%c11_i32_95] : memref<16x!tpu.dma_semaphore, #tpu.memory_space<semaphore_mem>> -> memref<1x!tpu.dma_semaphore, #tpu.memory_space<semaphore_mem>>
    %184 = tpu.memref_squeeze %183 : memref<1x!tpu.dma_semaphore, #tpu.memory_space<semaphore_mem>> -> memref<!tpu.dma_semaphore, #tpu.memory_space<semaphore_mem>>
    tpu.wait_dma2 semaphore(%184 : memref<!tpu.dma_semaphore, #tpu.memory_space<semaphore_mem>>) src(%180 : memref<512xf32, #tpu.memory_space<any>>) dst(%182 : memref<512xf32, #tpu.memory_space<vmem>>)
    %c12_i32_98 = arith.constant 12 : i32
    %c12_i32_99 = arith.constant 12 : i32
    %c0_i32_100 = arith.constant 0 : i32
    %185 = tpu.memref_slice %arg1[%84, %c0_i32_100] : memref<1000x512xf32, #tpu.memory_space<any>> -> memref<1x512xf32, #tpu.memory_space<any>>
    %186 = tpu.memref_squeeze %185 : memref<1x512xf32, #tpu.memory_space<any>> -> memref<512xf32, #tpu.memory_space<any>>
    %c0_i32_101 = arith.constant 0 : i32
    %187 = tpu.memref_slice %arg4[%c12_i32_98, %c0_i32_101] : memref<16x512xf32, #tpu.memory_space<vmem>> -> memref<1x512xf32, #tpu.memory_space<vmem>>
    %188 = tpu.memref_squeeze %187 : memref<1x512xf32, #tpu.memory_space<vmem>> -> memref<512xf32, #tpu.memory_space<vmem>>
    %189 = tpu.memref_slice %arg5[%c12_i32_99] : memref<16x!tpu.dma_semaphore, #tpu.memory_space<semaphore_mem>> -> memref<1x!tpu.dma_semaphore, #tpu.memory_space<semaphore_mem>>
    %190 = tpu.memref_squeeze %189 : memref<1x!tpu.dma_semaphore, #tpu.memory_space<semaphore_mem>> -> memref<!tpu.dma_semaphore, #tpu.memory_space<semaphore_mem>>
    tpu.wait_dma2 semaphore(%190 : memref<!tpu.dma_semaphore, #tpu.memory_space<semaphore_mem>>) src(%186 : memref<512xf32, #tpu.memory_space<any>>) dst(%188 : memref<512xf32, #tpu.memory_space<vmem>>)
    %c13_i32_102 = arith.constant 13 : i32
    %c13_i32_103 = arith.constant 13 : i32
    %c0_i32_104 = arith.constant 0 : i32
    %191 = tpu.memref_slice %arg1[%91, %c0_i32_104] : memref<1000x512xf32, #tpu.memory_space<any>> -> memref<1x512xf32, #tpu.memory_space<any>>
    %192 = tpu.memref_squeeze %191 : memref<1x512xf32, #tpu.memory_space<any>> -> memref<512xf32, #tpu.memory_space<any>>
    %c0_i32_105 = arith.constant 0 : i32
    %193 = tpu.memref_slice %arg4[%c13_i32_102, %c0_i32_105] : memref<16x512xf32, #tpu.memory_space<vmem>> -> memref<1x512xf32, #tpu.memory_space<vmem>>
    %194 = tpu.memref_squeeze %193 : memref<1x512xf32, #tpu.memory_space<vmem>> -> memref<512xf32, #tpu.memory_space<vmem>>
    %195 = tpu.memref_slice %arg5[%c13_i32_103] : memref<16x!tpu.dma_semaphore, #tpu.memory_space<semaphore_mem>> -> memref<1x!tpu.dma_semaphore, #tpu.memory_space<semaphore_mem>>
    %196 = tpu.memref_squeeze %195 : memref<1x!tpu.dma_semaphore, #tpu.memory_space<semaphore_mem>> -> memref<!tpu.dma_semaphore, #tpu.memory_space<semaphore_mem>>
    tpu.wait_dma2 semaphore(%196 : memref<!tpu.dma_semaphore, #tpu.memory_space<semaphore_mem>>) src(%192 : memref<512xf32, #tpu.memory_space<any>>) dst(%194 : memref<512xf32, #tpu.memory_space<vmem>>)
    %c14_i32_106 = arith.constant 14 : i32
    %c14_i32_107 = arith.constant 14 : i32
    %c0_i32_108 = arith.constant 0 : i32
    %197 = tpu.memref_slice %arg1[%98, %c0_i32_108] : memref<1000x512xf32, #tpu.memory_space<any>> -> memref<1x512xf32, #tpu.memory_space<any>>
    %198 = tpu.memref_squeeze %197 : memref<1x512xf32, #tpu.memory_space<any>> -> memref<512xf32, #tpu.memory_space<any>>
    %c0_i32_109 = arith.constant 0 : i32
    %199 = tpu.memref_slice %arg4[%c14_i32_106, %c0_i32_109] : memref<16x512xf32, #tpu.memory_space<vmem>> -> memref<1x512xf32, #tpu.memory_space<vmem>>
    %200 = tpu.memref_squeeze %199 : memref<1x512xf32, #tpu.memory_space<vmem>> -> memref<512xf32, #tpu.memory_space<vmem>>
    %201 = tpu.memref_slice %arg5[%c14_i32_107] : memref<16x!tpu.dma_semaphore, #tpu.memory_space<semaphore_mem>> -> memref<1x!tpu.dma_semaphore, #tpu.memory_space<semaphore_mem>>
    %202 = tpu.memref_squeeze %201 : memref<1x!tpu.dma_semaphore, #tpu.memory_space<semaphore_mem>> -> memref<!tpu.dma_semaphore, #tpu.memory_space<semaphore_mem>>
    tpu.wait_dma2 semaphore(%202 : memref<!tpu.dma_semaphore, #tpu.memory_space<semaphore_mem>>) src(%198 : memref<512xf32, #tpu.memory_space<any>>) dst(%200 : memref<512xf32, #tpu.memory_space<vmem>>)
    %c15_i32_110 = arith.constant 15 : i32
    %c15_i32_111 = arith.constant 15 : i32
    %c0_i32_112 = arith.constant 0 : i32
    %203 = tpu.memref_slice %arg1[%105, %c0_i32_112] : memref<1000x512xf32, #tpu.memory_space<any>> -> memref<1x512xf32, #tpu.memory_space<any>>
    %204 = tpu.memref_squeeze %203 : memref<1x512xf32, #tpu.memory_space<any>> -> memref<512xf32, #tpu.memory_space<any>>
    %c0_i32_113 = arith.constant 0 : i32
    %205 = tpu.memref_slice %arg4[%c15_i32_110, %c0_i32_113] : memref<16x512xf32, #tpu.memory_space<vmem>> -> memref<1x512xf32, #tpu.memory_space<vmem>>
    %206 = tpu.memref_squeeze %205 : memref<1x512xf32, #tpu.memory_space<vmem>> -> memref<512xf32, #tpu.memory_space<vmem>>
    %207 = tpu.memref_slice %arg5[%c15_i32_111] : memref<16x!tpu.dma_semaphore, #tpu.memory_space<semaphore_mem>> -> memref<1x!tpu.dma_semaphore, #tpu.memory_space<semaphore_mem>>
    %208 = tpu.memref_squeeze %207 : memref<1x!tpu.dma_semaphore, #tpu.memory_space<semaphore_mem>> -> memref<!tpu.dma_semaphore, #tpu.memory_space<semaphore_mem>>
    tpu.wait_dma2 semaphore(%208 : memref<!tpu.dma_semaphore, #tpu.memory_space<semaphore_mem>>) src(%204 : memref<512xf32, #tpu.memory_space<any>>) dst(%206 : memref<512xf32, #tpu.memory_space<vmem>>)
    %cst = arith.constant 0.000000e+00 : f32
    %209 = vector.broadcast %cst : f32 to vector<2x40xf32>
    %cst_114 = arith.constant 0.000000e+00 : f32
    %210 = vector.broadcast %cst_114 : f32 to vector<2x40xf32>
    %c0_115 = arith.constant 0 : index
    %c0_116 = arith.constant 0 : index
    %211 = vector.load %arg4[%c0_115, %c0_116] : memref<16x512xf32, #tpu.memory_space<vmem>>, vector<2x512xf32>
    %cst_117 = arith.constant dense<0.000000e+00> : vector<2x512xf32>
    %212 = tpu.matmul %209, %112, %cst_117 {dimension_numbers = #tpu.dot_dimension_numbers<[1], [0], [0], [1], [0, 0, 1, 1], [], []>} : vector<2x40xf32>, vector<40x512xf32>, vector<2x512xf32> -> vector<2x512xf32>
    %213 = arith.addf %211, %212 : vector<2x512xf32>
    %214 = vector.extract_strided_slice %213 {offsets = [0, 0], sizes = [2, 40], strides = [1, 1]} : vector<2x512xf32> to vector<2x40xf32>
    %cst_118 = arith.constant 5.000000e-01 : f32
    %215 = vector.broadcast %cst_118 : f32 to vector<2x40xf32>
    %216 = arith.mulf %215, %214 : vector<2x40xf32>
    %217 = math.tanh %216 : vector<2x40xf32>
    %cst_119 = arith.constant 5.000000e-01 : f32
    %218 = vector.broadcast %cst_119 : f32 to vector<2x40xf32>
    %219 = arith.mulf %218, %217 : vector<2x40xf32>
    %cst_120 = arith.constant 5.000000e-01 : f32
    %220 = vector.broadcast %cst_120 : f32 to vector<2x40xf32>
    %221 = arith.addf %219, %220 : vector<2x40xf32>
    %222 = vector.extract_strided_slice %213 {offsets = [0, 128], sizes = [2, 40], strides = [1, 1]} : vector<2x512xf32> to vector<2x40xf32>
    %cst_121 = arith.constant 5.000000e-01 : f32
    %223 = vector.broadcast %cst_121 : f32 to vector<2x40xf32>
    %224 = arith.mulf %223, %222 : vector<2x40xf32>
    %225 = math.tanh %224 : vector<2x40xf32>
    %cst_122 = arith.constant 5.000000e-01 : f32
    %226 = vector.broadcast %cst_122 : f32 to vector<2x40xf32>
    %227 = arith.mulf %226, %225 : vector<2x40xf32>
    %cst_123 = arith.constant 5.000000e-01 : f32
    %228 = vector.broadcast %cst_123 : f32 to vector<2x40xf32>
    %229 = arith.addf %227, %228 : vector<2x40xf32>
    %230 = vector.extract_strided_slice %213 {offsets = [0, 256], sizes = [2, 40], strides = [1, 1]} : vector<2x512xf32> to vector<2x40xf32>
    %231 = math.tanh %230 : vector<2x40xf32>
    %232 = vector.extract_strided_slice %213 {offsets = [0, 384], sizes = [2, 40], strides = [1, 1]} : vector<2x512xf32> to vector<2x40xf32>
    %cst_124 = arith.constant 5.000000e-01 : f32
    %233 = vector.broadcast %cst_124 : f32 to vector<2x40xf32>
    %234 = arith.mulf %233, %232 : vector<2x40xf32>
    %235 = math.tanh %234 : vector<2x40xf32>
    %cst_125 = arith.constant 5.000000e-01 : f32
    %236 = vector.broadcast %cst_125 : f32 to vector<2x40xf32>
    %237 = arith.mulf %236, %235 : vector<2x40xf32>
    %cst_126 = arith.constant 5.000000e-01 : f32
    %238 = vector.broadcast %cst_126 : f32 to vector<2x40xf32>
    %239 = arith.addf %237, %238 : vector<2x40xf32>
    %240 = arith.mulf %229, %210 : vector<2x40xf32>
    %241 = arith.mulf %221, %231 : vector<2x40xf32>
    %242 = arith.addf %240, %241 : vector<2x40xf32>
    %243 = math.tanh %242 : vector<2x40xf32>
    %244 = arith.mulf %239, %243 : vector<2x40xf32>
    %cst_127 = arith.constant dense<0xFF800000> : vector<40xf32>
    %245 = vector.multi_reduction <maximumf>, %244, %cst_127 [0] : vector<2x40xf32> to vector<40xf32>
    %246 = vector.shape_cast %245 : vector<40xf32> to vector<1x40xf32>
    %c2_128 = arith.constant 2 : index
    %c0_129 = arith.constant 0 : index
    %247 = vector.load %arg4[%c2_128, %c0_129] : memref<16x512xf32, #tpu.memory_space<vmem>>, vector<2x512xf32>
    %cst_130 = arith.constant dense<0.000000e+00> : vector<2x512xf32>
    %248 = tpu.matmul %244, %112, %cst_130 {dimension_numbers = #tpu.dot_dimension_numbers<[1], [0], [0], [1], [0, 0, 1, 1], [], []>} : vector<2x40xf32>, vector<40x512xf32>, vector<2x512xf32> -> vector<2x512xf32>
    %249 = arith.addf %247, %248 : vector<2x512xf32>
    %250 = vector.extract_strided_slice %249 {offsets = [0, 0], sizes = [2, 40], strides = [1, 1]} : vector<2x512xf32> to vector<2x40xf32>
    %cst_131 = arith.constant 5.000000e-01 : f32
    %251 = vector.broadcast %cst_131 : f32 to vector<2x40xf32>
    %252 = arith.mulf %251, %250 : vector<2x40xf32>
    %253 = math.tanh %252 : vector<2x40xf32>
    %cst_132 = arith.constant 5.000000e-01 : f32
    %254 = vector.broadcast %cst_132 : f32 to vector<2x40xf32>
    %255 = arith.mulf %254, %253 : vector<2x40xf32>
    %cst_133 = arith.constant 5.000000e-01 : f32
    %256 = vector.broadcast %cst_133 : f32 to vector<2x40xf32>
    %257 = arith.addf %255, %256 : vector<2x40xf32>
    %258 = vector.extract_strided_slice %249 {offsets = [0, 128], sizes = [2, 40], strides = [1, 1]} : vector<2x512xf32> to vector<2x40xf32>
    %cst_134 = arith.constant 5.000000e-01 : f32
    %259 = vector.broadcast %cst_134 : f32 to vector<2x40xf32>
    %260 = arith.mulf %259, %258 : vector<2x40xf32>
    %261 = math.tanh %260 : vector<2x40xf32>
    %cst_135 = arith.constant 5.000000e-01 : f32
    %262 = vector.broadcast %cst_135 : f32 to vector<2x40xf32>
    %263 = arith.mulf %262, %261 : vector<2x40xf32>
    %cst_136 = arith.constant 5.000000e-01 : f32
    %264 = vector.broadcast %cst_136 : f32 to vector<2x40xf32>
    %265 = arith.addf %263, %264 : vector<2x40xf32>
    %266 = vector.extract_strided_slice %249 {offsets = [0, 256], sizes = [2, 40], strides = [1, 1]} : vector<2x512xf32> to vector<2x40xf32>
    %267 = math.tanh %266 : vector<2x40xf32>
    %268 = vector.extract_strided_slice %249 {offsets = [0, 384], sizes = [2, 40], strides = [1, 1]} : vector<2x512xf32> to vector<2x40xf32>
    %cst_137 = arith.constant 5.000000e-01 : f32
    %269 = vector.broadcast %cst_137 : f32 to vector<2x40xf32>
    %270 = arith.mulf %269, %268 : vector<2x40xf32>
    %271 = math.tanh %270 : vector<2x40xf32>
    %cst_138 = arith.constant 5.000000e-01 : f32
    %272 = vector.broadcast %cst_138 : f32 to vector<2x40xf32>
    %273 = arith.mulf %272, %271 : vector<2x40xf32>
    %cst_139 = arith.constant 5.000000e-01 : f32
    %274 = vector.broadcast %cst_139 : f32 to vector<2x40xf32>
    %275 = arith.addf %273, %274 : vector<2x40xf32>
    %276 = arith.mulf %265, %242 : vector<2x40xf32>
    %277 = arith.mulf %257, %267 : vector<2x40xf32>
    %278 = arith.addf %276, %277 : vector<2x40xf32>
    %279 = math.tanh %278 : vector<2x40xf32>
    %280 = arith.mulf %275, %279 : vector<2x40xf32>
    %cst_140 = arith.constant dense<0xFF800000> : vector<40xf32>
    %281 = vector.multi_reduction <maximumf>, %280, %cst_140 [0] : vector<2x40xf32> to vector<40xf32>
    %282 = vector.shape_cast %281 : vector<40xf32> to vector<1x40xf32>
    %c4_141 = arith.constant 4 : index
    %c0_142 = arith.constant 0 : index
    %283 = vector.load %arg4[%c4_141, %c0_142] : memref<16x512xf32, #tpu.memory_space<vmem>>, vector<2x512xf32>
    %cst_143 = arith.constant dense<0.000000e+00> : vector<2x512xf32>
    %284 = tpu.matmul %280, %112, %cst_143 {dimension_numbers = #tpu.dot_dimension_numbers<[1], [0], [0], [1], [0, 0, 1, 1], [], []>} : vector<2x40xf32>, vector<40x512xf32>, vector<2x512xf32> -> vector<2x512xf32>
    %285 = arith.addf %283, %284 : vector<2x512xf32>
    %286 = vector.extract_strided_slice %285 {offsets = [0, 0], sizes = [2, 40], strides = [1, 1]} : vector<2x512xf32> to vector<2x40xf32>
    %cst_144 = arith.constant 5.000000e-01 : f32
    %287 = vector.broadcast %cst_144 : f32 to vector<2x40xf32>
    %288 = arith.mulf %287, %286 : vector<2x40xf32>
    %289 = math.tanh %288 : vector<2x40xf32>
    %cst_145 = arith.constant 5.000000e-01 : f32
    %290 = vector.broadcast %cst_145 : f32 to vector<2x40xf32>
    %291 = arith.mulf %290, %289 : vector<2x40xf32>
    %cst_146 = arith.constant 5.000000e-01 : f32
    %292 = vector.broadcast %cst_146 : f32 to vector<2x40xf32>
    %293 = arith.addf %291, %292 : vector<2x40xf32>
    %294 = vector.extract_strided_slice %285 {offsets = [0, 128], sizes = [2, 40], strides = [1, 1]} : vector<2x512xf32> to vector<2x40xf32>
    %cst_147 = arith.constant 5.000000e-01 : f32
    %295 = vector.broadcast %cst_147 : f32 to vector<2x40xf32>
    %296 = arith.mulf %295, %294 : vector<2x40xf32>
    %297 = math.tanh %296 : vector<2x40xf32>
    %cst_148 = arith.constant 5.000000e-01 : f32
    %298 = vector.broadcast %cst_148 : f32 to vector<2x40xf32>
    %299 = arith.mulf %298, %297 : vector<2x40xf32>
    %cst_149 = arith.constant 5.000000e-01 : f32
    %300 = vector.broadcast %cst_149 : f32 to vector<2x40xf32>
    %301 = arith.addf %299, %300 : vector<2x40xf32>
    %302 = vector.extract_strided_slice %285 {offsets = [0, 256], sizes = [2, 40], strides = [1, 1]} : vector<2x512xf32> to vector<2x40xf32>
    %303 = math.tanh %302 : vector<2x40xf32>
    %304 = vector.extract_strided_slice %285 {offsets = [0, 384], sizes = [2, 40], strides = [1, 1]} : vector<2x512xf32> to vector<2x40xf32>
    %cst_150 = arith.constant 5.000000e-01 : f32
    %305 = vector.broadcast %cst_150 : f32 to vector<2x40xf32>
    %306 = arith.mulf %305, %304 : vector<2x40xf32>
    %307 = math.tanh %306 : vector<2x40xf32>
    %cst_151 = arith.constant 5.000000e-01 : f32
    %308 = vector.broadcast %cst_151 : f32 to vector<2x40xf32>
    %309 = arith.mulf %308, %307 : vector<2x40xf32>
    %cst_152 = arith.constant 5.000000e-01 : f32
    %310 = vector.broadcast %cst_152 : f32 to vector<2x40xf32>
    %311 = arith.addf %309, %310 : vector<2x40xf32>
    %312 = arith.mulf %301, %278 : vector<2x40xf32>
    %313 = arith.mulf %293, %303 : vector<2x40xf32>
    %314 = arith.addf %312, %313 : vector<2x40xf32>
    %315 = math.tanh %314 : vector<2x40xf32>
    %316 = arith.mulf %311, %315 : vector<2x40xf32>
    %cst_153 = arith.constant dense<0xFF800000> : vector<40xf32>
    %317 = vector.multi_reduction <maximumf>, %316, %cst_153 [0] : vector<2x40xf32> to vector<40xf32>
    %318 = vector.shape_cast %317 : vector<40xf32> to vector<1x40xf32>
    %c6_154 = arith.constant 6 : index
    %c0_155 = arith.constant 0 : index
    %319 = vector.load %arg4[%c6_154, %c0_155] : memref<16x512xf32, #tpu.memory_space<vmem>>, vector<2x512xf32>
    %cst_156 = arith.constant dense<0.000000e+00> : vector<2x512xf32>
    %320 = tpu.matmul %316, %112, %cst_156 {dimension_numbers = #tpu.dot_dimension_numbers<[1], [0], [0], [1], [0, 0, 1, 1], [], []>} : vector<2x40xf32>, vector<40x512xf32>, vector<2x512xf32> -> vector<2x512xf32>
    %321 = arith.addf %319, %320 : vector<2x512xf32>
    %322 = vector.extract_strided_slice %321 {offsets = [0, 0], sizes = [2, 40], strides = [1, 1]} : vector<2x512xf32> to vector<2x40xf32>
    %cst_157 = arith.constant 5.000000e-01 : f32
    %323 = vector.broadcast %cst_157 : f32 to vector<2x40xf32>
    %324 = arith.mulf %323, %322 : vector<2x40xf32>
    %325 = math.tanh %324 : vector<2x40xf32>
    %cst_158 = arith.constant 5.000000e-01 : f32
    %326 = vector.broadcast %cst_158 : f32 to vector<2x40xf32>
    %327 = arith.mulf %326, %325 : vector<2x40xf32>
    %cst_159 = arith.constant 5.000000e-01 : f32
    %328 = vector.broadcast %cst_159 : f32 to vector<2x40xf32>
    %329 = arith.addf %327, %328 : vector<2x40xf32>
    %330 = vector.extract_strided_slice %321 {offsets = [0, 128], sizes = [2, 40], strides = [1, 1]} : vector<2x512xf32> to vector<2x40xf32>
    %cst_160 = arith.constant 5.000000e-01 : f32
    %331 = vector.broadcast %cst_160 : f32 to vector<2x40xf32>
    %332 = arith.mulf %331, %330 : vector<2x40xf32>
    %333 = math.tanh %332 : vector<2x40xf32>
    %cst_161 = arith.constant 5.000000e-01 : f32
    %334 = vector.broadcast %cst_161 : f32 to vector<2x40xf32>
    %335 = arith.mulf %334, %333 : vector<2x40xf32>
    %cst_162 = arith.constant 5.000000e-01 : f32
    %336 = vector.broadcast %cst_162 : f32 to vector<2x40xf32>
    %337 = arith.addf %335, %336 : vector<2x40xf32>
    %338 = vector.extract_strided_slice %321 {offsets = [0, 256], sizes = [2, 40], strides = [1, 1]} : vector<2x512xf32> to vector<2x40xf32>
    %339 = math.tanh %338 : vector<2x40xf32>
    %340 = vector.extract_strided_slice %321 {offsets = [0, 384], sizes = [2, 40], strides = [1, 1]} : vector<2x512xf32> to vector<2x40xf32>
    %cst_163 = arith.constant 5.000000e-01 : f32
    %341 = vector.broadcast %cst_163 : f32 to vector<2x40xf32>
    %342 = arith.mulf %341, %340 : vector<2x40xf32>
    %343 = math.tanh %342 : vector<2x40xf32>
    %cst_164 = arith.constant 5.000000e-01 : f32
    %344 = vector.broadcast %cst_164 : f32 to vector<2x40xf32>
    %345 = arith.mulf %344, %343 : vector<2x40xf32>
    %cst_165 = arith.constant 5.000000e-01 : f32
    %346 = vector.broadcast %cst_165 : f32 to vector<2x40xf32>
    %347 = arith.addf %345, %346 : vector<2x40xf32>
    %348 = arith.mulf %337, %314 : vector<2x40xf32>
    %349 = arith.mulf %329, %339 : vector<2x40xf32>
    %350 = arith.addf %348, %349 : vector<2x40xf32>
    %351 = math.tanh %350 : vector<2x40xf32>
    %352 = arith.mulf %347, %351 : vector<2x40xf32>
    %cst_166 = arith.constant dense<0xFF800000> : vector<40xf32>
    %353 = vector.multi_reduction <maximumf>, %352, %cst_166 [0] : vector<2x40xf32> to vector<40xf32>
    %354 = vector.shape_cast %353 : vector<40xf32> to vector<1x40xf32>
    %c8_167 = arith.constant 8 : index
    %c0_168 = arith.constant 0 : index
    %355 = vector.load %arg4[%c8_167, %c0_168] : memref<16x512xf32, #tpu.memory_space<vmem>>, vector<2x512xf32>
    %cst_169 = arith.constant dense<0.000000e+00> : vector<2x512xf32>
    %356 = tpu.matmul %352, %112, %cst_169 {dimension_numbers = #tpu.dot_dimension_numbers<[1], [0], [0], [1], [0, 0, 1, 1], [], []>} : vector<2x40xf32>, vector<40x512xf32>, vector<2x512xf32> -> vector<2x512xf32>
    %357 = arith.addf %355, %356 : vector<2x512xf32>
    %358 = vector.extract_strided_slice %357 {offsets = [0, 0], sizes = [2, 40], strides = [1, 1]} : vector<2x512xf32> to vector<2x40xf32>
    %cst_170 = arith.constant 5.000000e-01 : f32
    %359 = vector.broadcast %cst_170 : f32 to vector<2x40xf32>
    %360 = arith.mulf %359, %358 : vector<2x40xf32>
    %361 = math.tanh %360 : vector<2x40xf32>
    %cst_171 = arith.constant 5.000000e-01 : f32
    %362 = vector.broadcast %cst_171 : f32 to vector<2x40xf32>
    %363 = arith.mulf %362, %361 : vector<2x40xf32>
    %cst_172 = arith.constant 5.000000e-01 : f32
    %364 = vector.broadcast %cst_172 : f32 to vector<2x40xf32>
    %365 = arith.addf %363, %364 : vector<2x40xf32>
    %366 = vector.extract_strided_slice %357 {offsets = [0, 128], sizes = [2, 40], strides = [1, 1]} : vector<2x512xf32> to vector<2x40xf32>
    %cst_173 = arith.constant 5.000000e-01 : f32
    %367 = vector.broadcast %cst_173 : f32 to vector<2x40xf32>
    %368 = arith.mulf %367, %366 : vector<2x40xf32>
    %369 = math.tanh %368 : vector<2x40xf32>
    %cst_174 = arith.constant 5.000000e-01 : f32
    %370 = vector.broadcast %cst_174 : f32 to vector<2x40xf32>
    %371 = arith.mulf %370, %369 : vector<2x40xf32>
    %cst_175 = arith.constant 5.000000e-01 : f32
    %372 = vector.broadcast %cst_175 : f32 to vector<2x40xf32>
    %373 = arith.addf %371, %372 : vector<2x40xf32>
    %374 = vector.extract_strided_slice %357 {offsets = [0, 256], sizes = [2, 40], strides = [1, 1]} : vector<2x512xf32> to vector<2x40xf32>
    %375 = math.tanh %374 : vector<2x40xf32>
    %376 = vector.extract_strided_slice %357 {offsets = [0, 384], sizes = [2, 40], strides = [1, 1]} : vector<2x512xf32> to vector<2x40xf32>
    %cst_176 = arith.constant 5.000000e-01 : f32
    %377 = vector.broadcast %cst_176 : f32 to vector<2x40xf32>
    %378 = arith.mulf %377, %376 : vector<2x40xf32>
    %379 = math.tanh %378 : vector<2x40xf32>
    %cst_177 = arith.constant 5.000000e-01 : f32
    %380 = vector.broadcast %cst_177 : f32 to vector<2x40xf32>
    %381 = arith.mulf %380, %379 : vector<2x40xf32>
    %cst_178 = arith.constant 5.000000e-01 : f32
    %382 = vector.broadcast %cst_178 : f32 to vector<2x40xf32>
    %383 = arith.addf %381, %382 : vector<2x40xf32>
    %384 = arith.mulf %373, %350 : vector<2x40xf32>
    %385 = arith.mulf %365, %375 : vector<2x40xf32>
    %386 = arith.addf %384, %385 : vector<2x40xf32>
    %387 = math.tanh %386 : vector<2x40xf32>
    %388 = arith.mulf %383, %387 : vector<2x40xf32>
    %cst_179 = arith.constant dense<0xFF800000> : vector<40xf32>
    %389 = vector.multi_reduction <maximumf>, %388, %cst_179 [0] : vector<2x40xf32> to vector<40xf32>
    %390 = vector.shape_cast %389 : vector<40xf32> to vector<1x40xf32>
    %c10_180 = arith.constant 10 : index
    %c0_181 = arith.constant 0 : index
    %391 = vector.load %arg4[%c10_180, %c0_181] : memref<16x512xf32, #tpu.memory_space<vmem>>, vector<2x512xf32>
    %cst_182 = arith.constant dense<0.000000e+00> : vector<2x512xf32>
    %392 = tpu.matmul %388, %112, %cst_182 {dimension_numbers = #tpu.dot_dimension_numbers<[1], [0], [0], [1], [0, 0, 1, 1], [], []>} : vector<2x40xf32>, vector<40x512xf32>, vector<2x512xf32> -> vector<2x512xf32>
    %393 = arith.addf %391, %392 : vector<2x512xf32>
    %394 = vector.extract_strided_slice %393 {offsets = [0, 0], sizes = [2, 40], strides = [1, 1]} : vector<2x512xf32> to vector<2x40xf32>
    %cst_183 = arith.constant 5.000000e-01 : f32
    %395 = vector.broadcast %cst_183 : f32 to vector<2x40xf32>
    %396 = arith.mulf %395, %394 : vector<2x40xf32>
    %397 = math.tanh %396 : vector<2x40xf32>
    %cst_184 = arith.constant 5.000000e-01 : f32
    %398 = vector.broadcast %cst_184 : f32 to vector<2x40xf32>
    %399 = arith.mulf %398, %397 : vector<2x40xf32>
    %cst_185 = arith.constant 5.000000e-01 : f32
    %400 = vector.broadcast %cst_185 : f32 to vector<2x40xf32>
    %401 = arith.addf %399, %400 : vector<2x40xf32>
    %402 = vector.extract_strided_slice %393 {offsets = [0, 128], sizes = [2, 40], strides = [1, 1]} : vector<2x512xf32> to vector<2x40xf32>
    %cst_186 = arith.constant 5.000000e-01 : f32
    %403 = vector.broadcast %cst_186 : f32 to vector<2x40xf32>
    %404 = arith.mulf %403, %402 : vector<2x40xf32>
    %405 = math.tanh %404 : vector<2x40xf32>
    %cst_187 = arith.constant 5.000000e-01 : f32
    %406 = vector.broadcast %cst_187 : f32 to vector<2x40xf32>
    %407 = arith.mulf %406, %405 : vector<2x40xf32>
    %cst_188 = arith.constant 5.000000e-01 : f32
    %408 = vector.broadcast %cst_188 : f32 to vector<2x40xf32>
    %409 = arith.addf %407, %408 : vector<2x40xf32>
    %410 = vector.extract_strided_slice %393 {offsets = [0, 256], sizes = [2, 40], strides = [1, 1]} : vector<2x512xf32> to vector<2x40xf32>
    %411 = math.tanh %410 : vector<2x40xf32>
    %412 = vector.extract_strided_slice %393 {offsets = [0, 384], sizes = [2, 40], strides = [1, 1]} : vector<2x512xf32> to vector<2x40xf32>
    %cst_189 = arith.constant 5.000000e-01 : f32
    %413 = vector.broadcast %cst_189 : f32 to vector<2x40xf32>
    %414 = arith.mulf %413, %412 : vector<2x40xf32>
    %415 = math.tanh %414 : vector<2x40xf32>
    %cst_190 = arith.constant 5.000000e-01 : f32
    %416 = vector.broadcast %cst_190 : f32 to vector<2x40xf32>
    %417 = arith.mulf %416, %415 : vector<2x40xf32>
    %cst_191 = arith.constant 5.000000e-01 : f32
    %418 = vector.broadcast %cst_191 : f32 to vector<2x40xf32>
    %419 = arith.addf %417, %418 : vector<2x40xf32>
    %420 = arith.mulf %409, %386 : vector<2x40xf32>
    %421 = arith.mulf %401, %411 : vector<2x40xf32>
    %422 = arith.addf %420, %421 : vector<2x40xf32>
    %423 = math.tanh %422 : vector<2x40xf32>
    %424 = arith.mulf %419, %423 : vector<2x40xf32>
    %cst_192 = arith.constant dense<0xFF800000> : vector<40xf32>
    %425 = vector.multi_reduction <maximumf>, %424, %cst_192 [0] : vector<2x40xf32> to vector<40xf32>
    %426 = vector.shape_cast %425 : vector<40xf32> to vector<1x40xf32>
    %c12_193 = arith.constant 12 : index
    %c0_194 = arith.constant 0 : index
    %427 = vector.load %arg4[%c12_193, %c0_194] : memref<16x512xf32, #tpu.memory_space<vmem>>, vector<2x512xf32>
    %cst_195 = arith.constant dense<0.000000e+00> : vector<2x512xf32>
    %428 = tpu.matmul %424, %112, %cst_195 {dimension_numbers = #tpu.dot_dimension_numbers<[1], [0], [0], [1], [0, 0, 1, 1], [], []>} : vector<2x40xf32>, vector<40x512xf32>, vector<2x512xf32> -> vector<2x512xf32>
    %429 = arith.addf %427, %428 : vector<2x512xf32>
    %430 = vector.extract_strided_slice %429 {offsets = [0, 0], sizes = [2, 40], strides = [1, 1]} : vector<2x512xf32> to vector<2x40xf32>
    %cst_196 = arith.constant 5.000000e-01 : f32
    %431 = vector.broadcast %cst_196 : f32 to vector<2x40xf32>
    %432 = arith.mulf %431, %430 : vector<2x40xf32>
    %433 = math.tanh %432 : vector<2x40xf32>
    %cst_197 = arith.constant 5.000000e-01 : f32
    %434 = vector.broadcast %cst_197 : f32 to vector<2x40xf32>
    %435 = arith.mulf %434, %433 : vector<2x40xf32>
    %cst_198 = arith.constant 5.000000e-01 : f32
    %436 = vector.broadcast %cst_198 : f32 to vector<2x40xf32>
    %437 = arith.addf %435, %436 : vector<2x40xf32>
    %438 = vector.extract_strided_slice %429 {offsets = [0, 128], sizes = [2, 40], strides = [1, 1]} : vector<2x512xf32> to vector<2x40xf32>
    %cst_199 = arith.constant 5.000000e-01 : f32
    %439 = vector.broadcast %cst_199 : f32 to vector<2x40xf32>
    %440 = arith.mulf %439, %438 : vector<2x40xf32>
    %441 = math.tanh %440 : vector<2x40xf32>
    %cst_200 = arith.constant 5.000000e-01 : f32
    %442 = vector.broadcast %cst_200 : f32 to vector<2x40xf32>
    %443 = arith.mulf %442, %441 : vector<2x40xf32>
    %cst_201 = arith.constant 5.000000e-01 : f32
    %444 = vector.broadcast %cst_201 : f32 to vector<2x40xf32>
    %445 = arith.addf %443, %444 : vector<2x40xf32>
    %446 = vector.extract_strided_slice %429 {offsets = [0, 256], sizes = [2, 40], strides = [1, 1]} : vector<2x512xf32> to vector<2x40xf32>
    %447 = math.tanh %446 : vector<2x40xf32>
    %448 = vector.extract_strided_slice %429 {offsets = [0, 384], sizes = [2, 40], strides = [1, 1]} : vector<2x512xf32> to vector<2x40xf32>
    %cst_202 = arith.constant 5.000000e-01 : f32
    %449 = vector.broadcast %cst_202 : f32 to vector<2x40xf32>
    %450 = arith.mulf %449, %448 : vector<2x40xf32>
    %451 = math.tanh %450 : vector<2x40xf32>
    %cst_203 = arith.constant 5.000000e-01 : f32
    %452 = vector.broadcast %cst_203 : f32 to vector<2x40xf32>
    %453 = arith.mulf %452, %451 : vector<2x40xf32>
    %cst_204 = arith.constant 5.000000e-01 : f32
    %454 = vector.broadcast %cst_204 : f32 to vector<2x40xf32>
    %455 = arith.addf %453, %454 : vector<2x40xf32>
    %456 = arith.mulf %445, %422 : vector<2x40xf32>
    %457 = arith.mulf %437, %447 : vector<2x40xf32>
    %458 = arith.addf %456, %457 : vector<2x40xf32>
    %459 = math.tanh %458 : vector<2x40xf32>
    %460 = arith.mulf %455, %459 : vector<2x40xf32>
    %cst_205 = arith.constant dense<0xFF800000> : vector<40xf32>
    %461 = vector.multi_reduction <maximumf>, %460, %cst_205 [0] : vector<2x40xf32> to vector<40xf32>
    %462 = vector.shape_cast %461 : vector<40xf32> to vector<1x40xf32>
    %c14_206 = arith.constant 14 : index
    %c0_207 = arith.constant 0 : index
    %463 = vector.load %arg4[%c14_206, %c0_207] : memref<16x512xf32, #tpu.memory_space<vmem>>, vector<2x512xf32>
    %cst_208 = arith.constant dense<0.000000e+00> : vector<2x512xf32>
    %464 = tpu.matmul %460, %112, %cst_208 {dimension_numbers = #tpu.dot_dimension_numbers<[1], [0], [0], [1], [0, 0, 1, 1], [], []>} : vector<2x40xf32>, vector<40x512xf32>, vector<2x512xf32> -> vector<2x512xf32>
    %465 = arith.addf %463, %464 : vector<2x512xf32>
    %466 = vector.extract_strided_slice %465 {offsets = [0, 0], sizes = [2, 40], strides = [1, 1]} : vector<2x512xf32> to vector<2x40xf32>
    %cst_209 = arith.constant 5.000000e-01 : f32
    %467 = vector.broadcast %cst_209 : f32 to vector<2x40xf32>
    %468 = arith.mulf %467, %466 : vector<2x40xf32>
    %469 = math.tanh %468 : vector<2x40xf32>
    %cst_210 = arith.constant 5.000000e-01 : f32
    %470 = vector.broadcast %cst_210 : f32 to vector<2x40xf32>
    %471 = arith.mulf %470, %469 : vector<2x40xf32>
    %cst_211 = arith.constant 5.000000e-01 : f32
    %472 = vector.broadcast %cst_211 : f32 to vector<2x40xf32>
    %473 = arith.addf %471, %472 : vector<2x40xf32>
    %474 = vector.extract_strided_slice %465 {offsets = [0, 128], sizes = [2, 40], strides = [1, 1]} : vector<2x512xf32> to vector<2x40xf32>
    %cst_212 = arith.constant 5.000000e-01 : f32
    %475 = vector.broadcast %cst_212 : f32 to vector<2x40xf32>
    %476 = arith.mulf %475, %474 : vector<2x40xf32>
    %477 = math.tanh %476 : vector<2x40xf32>
    %cst_213 = arith.constant 5.000000e-01 : f32
    %478 = vector.broadcast %cst_213 : f32 to vector<2x40xf32>
    %479 = arith.mulf %478, %477 : vector<2x40xf32>
    %cst_214 = arith.constant 5.000000e-01 : f32
    %480 = vector.broadcast %cst_214 : f32 to vector<2x40xf32>
    %481 = arith.addf %479, %480 : vector<2x40xf32>
    %482 = vector.extract_strided_slice %465 {offsets = [0, 256], sizes = [2, 40], strides = [1, 1]} : vector<2x512xf32> to vector<2x40xf32>
    %483 = math.tanh %482 : vector<2x40xf32>
    %484 = vector.extract_strided_slice %465 {offsets = [0, 384], sizes = [2, 40], strides = [1, 1]} : vector<2x512xf32> to vector<2x40xf32>
    %cst_215 = arith.constant 5.000000e-01 : f32
    %485 = vector.broadcast %cst_215 : f32 to vector<2x40xf32>
    %486 = arith.mulf %485, %484 : vector<2x40xf32>
    %487 = math.tanh %486 : vector<2x40xf32>
    %cst_216 = arith.constant 5.000000e-01 : f32
    %488 = vector.broadcast %cst_216 : f32 to vector<2x40xf32>
    %489 = arith.mulf %488, %487 : vector<2x40xf32>
    %cst_217 = arith.constant 5.000000e-01 : f32
    %490 = vector.broadcast %cst_217 : f32 to vector<2x40xf32>
    %491 = arith.addf %489, %490 : vector<2x40xf32>
    %492 = arith.mulf %481, %458 : vector<2x40xf32>
    %493 = arith.mulf %473, %483 : vector<2x40xf32>
    %494 = arith.addf %492, %493 : vector<2x40xf32>
    %495 = math.tanh %494 : vector<2x40xf32>
    %496 = arith.mulf %491, %495 : vector<2x40xf32>
    %cst_218 = arith.constant dense<0xFF800000> : vector<40xf32>
    %497 = vector.multi_reduction <maximumf>, %496, %cst_218 [0] : vector<2x40xf32> to vector<40xf32>
    %498 = vector.shape_cast %497 : vector<40xf32> to vector<1x40xf32>
    %499 = tpu.concatenate %246, %282, %318, %354, %390, %426, %462, %498 in 0 : vector<1x40xf32>, vector<1x40xf32>, vector<1x40xf32>, vector<1x40xf32>, vector<1x40xf32>, vector<1x40xf32>, vector<1x40xf32>, vector<1x40xf32> -> vector<8x40xf32>
    %c40 = arith.constant 40 : index
    %c0_219 = arith.constant 0 : index
    %500 = vector.load %arg2[%c40, %c0_219] : memref<112x512xf32, #tpu.memory_space<vmem>>, vector<40x16xf32>
    %c80 = arith.constant 80 : index
    %c0_220 = arith.constant 0 : index
    %501 = vector.load %arg2[%c80, %c0_220] : memref<112x512xf32, #tpu.memory_space<vmem>>, vector<1x16xf32>
    %c88 = arith.constant 88 : index
    %c0_221 = arith.constant 0 : index
    %502 = vector.load %arg2[%c88, %c0_221] : memref<112x512xf32, #tpu.memory_space<vmem>>, vector<16x9xf32>
    %c104 = arith.constant 104 : index
    %c0_222 = arith.constant 0 : index
    %503 = vector.load %arg2[%c104, %c0_222] : memref<112x512xf32, #tpu.memory_space<vmem>>, vector<1x9xf32>
    %cst_223 = arith.constant dense<0.000000e+00> : vector<8x16xf32>
    %504 = tpu.matmul %499, %500, %cst_223 {dimension_numbers = #tpu.dot_dimension_numbers<[1], [0], [0], [1], [0, 0, 1, 1], [], []>} : vector<8x40xf32>, vector<40x16xf32>, vector<8x16xf32> -> vector<8x16xf32>
    %505 = vector.broadcast %501 : vector<1x16xf32> to vector<8x16xf32>
    %506 = arith.addf %504, %505 : vector<8x16xf32>
    %cst_224 = arith.constant 0.000000e+00 : f32
    %507 = vector.broadcast %cst_224 : f32 to vector<8x16xf32>
    %508 = arith.maximumf %506, %507 : vector<8x16xf32>
    %cst_225 = arith.constant dense<0.000000e+00> : vector<8x9xf32>
    %509 = tpu.matmul %508, %502, %cst_225 {dimension_numbers = #tpu.dot_dimension_numbers<[1], [0], [0], [1], [0, 0, 1, 1], [], []>} : vector<8x16xf32>, vector<16x9xf32>, vector<8x9xf32> -> vector<8x9xf32>
    %510 = vector.broadcast %503 : vector<1x9xf32> to vector<8x9xf32>
    %511 = arith.addf %509, %510 : vector<8x9xf32>
    %c0_226 = arith.constant 0 : index
    %c0_227 = arith.constant 0 : index
    %512 = vector.load %arg3[%c0_226, %c0_227] : memref<8x9xf32, #tpu.memory_space<vmem>>, vector<8x9xf32>
    tpu.vector_store %arg3[%c0_226, %c0_227], %511 {strides = array<i32>} : memref<8x9xf32, #tpu.memory_space<vmem>>, vector<8x9xf32>,
    return
  }
}

</mosaic_0001>

<bundles_post_ra>
// kernel: model_forward.1
= control target key start
LH: loop header
LB: loop body
LE: loop exit
PB: predicated region body
PF: predicated region fallthrough
CT: control target
= control target key end

     0   :  { %8 = vsyncpa [#allocation7], 0  ;;  %s3667_s0 = inlined_call_operand.vmem [shape: s32[16], index: 0, kind: input, shape index: {}]   ;;  %s3668_s1 = inlined_call_operand.hbm [shape: f32[1000,512], index: 1, kind: input, shape index: {}]   ;;  %s3669_s2 = inlined_call_operand.hbm [shape: f32[112,512], index: 2, kind: input, shape index: {}]   ;;  %s3670_s3 = inlined_call_operand.hbm [shape: f32[8,9], index: 3, kind: output, shape index: {}]  }
   0x1   :  { %9 = vsyncpa [#allocation5], 0 }
   0x2   :  { %10 = vsyncpa [#allocation6], 0  ;;  %s17_s14 = sshll.u32 %s3667_s0, 4  ;;  %s18_s14 = int_to_ptr.vmem [resolvable:$true] %s17_s14 }
   0x3   :  { %s2556_s15 = scalar_lea.vmem %s18_s14, 16  ;;  %p2561_p1 = scmp.lt.s32.totalorder %s18_s14, %s18_s14 }
   0x4   :  { %p2557_p0 = scmp.ne.s32.totalorder %s18_s14, %s2556_s15  ;;  %p2562_p2 = scmp.lt.s32.totalorder %s2556_s15, %s2556_s15 }
   0x6   :  { %p2563_p3 = por %p2562_p2, %p2561_p1 }
   0x8   :  { %p2564_p4 = pnand %p2563_p3, %p2557_p0 }
   0xa   :  { %2567 = shalt.err (!%p2564_p4)
}
   0xb   :  { %s3034_s16 = smov [#allocation4]   ;;  %s3035_s17 = smov [#allocation8]  }
   0xc   :  { %20 = dma.vmem_to_smem %s18_s14, 16, %s3034_s16, [#allocation7]  }
   0xd   :  { %s26_s18 = sshll.u32 %s3035_s17, 4  ;;  %s2568_s21 = scalar_lea.hbm %s3669_s2, 7168  ;;  %s27_s18 = int_to_ptr.vmem [resolvable:$true] %s26_s18 }
   0xe   :  { %p2569_p5 = scmp.ne.s32.totalorder %s3669_s2, %s2568_s21  ;;  %p2572_p6 = scmp.lt.u32.totalorder %s2568_s21, %s3669_s2 }
  0x10   :  { %p2574_p7 = pnand %p2572_p6, %p2569_p5 }
  0x12   :  { %2577 = shalt.err (!%p2574_p7)
}
  0x13   :  { %s2578_s25 = scalar_lea.vmem %s27_s18, 7168  ;;  %p2583_p9 = scmp.lt.s32.totalorder %s27_s18, %s27_s18 }
  0x14   :  { %p2579_p8 = scmp.ne.s32.totalorder %s27_s18, %s2578_s25  ;;  %p2584_p10 = scmp.lt.s32.totalorder %s2578_s25, %s2578_s25 }
  0x16   :  { %p2585_p11 = por %p2584_p10, %p2583_p9 }
  0x18   :  { %p2586_p12 = pnand %p2585_p11, %p2579_p8 }
  0x1a   :  { %2589 = shalt.err (!%p2586_p12)
}
  0x1b   :  { %s3036_s26 = smov 512   ;;  %s3037_s27 = smov 32  }
  0x1c   :  { %32 = dma.hbm_to_vmem [thread:$0]  %s3669_s2, 7168, %s27_s18, [#allocation5], %s3036_s26, %s3036_s26, %s3037_s27  }
  0x1d   :  { %2996 = dma.done.wait [#allocation7], 16  }
  0x1e   :  { %2997 = vsyncadd [#allocation7], 4294967280 }
  0x1f   :  { %2998 = dma.done.wait [#allocation5], 7168  }
  0x20   :  { %2999 = vsyncadd [#allocation5], 4294960128 }
  0x21   :  { %39 = sfence }
  0x22   :  { %s3095_s30 = sld [smem:[#allocation4]]  ;;  %v3097_v0 = vld [vmem:[#allocation8] sm:$0xff]  ;;  %v3099_v1 = vld [vmem:[#allocation8 + $0x8] sm:$0xff]  ;;  %v3101_v2 = vld [vmem:[#allocation8 + $0x10] sm:$0xff]  ;;  %s3038_s4 = smov [#allocation2]  }
  0x23   :  { %s48_s5 = sshll.u32 %s3038_s4, 4  ;;  %v3103_v3 = vld [vmem:[#allocation8 + $0x18] sm:$0xff]  ;;  %v3105_v4 = vld [vmem:[#allocation8 + $0x20] sm:$0xff]  ;;  %v3107_v5 = vld [vmem:[#allocation8 + $0x28] sm:$0xff]  ;;  %s3117_s2 = sld [smem:[#allocation4 + $0x1]]  ;;  %s3109_s5 = int_to_ptr.vmem [resolvable:$true] %s48_s5 }
  0x24   :  { %v3111_v6 = vld [vmem:[#allocation8 + $0x30] sm:$0xff]  ;;  %v3113_v7 = vld [vmem:[#allocation8 + $0x38] sm:$0xff]  ;;  %v3115_v8 = vld [vmem:[#allocation8 + $0x40] sm:$0xff]  ;;  %s3039_s6 = smov [#allocation2 + $0x1]   ;;  %s3125_s8 = sld [smem:[#allocation4 + $0x2]] }
  0x25   :  { %v3119_v9 = vld [vmem:[#allocation8 + $0x48] sm:$0xff]  ;;  %v3121_v10 = vld [vmem:[#allocation8 + $0x50] sm:$0xff]  ;;  %v3123_v11 = vld [vmem:[#allocation8 + $0x58] sm:$0xff]  ;;  %s62_s7 = sshll.u32 %s3039_s6, 4  ;;  %s3040_s12 = smov [#allocation2 + $0x2]   ;;  %s3133_s7 = int_to_ptr.vmem [resolvable:$true] %s62_s7 }
  0x26   :  { %v3127_v12 = vld [vmem:[#allocation8 + $0x60] sm:$0xff]  ;;  %v3129_v13 = vld [vmem:[#allocation8 + $0x68] sm:$0xff]  ;;  %v3131_v14 = vld [vmem:[#allocation8 + $0x70] sm:$0xff]  ;;  %s76_s13 = sshll.u32 %s3040_s12, 4  ;;  %s3157_s0 = scalar_lea.hbm %s3668_s1, 64000  ;;  %s3147_s13 = int_to_ptr.vmem [resolvable:$true] %s76_s13 }
  0x27   :  { %v3135_v15 = vld [vmem:[#allocation8 + $0x78] sm:$0xff]  ;;  %v3137_v16 = vld [vmem:[#allocation8 + $0x80] sm:$0xff]  ;;  %v3139_v17 = vld [vmem:[#allocation8 + $0x88] sm:$0xff] }
  0x28   :  { %s41_s9 = sshrl.u32 %s3095_s30, 3  ;;  %s42_s10 = sand.u32 7, %s3095_s30   ;;  %v3143_v18 = vld [vmem:[#allocation8 + $0x90] sm:$0xff]  ;;  %v3145_v19 = vld [vmem:[#allocation8 + $0x98] sm:$0xff] }
  0x29   :  { %s2205_s11 = sshll.u32 %s41_s9, 5  ;;  %s53_s16 = sshrl.u32 %s3117_s2, 3 }
  0x2a   :  { %s44_s14 = sadd.s32 %s2205_s11, %s42_s10  ;;  %s54_s20 = sand.u32 7, %s3117_s2  }
  0x2b   :  { %s2206_s15 = sshll.u32 %s44_s14, 4 }
  0x2c   :  { %s46_s19 = scalar_lea.hbm %s3668_s1, %s2206_s15 }
  0x2d   :  { %s2590_s21 = scalar_lea.hbm %s46_s19, 64  ;;  %p2593_p0 = scmp.lt.u32.totalorder %s46_s19, %s3668_s1 }
  0x2e   :  { %p2591_p13 = scmp.ne.s32.totalorder %s46_s19, %s2590_s21  ;;  %p2594_p1 = scmp.lt.u32.totalorder %s3157_s0, %s2590_s21 }
  0x2f   :  { %p2596_p3 = scmp.lt.u32.totalorder %s2590_s21, %s46_s19 }
  0x30   :  { %p2595_p2 = por %p2594_p1, %p2593_p0 }
  0x32   :  { %p2597_p4 = por %p2596_p3, %p2595_p2 }
  0x34   :  { %p2598_p5 = pnand %p2597_p4, %p2591_p13 }
  0x36   :  { %2601 = shalt.err (!%p2598_p5)  }
  0x37   :  { %s2602_s26 = scalar_lea.vmem %s3109_s5, 64  ;;  %s3166_s27 = scalar_lea.vmem %s3109_s5, 1024 }
  0x38   :  { %p2603_p6 = scmp.ne.s32.totalorder %s3109_s5, %s2602_s26  ;;  %p2607_p7 = scmp.lt.s32.totalorder %s3109_s5, %s3109_s5 }
  0x39   :  { %p2608_p8 = scmp.lt.s32.totalorder %s3166_s27, %s2602_s26 }
  0x3b   :  { %p2609_p9 = por %p2608_p8, %p2607_p7 }
  0x3d   :  { %p2610_p10 = pnand %p2609_p9, %p2603_p6 }
  0x3f   :  { %2613 = shalt.err (!%p2610_p10)  }
  0x40   :  { %s3041_s28 = smov 128   ;;  %s3042_s29 = smov 1  }
  0x41   :  { %51 = dma.hbm_to_vmem [thread:$0]  %s46_s19, 64, %s3109_s5, [#allocation3], %s3041_s28, %s3041_s28, %s3042_s29 }
  0x42   :  { %s2208_s30 = sshll.u32 %s53_s16, 5  ;;  %s67_s4 = sshrl.u32 %s3125_s8, 3 }
  0x43   :  { %s56_s2 = sadd.s32 %s2208_s30, %s54_s20  ;;  %s68_s6 = sand.u32 7, %s3125_s8  }
  0x44   :  { %s2209_s9 = sshll.u32 %s56_s2, 4  ;;  %s2211_s10 = sshll.u32 %s67_s4, 5 }
  0x45   :  { %s58_s14 = scalar_lea.hbm %s3668_s1, %s2209_s9  ;;  %s70_s15 = sadd.s32 %s2211_s10, %s68_s6 }
  0x46   :  { %s2614_s17 = scalar_lea.hbm %s58_s14, 64  ;;  %p2617_p12 = scmp.lt.u32.totalorder %s58_s14, %s3668_s1 }
  0x47   :  { %p2615_p11 = scmp.ne.s32.totalorder %s58_s14, %s2614_s17  ;;  %p2618_p13 = scmp.lt.u32.totalorder %s3157_s0, %s2614_s17 }
  0x48   :  { %p2620_p1 = scmp.lt.u32.totalorder %s2614_s17, %s58_s14 }
  0x49   :  { %p2619_p0 = por %p2618_p13, %p2617_p12 }
  0x4b   :  { %p2621_p2 = por %p2620_p1, %p2619_p0 }
  0x4d   :  { %p2622_p3 = pnand %p2621_p2, %p2615_p11 }
  0x4f   :  { %2625 = shalt.err (!%p2622_p3)  }
  0x50   :  { %s2626_s8 = scalar_lea.vmem %s3133_s7, 64  ;;  %p2631_p5 = scmp.lt.s32.totalorder %s3133_s7, %s3109_s5 }
  0x51   :  { %p2627_p4 = scmp.ne.s32.totalorder %s3133_s7, %s2626_s8  ;;  %p2632_p6 = scmp.lt.s32.totalorder %s3166_s27, %s2626_s8 }
  0x53   :  { %p2633_p7 = por %p2632_p6, %p2631_p5 }
  0x55   :  { %p2634_p8 = pnand %p2633_p7, %p2627_p4 }
  0x57   :  { %2637 = shalt.err (!%p2634_p8)  }
  0x58   :  { %65 = dma.hbm_to_vmem [thread:$0]  %s58_s14, 64, %s3133_s7, [#allocation3 + $0x1], %s3041_s28, %s3041_s28, %s3042_s29 }
  0x59   :  { %s2212_s16 = sshll.u32 %s70_s15, 4  ;;  %s3193_s19 = sld [smem:[#allocation4 + $0x3]] }
  0x5a   :  { %s72_s23 = scalar_lea.hbm %s3668_s1, %s2212_s16 }
  0x5b   :  { %s2638_s24 = scalar_lea.hbm %s72_s23, 64  ;;  %p2641_p10 = scmp.lt.u32.totalorder %s72_s23, %s3668_s1 }
  0x5c   :  { %p2639_p9 = scmp.ne.s32.totalorder %s72_s23, %s2638_s24  ;;  %p2642_p11 = scmp.lt.u32.totalorder %s3157_s0, %s2638_s24 }
  0x5d   :  { %p2644_p13 = scmp.lt.u32.totalorder %s2638_s24, %s72_s23 }
  0x5e   :  { %p2643_p12 = por %p2642_p11, %p2641_p10 }
  0x60   :  { %p2645_p0 = por %p2644_p13, %p2643_p12 }
  0x62   :  { %p2646_p1 = pnand %p2645_p0, %p2639_p9 }
  0x64   :  { %2649 = shalt.err (!%p2646_p1)  }
  0x65   :  { %s2650_s7 = scalar_lea.vmem %s3147_s13, 64  ;;  %p2655_p3 = scmp.lt.s32.totalorder %s3147_s13, %s3109_s5 }
  0x66   :  { %p2651_p2 = scmp.ne.s32.totalorder %s3147_s13, %s2650_s7  ;;  %p2656_p4 = scmp.lt.s32.totalorder %s3166_s27, %s2650_s7 }
  0x68   :  { %p2657_p5 = por %p2656_p4, %p2655_p3 }
  0x6a   :  { %p2658_p6 = pnand %p2657_p5, %p2651_p2 }
  0x6c   :  { %2661 = shalt.err (!%p2658_p6)  }
  0x6d   :  { %79 = dma.hbm_to_vmem [thread:$0]  %s72_s23, 64, %s3147_s13, [#allocation3 + $0x2], %s3041_s28, %s3041_s28, %s3042_s29 }
  0x6e   :  { %s3043_s30 = smov [#allocation2 + $0x3]   ;;  %s3211_s2 = sld [smem:[#allocation4 + $0x4]] }
  0x6f   :  { %s90_s4 = sshll.u32 %s3043_s30, 4  ;;  %s3044_s6 = smov [#allocation2 + $0x4]   ;;  %s3213_s4 = int_to_ptr.vmem [resolvable:$true] %s90_s4 }
  0x70   :  { %s104_s9 = sshll.u32 %s3044_s6, 4  ;;  %s3215_s10 = sld [smem:[#allocation4 + $0x5]]  ;;  %s3219_s9 = int_to_ptr.vmem [resolvable:$true] %s104_s9 }
  0x71   :  { %s81_s11 = sshrl.u32 %s3193_s19, 3  ;;  %s82_s12 = sand.u32 7, %s3193_s19  }
  0x72   :  { %s2214_s14 = sshll.u32 %s81_s11, 5 }
  0x73   :  { %s84_s15 = sadd.s32 %s2214_s14, %s82_s12 }
  0x74   :  { %s2215_s13 = sshll.u32 %s84_s15, 4  ;;  %s95_s17 = sshrl.u32 %s3211_s2, 3 }
  0x75   :  { %s86_s8 = scalar_lea.hbm %s3668_s1, %s2215_s13  ;;  %s96_s16 = sand.u32 7, %s3211_s2  }
  0x76   :  { %s2662_s20 = scalar_lea.hbm %s86_s8, 64  ;;  %p2665_p8 = scmp.lt.u32.totalorder %s86_s8, %s3668_s1 }
  0x77   :  { %p2663_p7 = scmp.ne.s32.totalorder %s86_s8, %s2662_s20  ;;  %p2666_p9 = scmp.lt.u32.totalorder %s3157_s0, %s2662_s20 }
  0x78   :  { %p2668_p11 = scmp.lt.u32.totalorder %s2662_s20, %s86_s8 }
  0x79   :  { %p2667_p10 = por %p2666_p9, %p2665_p8 }
  0x7b   :  { %p2669_p12 = por %p2668_p11, %p2667_p10 }
  0x7d   :  { %p2670_p13 = pnand %p2669_p12, %p2663_p7 }
  0x7f   :  { %2673 = shalt.err (!%p2670_p13)  }
  0x80   :  { %s2674_s19 = scalar_lea.vmem %s3213_s4, 64  ;;  %p2679_p1 = scmp.lt.s32.totalorder %s3213_s4, %s3109_s5 }
  0x81   :  { %p2675_p0 = scmp.ne.s32.totalorder %s3213_s4, %s2674_s19  ;;  %p2680_p2 = scmp.lt.s32.totalorder %s3166_s27, %s2674_s19 }
  0x83   :  { %p2681_p3 = por %p2680_p2, %p2679_p1 }
  0x85   :  { %p2682_p4 = pnand %p2681_p3, %p2675_p0 }
  0x87   :  { %2685 = shalt.err (!%p2682_p4)  }
  0x88   :  { %93 = dma.hbm_to_vmem [thread:$0]  %s86_s8, 64, %s3213_s4, [#allocation3 + $0x3], %s3041_s28, %s3041_s28, %s3042_s29 }
  0x89   :  { %s2217_s24 = sshll.u32 %s95_s17, 5  ;;  %s109_s25 = sshrl.u32 %s3215_s10, 3 }
  0x8a   :  { %s98_s26 = sadd.s32 %s2217_s24, %s96_s16  ;;  %s110_s7 = sand.u32 7, %s3215_s10  }
  0x8b   :  { %s2218_s30 = sshll.u32 %s98_s26, 4  ;;  %s2220_s2 = sshll.u32 %s109_s25, 5 }
  0x8c   :  { %s100_s12 = scalar_lea.hbm %s3668_s1, %s2218_s30  ;;  %s112_s14 = sadd.s32 %s2220_s2, %s110_s7 }
  0x8d   :  { %s2686_s15 = scalar_lea.hbm %s100_s12, 64  ;;  %p2689_p6 = scmp.lt.u32.totalorder %s100_s12, %s3668_s1 }
  0x8e   :  { %p2687_p5 = scmp.ne.s32.totalorder %s100_s12, %s2686_s15  ;;  %p2690_p7 = scmp.lt.u32.totalorder %s3157_s0, %s2686_s15 }
  0x8f   :  { %p2692_p9 = scmp.lt.u32.totalorder %s2686_s15, %s100_s12 }
  0x90   :  { %p2691_p8 = por %p2690_p7, %p2689_p6 }
  0x92   :  { %p2693_p10 = por %p2692_p9, %p2691_p8 }
  0x94   :  { %p2694_p11 = pnand %p2693_p10, %p2687_p5 }
  0x96   :  { %2697 = shalt.err (!%p2694_p11)  }
  0x97   :  { %s2698_s4 = scalar_lea.vmem %s3219_s9, 64  ;;  %p2703_p13 = scmp.lt.s32.totalorder %s3219_s9, %s3109_s5 }
  0x98   :  { %p2699_p12 = scmp.ne.s32.totalorder %s3219_s9, %s2698_s4  ;;  %p2704_p0 = scmp.lt.s32.totalorder %s3166_s27, %s2698_s4 }
  0x9a   :  { %p2705_p1 = por %p2704_p0, %p2703_p13 }
  0x9c   :  { %p2706_p2 = pnand %p2705_p1, %p2699_p12 }
  0x9e   :  { %2709 = shalt.err (!%p2706_p2)  }
  0x9f   :  { %107 = dma.hbm_to_vmem [thread:$0]  %s100_s12, 64, %s3219_s9, [#allocation3 + $0x4], %s3041_s28, %s3041_s28, %s3042_s29 }
  0xa0   :  { %s2221_s10 = sshll.u32 %s112_s14, 4  ;;  %s3045_s17 = smov [#allocation2 + $0x5]  }
  0xa1   :  { %s118_s21 = sshll.u32 %s3045_s17, 4  ;;  %s114_s20 = scalar_lea.hbm %s3668_s1, %s2221_s10  ;;  %s119_s21 = int_to_ptr.vmem [resolvable:$true] %s118_s21 }
  0xa2   :  { %s2710_s22 = scalar_lea.hbm %s114_s20, 64  ;;  %p2713_p4 = scmp.lt.u32.totalorder %s114_s20, %s3668_s1 }
  0xa3   :  { %p2711_p3 = scmp.ne.s32.totalorder %s114_s20, %s2710_s22  ;;  %p2714_p5 = scmp.lt.u32.totalorder %s3157_s0, %s2710_s22 }
  0xa4   :  { %p2716_p7 = scmp.lt.u32.totalorder %s2710_s22, %s114_s20 }
  0xa5   :  { %p2715_p6 = por %p2714_p5, %p2713_p4 }
  0xa7   :  { %p2717_p8 = por %p2716_p7, %p2715_p6 }
  0xa9   :  { %p2718_p9 = pnand %p2717_p8, %p2711_p3 }
  0xab   :  { %2721 = shalt.err (!%p2718_p9)  }
  0xac   :  { %s2722_s9 = scalar_lea.vmem %s119_s21, 64  ;;  %p2727_p11 = scmp.lt.s32.totalorder %s119_s21, %s3109_s5 }
  0xad   :  { %p2723_p10 = scmp.ne.s32.totalorder %s119_s21, %s2722_s9  ;;  %p2728_p12 = scmp.lt.s32.totalorder %s3166_s27, %s2722_s9 }
  0xaf   :  { %p2729_p13 = por %p2728_p12, %p2727_p11 }
  0xb1   :  { %p2730_p0 = pnand %p2729_p13, %p2723_p10 }
  0xb3   :  { %2733 = shalt.err (!%p2730_p0)  }
  0xb4   :  { %121 = dma.hbm_to_vmem [thread:$0]  %s114_s20, 64, %s119_s21, [#allocation3 + $0x5], %s3041_s28, %s3041_s28, %s3042_s29 }
  0xb5   :  { %s2222_s24 = sld [smem:[#allocation4 + $0x6]]  ;;  %s3046_s25 = smov [#allocation2 + $0x6]  }
  0xb6   :  { %s132_s26 = sshll.u32 %s3046_s25, 4  ;;  %s2225_s7 = sld [smem:[#allocation4 + $0x7]]  ;;  %s3269_s26 = int_to_ptr.vmem [resolvable:$true] %s132_s26 }
  0xb7   :  { %s3047_s30 = smov [#allocation2 + $0x7]   ;;  %s3271_s6 = sld [smem:[#allocation4 + $0x8]] }
  0xb8   :  { %s146_s2 = sshll.u32 %s3047_s30, 4  ;;  %s3048_s11 = smov [#allocation2 + $0x20]   ;;  %s3273_s2 = int_to_ptr.vmem [resolvable:$true] %s146_s2 }
  0xb9   :  { %s3275_s12 = sshll.u32 %s3048_s11, 4  ;;  %s3277_s14 = sld [smem:[#allocation4 + $0x9]]  ;;  %s161_s12 = int_to_ptr.vmem [resolvable:$true] %s3275_s12 }
  0xbb   :  { %s123_s15 = sshrl.u32 %s2222_s24, 3  ;;  %s124_s13 = sand.u32 7, %s2222_s24  }
  0xbc   :  { %s2223_s18 = sshll.u32 %s123_s15, 5  ;;  %s137_s4 = sshrl.u32 %s2225_s7, 3 }
  0xbd   :  { %s126_s10 = sadd.s32 %s2223_s18, %s124_s13  ;;  %s138_s17 = sand.u32 7, %s2225_s7  }
  0xbe   :  { %s2224_s21 = sshll.u32 %s126_s10, 4  ;;  %s2226_s8 = sshll.u32 %s137_s4, 5 }
  0xbf   :  { %s128_s22 = scalar_lea.hbm %s3668_s1, %s2224_s21  ;;  %s140_s23 = sadd.s32 %s2226_s8, %s138_s17 }
  0xc0   :  { %s2734_s19 = scalar_lea.hbm %s128_s22, 64  ;;  %p2737_p2 = scmp.lt.u32.totalorder %s128_s22, %s3668_s1 }
  0xc1   :  { %p2735_p1 = scmp.ne.s32.totalorder %s128_s22, %s2734_s19  ;;  %p2738_p3 = scmp.lt.u32.totalorder %s3157_s0, %s2734_s19 }
  0xc2   :  { %p2740_p5 = scmp.lt.u32.totalorder %s2734_s19, %s128_s22 }
  0xc3   :  { %p2739_p4 = por %p2738_p3, %p2737_p2 }
  0xc5   :  { %p2741_p6 = por %p2740_p5, %p2739_p4 }
  0xc7   :  { %p2742_p7 = pnand %p2741_p6, %p2735_p1 }
  0xc9   :  { %2745 = shalt.err (!%p2742_p7)  }
  0xca   :  { %s2746_s24 = scalar_lea.vmem %s3269_s26, 64  ;;  %p2751_p9 = scmp.lt.s32.totalorder %s3269_s26, %s3109_s5 }
  0xcb   :  { %p2747_p8 = scmp.ne.s32.totalorder %s3269_s26, %s2746_s24  ;;  %p2752_p10 = scmp.lt.s32.totalorder %s3166_s27, %s2746_s24 }
  0xcd   :  { %p2753_p11 = por %p2752_p10, %p2751_p9 }
  0xcf   :  { %p2754_p12 = pnand %p2753_p11, %p2747_p8 }
  0xd1   :  { %2757 = shalt.err (!%p2754_p12)  }
  0xd2   :  { %135 = dma.hbm_to_vmem [thread:$0]  %s128_s22, 64, %s3269_s26, [#allocation3 + $0x6], %s3041_s28, %s3041_s28, %s3042_s29 }
  0xd3   :  { %s2227_s7 = sshll.u32 %s140_s23, 4  ;;  %s151_s30 = sshrl.u32 %s3271_s6, 3 }
  0xd4   :  { %s142_s13 = scalar_lea.hbm %s3668_s1, %s2227_s7  ;;  %s152_s18 = sand.u32 7, %s3271_s6  }
  0xd5   :  { %s2758_s4 = scalar_lea.hbm %s142_s13, 64  ;;  %p2761_p0 = scmp.lt.u32.totalorder %s142_s13, %s3668_s1 }
  0xd6   :  { %p2759_p13 = scmp.ne.s32.totalorder %s142_s13, %s2758_s4  ;;  %p2762_p1 = scmp.lt.u32.totalorder %s3157_s0, %s2758_s4 }
  0xd7   :  { %p2764_p3 = scmp.lt.u32.totalorder %s2758_s4, %s142_s13 }
  0xd8   :  { %p2763_p2 = por %p2762_p1, %p2761_p0 }
  0xda   :  { %p2765_p4 = por %p2764_p3, %p2763_p2 }
  0xdc   :  { %p2766_p5 = pnand %p2765_p4, %p2759_p13 }
  0xde   :  { %2769 = shalt.err (!%p2766_p5)  }
  0xdf   :  { %s2770_s26 = scalar_lea.vmem %s3273_s2, 64  ;;  %p2775_p7 = scmp.lt.s32.totalorder %s3273_s2, %s3109_s5 }
  0xe0   :  { %p2771_p6 = scmp.ne.s32.totalorder %s3273_s2, %s2770_s26  ;;  %p2776_p8 = scmp.lt.s32.totalorder %s3166_s27, %s2770_s26 }
  0xe2   :  { %p2777_p9 = por %p2776_p8, %p2775_p7 }
  0xe4   :  { %p2778_p10 = pnand %p2777_p9, %p2771_p6 }
  0xe6   :  { %2781 = shalt.err (!%p2778_p10)  }
  0xe7   :  { %149 = dma.hbm_to_vmem [thread:$0]  %s142_s13, 64, %s3273_s2, [#allocation3 + $0x7], %s3041_s28, %s3041_s28, %s3042_s29 }
  0xe8   :  { %s2229_s6 = sshll.u32 %s151_s30, 5  ;;  %s165_s8 = sshrl.u32 %s3277_s14, 3 }
  0xe9   :  { %s154_s21 = sadd.s32 %s2229_s6, %s152_s18  ;;  %s166_s20 = sand.u32 7, %s3277_s14  }
  0xea   :  { %s2230_s16 = sshll.u32 %s154_s21, 4  ;;  %s2232_s9 = sshll.u32 %s165_s8, 5 }
  0xeb   :  { %s156_s19 = scalar_lea.hbm %s3668_s1, %s2230_s16 }
  0xec   :  { %s2782_s25 = scalar_lea.hbm %s156_s19, 64  ;;  %p2785_p12 = scmp.lt.u32.totalorder %s156_s19, %s3668_s1 }
  0xed   :  { %p2783_p11 = scmp.ne.s32.totalorder %s156_s19, %s2782_s25  ;;  %p2786_p13 = scmp.lt.u32.totalorder %s3157_s0, %s2782_s25 }
  0xee   :  { %p2788_p1 = scmp.lt.u32.totalorder %s2782_s25, %s156_s19 }
  0xef   :  { %p2787_p0 = por %p2786_p13, %p2785_p12 }
  0xf1   :  { %p2789_p2 = por %p2788_p1, %p2787_p0 }
  0xf3   :  { %p2790_p3 = pnand %p2789_p2, %p2783_p11 }
  0xf5   :  { %2793 = shalt.err (!%p2790_p3)  }
  0xf6   :  { %s2794_s2 = scalar_lea.vmem %s161_s12, 64  ;;  %p2799_p5 = scmp.lt.s32.totalorder %s161_s12, %s3109_s5 }
  0xf7   :  { %p2795_p4 = scmp.ne.s32.totalorder %s161_s12, %s2794_s2  ;;  %p2800_p6 = scmp.lt.s32.totalorder %s3166_s27, %s2794_s2 }
  0xf9   :  { %p2801_p7 = por %p2800_p6, %p2799_p5 }
  0xfb   :  { %p2802_p8 = pnand %p2801_p7, %p2795_p4 }
  0xfd   :  { %2805 = shalt.err (!%p2802_p8)  }
  0xfe   :  { %163 = dma.hbm_to_vmem [thread:$0]  %s156_s19, 64, %s161_s12, [#allocation3 + $0x8], %s3041_s28, %s3041_s28, %s3042_s29 }
  0xff   :  { %s168_s14 = sadd.s32 %s2232_s9, %s166_s20  ;;  %s3049_s11 = smov [#allocation2 + $0x21]  }
 0x100   :  { %s2233_s30 = sshll.u32 %s168_s14, 4  ;;  %s174_s15 = sshll.u32 %s3049_s11, 4  ;;  %s175_s15 = int_to_ptr.vmem [resolvable:$true] %s174_s15 }
 0x101   :  { %s170_s4 = scalar_lea.hbm %s3668_s1, %s2233_s30 }
 0x102   :  { %s2806_s10 = scalar_lea.hbm %s170_s4, 64  ;;  %p2809_p10 = scmp.lt.u32.totalorder %s170_s4, %s3668_s1 }
 0x103   :  { %p2807_p9 = scmp.ne.s32.totalorder %s170_s4, %s2806_s10  ;;  %p2810_p11 = scmp.lt.u32.totalorder %s3157_s0, %s2806_s10 }
 0x104   :  { %p2812_p13 = scmp.lt.u32.totalorder %s2806_s10, %s170_s4 }
 0x105   :  { %p2811_p12 = por %p2810_p11, %p2809_p10 }
 0x107   :  { %p2813_p0 = por %p2812_p13, %p2811_p12 }
 0x109   :  { %p2814_p1 = pnand %p2813_p0, %p2807_p9 }
 0x10b   :  { %2817 = shalt.err (!%p2814_p1)  }
 0x10c   :  { %s2818_s12 = scalar_lea.vmem %s175_s15, 64  ;;  %p2823_p3 = scmp.lt.s32.totalorder %s175_s15, %s3109_s5 }
 0x10d   :  { %p2819_p2 = scmp.ne.s32.totalorder %s175_s15, %s2818_s12  ;;  %p2824_p4 = scmp.lt.s32.totalorder %s3166_s27, %s2818_s12 }
 0x10f   :  { %p2825_p5 = por %p2824_p4, %p2823_p3 }
 0x111   :  { %p2826_p6 = pnand %p2825_p5, %p2819_p2 }
 0x113   :  { %2829 = shalt.err (!%p2826_p6)  }
 0x114   :  { %177 = dma.hbm_to_vmem [thread:$0]  %s170_s4, 64, %s175_s15, [#allocation3 + $0x9], %s3041_s28, %s3041_s28, %s3042_s29 }
 0x115   :  { %s2234_s6 = sld [smem:[#allocation4 + $0xa]]  ;;  %s3050_s21 = smov [#allocation2 + $0x22]  }
 0x116   :  { %s188_s8 = sshll.u32 %s3050_s21, 4  ;;  %s2237_s16 = sld [smem:[#allocation4 + $0xb]]  ;;  %s3340_s8 = int_to_ptr.vmem [resolvable:$true] %s188_s8 }
 0x117   :  { %s3051_s20 = smov [#allocation2 + $0x23]   ;;  %s3342_s23 = sld [smem:[#allocation4 + $0xc]] }
 0x118   :  { %s202_s22 = sshll.u32 %s3051_s20, 4  ;;  %s3052_s19 = smov [#allocation2 + $0x24]   ;;  %s3344_s22 = int_to_ptr.vmem [resolvable:$true] %s202_s22 }
 0x119   :  { %s3346_s9 = sshll.u32 %s3052_s19, 4  ;;  %s3348_s25 = sld [smem:[#allocation4 + $0xd]]  ;;  %s217_s9 = int_to_ptr.vmem [resolvable:$true] %s3346_s9 }
 0x11b   :  { %s179_s24 = sshrl.u32 %s2234_s6, 3  ;;  %s180_s7 = sand.u32 7, %s2234_s6  }
 0x11c   :  { %s2235_s2 = sshll.u32 %s179_s24, 5  ;;  %s193_s14 = sshrl.u32 %s2237_s16, 3 }
 0x11d   :  { %s182_s30 = sadd.s32 %s2235_s2, %s180_s7  ;;  %s194_s11 = sand.u32 7, %s2237_s16  }
 0x11e   :  { %s2236_s15 = sshll.u32 %s182_s30, 4  ;;  %s2238_s13 = sshll.u32 %s193_s14, 5 }
 0x11f   :  { %s184_s10 = scalar_lea.hbm %s3668_s1, %s2236_s15  ;;  %s196_s17 = sadd.s32 %s2238_s13, %s194_s11 }
 0x120   :  { %s2830_s26 = scalar_lea.hbm %s184_s10, 64  ;;  %p2833_p8 = scmp.lt.u32.totalorder %s184_s10, %s3668_s1 }
 0x121   :  { %p2831_p7 = scmp.ne.s32.totalorder %s184_s10, %s2830_s26  ;;  %p2834_p9 = scmp.lt.u32.totalorder %s3157_s0, %s2830_s26 }
 0x122   :  { %p2836_p11 = scmp.lt.u32.totalorder %s2830_s26, %s184_s10 }
 0x123   :  { %p2835_p10 = por %p2834_p9, %p2833_p8 }
 0x125   :  { %p2837_p12 = por %p2836_p11, %p2835_p10 }
 0x127   :  { %p2838_p13 = pnand %p2837_p12, %p2831_p7 }
 0x129   :  { %2841 = shalt.err (!%p2838_p13)  }
 0x12a   :  { %s2842_s6 = scalar_lea.vmem %s3340_s8, 64  ;;  %p2847_p1 = scmp.lt.s32.totalorder %s3340_s8, %s3109_s5 }
 0x12b   :  { %p2843_p0 = scmp.ne.s32.totalorder %s3340_s8, %s2842_s6  ;;  %p2848_p2 = scmp.lt.s32.totalorder %s3166_s27, %s2842_s6 }
 0x12d   :  { %p2849_p3 = por %p2848_p2, %p2847_p1 }
 0x12f   :  { %p2850_p4 = pnand %p2849_p3, %p2843_p0 }
 0x131   :  { %2853 = shalt.err (!%p2850_p4)  }
 0x132   :  { %191 = dma.hbm_to_vmem [thread:$0]  %s184_s10, 64, %s3340_s8, [#allocation3 + $0xa], %s3041_s28, %s3041_s28, %s3042_s29 }
 0x133   :  { %s2239_s16 = sshll.u32 %s196_s17, 4  ;;  %s207_s20 = sshrl.u32 %s3342_s23, 3 }
 0x134   :  { %s198_s7 = scalar_lea.hbm %s3668_s1, %s2239_s16  ;;  %s208_s2 = sand.u32 7, %s3342_s23  }
 0x135   :  { %s2854_s14 = scalar_lea.hbm %s198_s7, 64  ;;  %p2857_p6 = scmp.lt.u32.totalorder %s198_s7, %s3668_s1 }
 0x136   :  { %p2855_p5 = scmp.ne.s32.totalorder %s198_s7, %s2854_s14  ;;  %p2858_p7 = scmp.lt.u32.totalorder %s3157_s0, %s2854_s14 }
 0x137   :  { %p2860_p9 = scmp.lt.u32.totalorder %s2854_s14, %s198_s7 }
 0x138   :  { %p2859_p8 = por %p2858_p7, %p2857_p6 }
 0x13a   :  { %p2861_p10 = por %p2860_p9, %p2859_p8 }
 0x13c   :  { %p2862_p11 = pnand %p2861_p10, %p2855_p5 }
 0x13e   :  { %2865 = shalt.err (!%p2862_p11)  }
 0x13f   :  { %s2866_s8 = scalar_lea.vmem %s3344_s22, 64  ;;  %p2871_p13 = scmp.lt.s32.totalorder %s3344_s22, %s3109_s5 }
 0x140   :  { %p2867_p12 = scmp.ne.s32.totalorder %s3344_s22, %s2866_s8  ;;  %p2872_p0 = scmp.lt.s32.totalorder %s3166_s27, %s2866_s8 }
 0x142   :  { %p2873_p1 = por %p2872_p0, %p2871_p13 }
 0x144   :  { %p2874_p2 = pnand %p2873_p1, %p2867_p12 }
 0x146   :  { %2877 = shalt.err (!%p2874_p2)  }
 0x147   :  { %205 = dma.hbm_to_vmem [thread:$0]  %s198_s7, 64, %s3344_s22, [#allocation3 + $0xb], %s3041_s28, %s3041_s28, %s3042_s29 }
 0x148   :  { %s2241_s23 = sshll.u32 %s207_s20, 5  ;;  %s221_s13 = sshrl.u32 %s3348_s25, 3 }
 0x149   :  { %s210_s15 = sadd.s32 %s2241_s23, %s208_s2  ;;  %s222_s4 = sand.u32 7, %s3348_s25  }
 0x14a   :  { %s2242_s18 = sshll.u32 %s210_s15, 4  ;;  %s2244_s12 = sshll.u32 %s221_s13, 5 }
 0x14b   :  { %s212_s26 = scalar_lea.hbm %s3668_s1, %s2242_s18 }
 0x14c   :  { %s2878_s21 = scalar_lea.hbm %s212_s26, 64  ;;  %p2881_p4 = scmp.lt.u32.totalorder %s212_s26, %s3668_s1 }
 0x14d   :  { %p2879_p3 = scmp.ne.s32.totalorder %s212_s26, %s2878_s21  ;;  %p2882_p5 = scmp.lt.u32.totalorder %s3157_s0, %s2878_s21 }
 0x14e   :  { %p2884_p7 = scmp.lt.u32.totalorder %s2878_s21, %s212_s26 }
 0x14f   :  { %p2883_p6 = por %p2882_p5, %p2881_p4 }
 0x151   :  { %p2885_p8 = por %p2884_p7, %p2883_p6 }
 0x153   :  { %p2886_p9 = pnand %p2885_p8, %p2879_p3 }
 0x155   :  { %2889 = shalt.err (!%p2886_p9)  }
 0x156   :  { %s2890_s22 = scalar_lea.vmem %s217_s9, 64  ;;  %p2895_p11 = scmp.lt.s32.totalorder %s217_s9, %s3109_s5 }
 0x157   :  { %p2891_p10 = scmp.ne.s32.totalorder %s217_s9, %s2890_s22  ;;  %p2896_p12 = scmp.lt.s32.totalorder %s3166_s27, %s2890_s22 }
 0x159   :  { %p2897_p13 = por %p2896_p12, %p2895_p11 }
 0x15b   :  { %p2898_p0 = pnand %p2897_p13, %p2891_p10 }
 0x15d   :  { %2901 = shalt.err (!%p2898_p0)  }
 0x15e   :  { %219 = dma.hbm_to_vmem [thread:$0]  %s212_s26, 64, %s217_s9, [#allocation3 + $0xc], %s3041_s28, %s3041_s28, %s3042_s29 }
 0x15f   :  { %s224_s25 = sadd.s32 %s2244_s12, %s222_s4  ;;  %s3053_s19 = smov [#allocation2 + $0x25]  }
 0x160   :  { %s2245_s20 = sshll.u32 %s224_s25, 4  ;;  %s230_s24 = sshll.u32 %s3053_s19, 4  ;;  %s231_s24 = int_to_ptr.vmem [resolvable:$true] %s230_s24 }
 0x161   :  { %s226_s14 = scalar_lea.hbm %s3668_s1, %s2245_s20 }
 0x162   :  { %s2902_s30 = scalar_lea.hbm %s226_s14, 64  ;;  %p2905_p2 = scmp.lt.u32.totalorder %s226_s14, %s3668_s1 }
 0x163   :  { %p2903_p1 = scmp.ne.s32.totalorder %s226_s14, %s2902_s30  ;;  %p2906_p3 = scmp.lt.u32.totalorder %s3157_s0, %s2902_s30 }
 0x164   :  { %p2908_p5 = scmp.lt.u32.totalorder %s2902_s30, %s226_s14 }
 0x165   :  { %p2907_p4 = por %p2906_p3, %p2905_p2 }
 0x167   :  { %p2909_p6 = por %p2908_p5, %p2907_p4 }
 0x169   :  { %p2910_p7 = pnand %p2909_p6, %p2903_p1 }
 0x16b   :  { %2913 = shalt.err (!%p2910_p7)  }
 0x16c   :  { %s2914_s9 = scalar_lea.vmem %s231_s24, 64  ;;  %p2919_p9 = scmp.lt.s32.totalorder %s231_s24, %s3109_s5 }
 0x16d   :  { %p2915_p8 = scmp.ne.s32.totalorder %s231_s24, %s2914_s9  ;;  %p2920_p10 = scmp.lt.s32.totalorder %s3166_s27, %s2914_s9 }
 0x16f   :  { %p2921_p11 = por %p2920_p10, %p2919_p9 }
 0x171   :  { %p2922_p12 = pnand %p2921_p11, %p2915_p8 }
 0x173   :  { %2925 = shalt.err (!%p2922_p12)  }
 0x174   :  { %233 = dma.hbm_to_vmem [thread:$0]  %s226_s14, 64, %s231_s24, [#allocation3 + $0xd], %s3041_s28, %s3041_s28, %s3042_s29 }
 0x175   :  { %s2246_s23 = sld [smem:[#allocation4 + $0xe]]  ;;  %s2249_s15 = sld [smem:[#allocation4 + $0xf]] }
 0x176   :  { %s3054_s13 = smov [#allocation2 + $0x26]   ;;  %s3055_s4 = smov [#allocation2 + $0x27]  }
 0x177   :  { %s244_s18 = sshll.u32 %s3054_s13, 4  ;;  %s258_s10 = sshll.u32 %s3055_s4, 4  ;;  %s3411_s18 = int_to_ptr.vmem [resolvable:$true] %s244_s18  ;;  %s3413_s10 = int_to_ptr.vmem [resolvable:$true] %s258_s10 }
 0x17b   :  { %s235_s17 = sshrl.u32 %s2246_s23, 3  ;;  %s236_s26 = sand.u32 7, %s2246_s23  }
 0x17c   :  { %s2247_s12 = sshll.u32 %s235_s17, 5  ;;  %s249_s21 = sshrl.u32 %s2249_s15, 3 }
 0x17d   :  { %s238_s6 = sadd.s32 %s2247_s12, %s236_s26  ;;  %s250_s16 = sand.u32 7, %s2249_s15  }
 0x17e   :  { %s2248_s22 = sshll.u32 %s238_s6, 4  ;;  %s2250_s25 = sshll.u32 %s249_s21, 5 }
 0x17f   :  { %s240_s24 = scalar_lea.hbm %s3668_s1, %s2248_s22  ;;  %s252_s7 = sadd.s32 %s2250_s25, %s250_s16 }
 0x180   :  { %s2926_s2 = scalar_lea.hbm %s240_s24, 64  ;;  %p2929_p0 = scmp.lt.u32.totalorder %s240_s24, %s3668_s1 }
 0x181   :  { %p2927_p13 = scmp.ne.s32.totalorder %s240_s24, %s2926_s2  ;;  %p2930_p1 = scmp.lt.u32.totalorder %s3157_s0, %s2926_s2 }
 0x182   :  { %p2932_p3 = scmp.lt.u32.totalorder %s2926_s2, %s240_s24 }
 0x183   :  { %p2931_p2 = por %p2930_p1, %p2929_p0 }
 0x185   :  { %p2933_p4 = por %p2932_p3, %p2931_p2 }
 0x187   :  { %p2934_p5 = pnand %p2933_p4, %p2927_p13 }
 0x189   :  { %2937 = shalt.err (!%p2934_p5)  }
 0x18a   :  { %s2938_s11 = scalar_lea.vmem %s3411_s18, 64  ;;  %p2943_p7 = scmp.lt.s32.totalorder %s3411_s18, %s3109_s5 }
 0x18b   :  { %p2939_p6 = scmp.ne.s32.totalorder %s3411_s18, %s2938_s11  ;;  %p2944_p8 = scmp.lt.s32.totalorder %s3166_s27, %s2938_s11 }
 0x18d   :  { %p2945_p9 = por %p2944_p8, %p2943_p7 }
 0x18f   :  { %p2946_p10 = pnand %p2945_p9, %p2939_p6 }
 0x191   :  { %2949 = shalt.err (!%p2946_p10)  }
 0x192   :  { %247 = dma.hbm_to_vmem [thread:$0]  %s240_s24, 64, %s3411_s18, [#allocation3 + $0xe], %s3041_s28, %s3041_s28, %s3042_s29 }
 0x193   :  { %s2251_s8 = sshll.u32 %s252_s7, 4 }
 0x194   :  { %s254_s15 = scalar_lea.hbm %s3668_s1, %s2251_s8 }
 0x195   :  { %s2950_s13 = scalar_lea.hbm %s254_s15, 64  ;;  %p2953_p12 = scmp.lt.u32.totalorder %s254_s15, %s3668_s1 }
 0x196   :  { %p2951_p11 = scmp.ne.s32.totalorder %s254_s15, %s2950_s13  ;;  %p2954_p13 = scmp.lt.u32.totalorder %s3157_s0, %s2950_s13 }
 0x197   :  { %p2956_p1 = scmp.lt.u32.totalorder %s2950_s13, %s254_s15 }
 0x198   :  { %p2955_p0 = por %p2954_p13, %p2953_p12 }
 0x19a   :  { %p2957_p2 = por %p2956_p1, %p2955_p0 }
 0x19c   :  { %p2958_p3 = pnand %p2957_p2, %p2951_p11 }
 0x19e   :  { %2961 = shalt.err (!%p2958_p3)  }
 0x19f   :  { %s2962_s18 = scalar_lea.vmem %s3413_s10, 64  ;;  %p2967_p5 = scmp.lt.s32.totalorder %s3413_s10, %s3109_s5 }
 0x1a0   :  { %p2963_p4 = scmp.ne.s32.totalorder %s3413_s10, %s2962_s18  ;;  %p2968_p6 = scmp.lt.s32.totalorder %s3166_s27, %s2962_s18 }
 0x1a2   :  { %p2969_p7 = por %p2968_p6, %p2967_p5 }
 0x1a4   :  { %p2970_p8 = pnand %p2969_p7, %p2963_p4 }
 0x1a6   :  { %2973 = shalt.err (!%p2970_p8)  }
 0x1a7   :  { %261 = dma.hbm_to_vmem [thread:$0]  %s254_s15, 64, %s3413_s10, [#allocation3 + $0xf], %s3041_s28, %s3041_s28, %s3042_s29 }
 0x1a8   :  { %3000 = dma.done.wait [#allocation3], 64 }
 0x1a9   :  { %3001 = vsyncadd [#allocation3], 4294967232 }
 0x1aa   :  { %3002 = dma.done.wait [#allocation3 + $0x1], 64 }
 0x1ab   :  { %3003 = vsyncadd [#allocation3 + $0x1], 4294967232 }
 0x1ac   :  { %3004 = dma.done.wait [#allocation3 + $0x2], 64 }
 0x1ad   :  { %3005 = vsyncadd [#allocation3 + $0x2], 4294967232 }
 0x1ae   :  { %3006 = dma.done.wait [#allocation3 + $0x3], 64 }
 0x1af   :  { %3007 = vsyncadd [#allocation3 + $0x3], 4294967232 }
 0x1b0   :  { %3008 = dma.done.wait [#allocation3 + $0x4], 64 }
 0x1b1   :  { %3009 = vsyncadd [#allocation3 + $0x4], 4294967232 }
 0x1b2   :  { %3010 = dma.done.wait [#allocation3 + $0x5], 64 }
 0x1b3   :  { %3011 = vsyncadd [#allocation3 + $0x5], 4294967232 }
 0x1b4   :  { %3012 = dma.done.wait [#allocation3 + $0x6], 64 }
 0x1b5   :  { %3013 = vsyncadd [#allocation3 + $0x6], 4294967232 }
 0x1b6   :  { %3014 = dma.done.wait [#allocation3 + $0x7], 64 }
 0x1b7   :  { %3015 = vsyncadd [#allocation3 + $0x7], 4294967232 }
 0x1b8   :  { %3016 = dma.done.wait [#allocation3 + $0x8], 64 }
 0x1b9   :  { %3017 = vsyncadd [#allocation3 + $0x8], 4294967232 }
 0x1ba   :  { %3018 = dma.done.wait [#allocation3 + $0x9], 64 }
 0x1bb   :  { %3019 = vsyncadd [#allocation3 + $0x9], 4294967232 }
 0x1bc   :  { %3020 = dma.done.wait [#allocation3 + $0xa], 64 }
 0x1bd   :  { %3021 = vsyncadd [#allocation3 + $0xa], 4294967232 }
 0x1be   :  { %3022 = dma.done.wait [#allocation3 + $0xb], 64 }
 0x1bf   :  { %3023 = vsyncadd [#allocation3 + $0xb], 4294967232 }
 0x1c0   :  { %3024 = dma.done.wait [#allocation3 + $0xc], 64 }
 0x1c1   :  { %3025 = vsyncadd [#allocation3 + $0xc], 4294967232 }
 0x1c2   :  { %3026 = dma.done.wait [#allocation3 + $0xd], 64 }
 0x1c3   :  { %3027 = vsyncadd [#allocation3 + $0xd], 4294967232 }
 0x1c4   :  { %3028 = dma.done.wait [#allocation3 + $0xe], 64 }
 0x1c5   :  { %3029 = vsyncadd [#allocation3 + $0xe], 4294967232  ;;  %v3449_v20 = vpack.c.bf16 %v3107_v5, %v3099_v1  ;;  %v3453_v21 = vpack.c.bf16 %v3105_v4, %v3097_v0  ;;  %v3457_v22 = vpack.c.bf16 %v3129_v13, %v3119_v9 }
 0x1c6   :  { %3030 = dma.done.wait [#allocation3 + $0xf], 64 }
 0x1c7   :  { %3031 = vsyncadd [#allocation3 + $0xf], 4294967232  ;;  %v3461_v23 = vpack.c.bf16 %v3113_v7, %v3103_v3  ;;  %v3465_v24 = vpack.c.bf16 %v3111_v6, %v3101_v2  ;;  %v3469_v25 = vpack.c.bf16 %v3135_v15, %v3123_v11  ;;  %2314 = vmatprep.subr.bf16.mxu0 %v3449_v20  ;;  %v3056_v26 = vmov 0.0   ;;  %v314_v29 = vld [vmem:[#allocation2] sm:$0x3]  ;;  %s3059_s1 = smov [#allocation9]  }
 0x1c8   :  { %386 = vmatprep.mubr.f32.mxu0 %v3056_v26  ;;  %2316 = vmatpush1.bf16.msra.mxu0 %v3453_v21  ;;  %v3476_v27 = vpack.c.bf16 %v3127_v12, %v3115_v8  ;;  %v3483_v28 = vpack.c.bf16 %v3131_v14, %v3121_v10  ;;  %v315_v30 = vld [vmem:[#allocation2 + $0x8] sm:$0x3]  ;;  %v316_v32 = vld [vmem:[#allocation2 + $0x10] sm:$0x3]  ;;  %v317_v41 = vld [vmem:[#allocation2 + $0x18] sm:$0x3] }
 0x1c9   :  { %2322 = vmatprep.subr.bf16.mxu1 %v3461_v23  ;;  %2318 = vmatprep.subr.bf16.mxu0 %v3457_v22  ;;  %vm318_vm0 = vcmask 326656   ;;  %v494_v59 = vld [vmem:[#allocation2] sm:$0xc]  ;;  %v495_v63 = vld [vmem:[#allocation2 + $0x8] sm:$0xc]  ;;  %vm486_vm1 = vcmask 320512  }
 0x1ca   :  { %2324 = vmatpush1.bf16.msra.mxu1 %v3465_v24  ;;  %457 = vmatprep.mubr.f32.mxu1 %v3056_v26  ;;  %v496_v5 = vld [vmem:[#allocation2 + $0x10] sm:$0xc]  ;;  %v497_v11 = vld [vmem:[#allocation2 + $0x18] sm:$0xc]  ;;  %vm680_vm2 = vcmask 322562   ;;  %vm1841_vm3 = vcmask 1040384  }
 0x1cb   :  { %2326 = vmatprep.subr.bf16.mxu1 %v3469_v25  ;;  %vm875_vm4 = vcmask 324612   ;;  %vm1843_vm5 = vcmask 1041408   ;;  %vm1070_vm6 = vcmask 326662   ;;  %vm1845_vm7 = vcmask 1042432   ;;  %s2020_s5 = sshll.u32 %s3059_s1, 4  ;;  %s2021_s5 = int_to_ptr.vmem [resolvable:$true] %s2020_s5 }
 0x1cc   :  { %2320 = vmatpush1.bf16.msra.mxu0 %v3476_v27  ;;  %vm1847_vm8 = vcmask 1043456   ;;  %vm1849_vm9 = vcmask 1044480   ;;  %vm1851_vm10 = vcmask 1045504   ;;  %vm3058_vm11 = vmmov 0   ;;  %s2974_s0 = scalar_lea.vmem %s2021_s5, 128  ;;  %p2979_p10 = scmp.lt.s32.totalorder %s2021_s5, %s2021_s5 }
 0x1cd   :  { %330 = vmatprep.subr.mxu0 %v3139_v17  ;;  %vm1853_vm12 = vcmask 1046528   ;;  %vm1938_vm13 = vcmask 130048   ;;  %vm2012_vm14 = vcmask 72704   ;;  %p2975_p9 = scmp.ne.s32.totalorder %s2021_s5, %s2974_s0  ;;  %p2980_p11 = scmp.lt.s32.totalorder %s2974_s0, %s2974_s0 }
 0x1ce   :  { %2328 = vmatpush1.bf16.msra.mxu1 %v3483_v28 }
 0x1cf   :  { %401 = vmatprep.subr.mxu1 %v3145_v19  ;;  %p2981_p12 = por %p2980_p11, %p2979_p10 }
 0x1d0   :  { %331 = vmatpush1.msra.mxu0 %v3137_v16 }
 0x1d1   :  { %387 = vmatmul.mubr.f32.vlgmr.msra.gmra.mrb[0].mxu0 %v3056_v26  ;;  %2330 = vmatprep.subr.bf16.mxu0 %v3449_v20  ;;  %p2982_p13 = pnand %p2981_p12, %p2975_p9 }
 0x1d2   :  { %402 = vmatpush1.msra.mxu1 %v3143_v18  ;;  %2332 = vmatpush1.bf16.msra.mxu0 %v3453_v21 }
 0x1d3   :  { %458 = vmatmul.mubr.f32.vlgmr.msra.gmra.mrb[0].mxu1 %v3056_v26  ;;  %2338 = vmatprep.subr.bf16.mxu1 %v3461_v23 }
 0x1d4   :  { %2340 = vmatpush1.bf16.msra.mxu1 %v3465_v24  ;;  %2334 = vmatprep.subr.bf16.mxu0 %v3457_v22 }
 0x1d5   :  { %2342 = vmatprep.subr.bf16.mxu1 %v3469_v25  ;;  %565 = vmatprep.mubr.f32.mxu0 %v3056_v26 }
 0x1d6   :  { %636 = vmatprep.mubr.f32.mxu1 %v3056_v26  ;;  %2336 = vmatpush1.bf16.msra.mxu0 %v3476_v27 }
 0x1d7   :  { %509 = vmatprep.subr.mxu0 %v3139_v17 }
 0x1d8   :  { %2344 = vmatpush1.bf16.msra.mxu1 %v3483_v28 }
 0x1d9   :  { %580 = vmatprep.subr.mxu1 %v3145_v19 }
 0x1da   :  { %510 = vmatpush1.msra.mxu0 %v3137_v16 }
 0x1db   :  { %2346 = vmatprep.subr.bf16.mxu0 %v3449_v20 }
 0x1dc   :  { %581 = vmatpush1.msra.mxu1 %v3143_v18 }
 0x1dd   :  { %2354 = vmatprep.subr.bf16.mxu1 %v3461_v23 }
 0x2a4   :  { %v388_v31 = vpop.f32.mrb[0].mxu0 }
 0x2a5   :  { %v464_v33 = vadd.f32 %v388_v31, %v314_v29  ;;  %v390_v34 = vpop.f32.mrb[1].mxu0 }
 0x2a6   :  { %v459_v35 = vpop.f32.mrb[0].mxu1  ;;  %v465_v36 = vadd.f32 %v390_v34, %v315_v30 }
 0x2a7   :  { %v461_v37 = vpop.f32.mrb[1].mxu1  ;;  %v468_v38 = vmul.f32 0.5, %v464_v33  ;;  %v466_v39 = vadd.f32 %v459_v35, %v316_v32 }
 0x2a8   :  { %v472_v40 = vmul.f32 0.5, %v465_v36  ;;  %v467_v42 = vadd.f32 %v461_v37, %v317_v41 }
 0x2a9   :  { %2476 = vtanh.f32 %v468_v38 }
 0x2aa   :  { %2478 = vtanh.f32 %v472_v40  ;;  %v477_v43 = vmul.f32 0.5, %v467_v42 }
 0x2ab   :  { %2480 = vtanh.f32 %v466_v39 }
 0x2ac   :  { %2482 = vtanh.f32 %v477_v43 }
 0x2b3   :  { %v2477_v44 = vpop.eup %2476 }
 0x2b4   :  { %v2479_v45 = vpop.eup %2478  ;;  %v470_v46 = vmul.f32 0.5, %v2477_v44 }
 0x2b5   :  { %v2481_v47 = vpop.eup %2480  ;;  %v474_v48 = vmul.f32 0.5, %v2479_v45 }
 0x2b6   :  { %v471_v49 = vadd.f32 0.5, %v470_v46  ;;  %v2483_v54 = vpop.eup %2482 }
 0x2b7   :  { %v475_v50 = vadd.f32 0.5, %v474_v48  ;;  %v479_v55 = vmul.f32 0.5, %v2483_v54 }
 0x2b8   :  { %v482_v51 = vmul.f32 %v2481_v47, %v471_v49 }
 0x2b9   :  { %v481_v52 = vmul.f32 0.0, %v475_v50  ;;  %v480_v56 = vadd.f32 0.5, %v479_v55 }
 0x2bb   :  { %v483_v53 = vadd.f32 %v482_v51, %v481_v52 }
 0x2bd   :  { %2484 = vtanh.f32 %v483_v53  ;;  %v673_v34 = vrot.slane %v483_v53, 6 }
 0x2c7   :  { %v2485_v57 = vpop.eup %2484 }
 0x2c8   :  { %v485_v58 = vmul.f32 %v2485_v57, %v480_v56 }
 0x2ca   :  { %2252 = vmatmul.mubr.msk.f32.vlgmr.msra.gmra.mrb[2].mxu0 %vm318_vm0, %v485_v58  ;;  %2253 = vmatmul.mubr.msk.f32.vlgmr.msra.gmra.mrb[2].mxu1 %vm318_vm0, %v485_v58  ;;  %v487_v38 = vsel %vm486_vm1, %v485_v58, -inf }
 0x2cb   :  { %2348 = vmatpush1.bf16.msra.mxu0 %v3453_v21  ;;  %2356 = vmatpush1.bf16.msra.mxu1 %v3465_v24  ;;  %v488_v40 = vrot.slane %v487_v38, 4 }
 0x2cc   :  { %2350 = vmatprep.subr.bf16.mxu0 %v3457_v22  ;;  %2358 = vmatprep.subr.bf16.mxu1 %v3469_v25 }
 0x2cd   :  { %760 = vmatprep.mubr.f32.mxu0 %v3056_v26  ;;  %831 = vmatprep.mubr.f32.mxu1 %v3056_v26  ;;  %v489_v42 = vmax.f32 %v487_v38, %v488_v40 }
 0x2cf   :  { %2352 = vmatpush1.bf16.msra.mxu0 %v3476_v27  ;;  %2360 = vmatpush1.bf16.msra.mxu1 %v3483_v28  ;;  %v490_v46 = vrot.slane %v489_v42, 2 }
 0x2d0   :  { %704 = vmatprep.subr.mxu0 %v3139_v17  ;;  %775 = vmatprep.subr.mxu1 %v3145_v19 }
 0x2d1   :  { %v491_v50 = vmax.f32 %v489_v42, %v490_v46 }
 0x2d3   :  { %705 = vmatpush1.msra.mxu0 %v3137_v16  ;;  %776 = vmatpush1.msra.mxu1 %v3143_v18  ;;  %v492_v53 = vrot.slane %v491_v50, 1 }
 0x2d4   :  { %2362 = vmatprep.subr.bf16.mxu0 %v3449_v20  ;;  %2370 = vmatprep.subr.bf16.mxu1 %v3461_v23 }
 0x2d5   :  { %v493_v56 = vmax.f32 %v491_v50, %v492_v53 }
 0x39d   :  { %v567_v60 = vpop.f32.mrb[2].mxu0  ;;  %v638_v61 = vpop.f32.mrb[2].mxu1 }
 0x39e   :  { %v647_v62 = vrot.slane %v567_v60, 6  ;;  %v569_v0 = vpop.f32.mrb[3].mxu0  ;;  %v640_v1 = vpop.f32.mrb[3].mxu1  ;;  %v649_v4 = vrot.slane %v638_v61, 6 }
 0x39f   :  { %v648_v2 = vrot.slane %v569_v0, 6  ;;  %v650_v10 = vrot.slane %v640_v1, 6 }
 0x3a0   :  { %v655_v3 = vadd.f32 %v647_v62, %v494_v59  ;;  %v657_v9 = vadd.f32 %v649_v4, %v496_v5  ;;  %v688_v59 = vld [vmem:[#allocation2] sm:$0x30]  ;;  %v690_v5 = vld [vmem:[#allocation2 + $0x10] sm:$0x30] }
 0x3a1   :  { %v656_v6 = vadd.f32 %v648_v2, %v495_v63  ;;  %v658_v12 = vadd.f32 %v650_v10, %v497_v11  ;;  %v689_v63 = vld [vmem:[#allocation2 + $0x8] sm:$0x30]  ;;  %v691_v11 = vld [vmem:[#allocation2 + $0x18] sm:$0x30] }
 0x3a2   :  { %v659_v7 = vmul.f32 0.5, %v655_v3 }
 0x3a3   :  { %v663_v8 = vmul.f32 0.5, %v656_v6  ;;  %v668_v13 = vmul.f32 0.5, %v658_v12 }
 0x3a4   :  { %2486 = vtanh.f32 %v659_v7 }
 0x3a5   :  { %2488 = vtanh.f32 %v663_v8 }
 0x3a6   :  { %2490 = vtanh.f32 %v657_v9 }
 0x3a7   :  { %2492 = vtanh.f32 %v668_v13 }
 0x3ae   :  { %v2487_v14 = vpop.eup %2486 }
 0x3af   :  { %v2489_v15 = vpop.eup %2488  ;;  %v661_v29 = vmul.f32 0.5, %v2487_v14 }
 0x3b0   :  { %v665_v30 = vmul.f32 0.5, %v2489_v15  ;;  %v2491_v32 = vpop.eup %2490 }
 0x3b1   :  { %v662_v31 = vadd.f32 0.5, %v661_v29  ;;  %v2493_v39 = vpop.eup %2492 }
 0x3b2   :  { %v666_v33 = vadd.f32 0.5, %v665_v30  ;;  %v670_v41 = vmul.f32 0.5, %v2493_v39 }
 0x3b3   :  { %v676_v35 = vmul.f32 %v2491_v32, %v662_v31 }
 0x3b4   :  { %v675_v36 = vmul.f32 %v673_v34, %v666_v33  ;;  %v671_v43 = vadd.f32 0.5, %v670_v41 }
 0x3b6   :  { %v3527_v37 = vadd.f32 %v676_v35, %v675_v36 }
 0x3b8   :  { %2494 = vtanh.f32 %v3527_v37  ;;  %v868_v34 = vrot.slane %v3527_v37, 6 }
 0x3c2   :  { %v2495_v44 = vpop.eup %2494 }
 0x3c3   :  { %v679_v45 = vmul.f32 %v2495_v44, %v671_v43 }
 0x3c5   :  { %v681_v47 = vsel %vm680_vm2, %v679_v45, -inf  ;;  %v693_v48 = vrot.slane %v679_v45, 2 }
 0x3c6   :  { %v682_v49 = vrot.slane %v681_v47, 4 }
 0x3c7   :  { %2254 = vmatmul.mubr.msk.f32.vlgmr.msra.gmra.mrb[4].mxu0 %vm318_vm0, %v693_v48  ;;  %2255 = vmatmul.mubr.msk.f32.vlgmr.msra.gmra.mrb[4].mxu1 %vm318_vm0, %v693_v48 }
 0x3c8   :  { %v683_v51 = vmax.f32 %v681_v47, %v682_v49  ;;  %2364 = vmatpush1.bf16.msra.mxu0 %v3453_v21  ;;  %2372 = vmatpush1.bf16.msra.mxu1 %v3465_v24 }
 0x3c9   :  { %2366 = vmatprep.subr.bf16.mxu0 %v3457_v22  ;;  %2374 = vmatprep.subr.bf16.mxu1 %v3469_v25 }
 0x3ca   :  { %v684_v52 = vrot.slane %v683_v51, 2  ;;  %955 = vmatprep.mubr.f32.mxu0 %v3056_v26  ;;  %1026 = vmatprep.mubr.f32.mxu1 %v3056_v26 }
 0x3cc   :  { %v685_v54 = vmax.f32 %v683_v51, %v684_v52  ;;  %2368 = vmatpush1.bf16.msra.mxu0 %v3476_v27  ;;  %2376 = vmatpush1.bf16.msra.mxu1 %v3483_v28  ;;  %v883_v52 = vld [vmem:[#allocation2] sm:$0xc0] }
 0x3cd   :  { %899 = vmatprep.subr.mxu0 %v3139_v17  ;;  %970 = vmatprep.subr.mxu1 %v3145_v19 }
 0x3ce   :  { %v686_v55 = vrot.slane %v685_v54, 1 }
 0x3d0   :  { %v687_v57 = vmax.f32 %v685_v54, %v686_v55  ;;  %900 = vmatpush1.msra.mxu0 %v3137_v16  ;;  %971 = vmatpush1.msra.mxu1 %v3143_v18 }
 0x3d1   :  { %2378 = vmatprep.subr.bf16.mxu0 %v3449_v20  ;;  %2386 = vmatprep.subr.bf16.mxu1 %v3461_v23 }
 0x3d2   :  { %v3548_v58 = vsel %vm1841_vm3, %v493_v56, %v687_v57  ;;  %v884_v56 = vld [vmem:[#allocation2 + $0x8] sm:$0xc0] }
 0x49a   :  { %v762_v60 = vpop.f32.mrb[4].mxu0  ;;  %v833_v61 = vpop.f32.mrb[4].mxu1 }
 0x49b   :  { %v842_v62 = vrot.slane %v762_v60, 4  ;;  %v764_v0 = vpop.f32.mrb[5].mxu0  ;;  %v835_v1 = vpop.f32.mrb[5].mxu1  ;;  %v844_v4 = vrot.slane %v833_v61, 4 }
 0x49c   :  { %v843_v2 = vrot.slane %v764_v0, 4  ;;  %v845_v10 = vrot.slane %v835_v1, 4 }
 0x49d   :  { %v850_v3 = vadd.f32 %v842_v62, %v688_v59  ;;  %v852_v9 = vadd.f32 %v844_v4, %v690_v5 }
 0x49e   :  { %v851_v6 = vadd.f32 %v843_v2, %v689_v63  ;;  %v853_v12 = vadd.f32 %v845_v10, %v691_v11  ;;  %v885_v63 = vld [vmem:[#allocation2 + $0x10] sm:$0xc0] }
 0x49f   :  { %v854_v7 = vmul.f32 0.5, %v850_v3 }
 0x4a0   :  { %v858_v8 = vmul.f32 0.5, %v851_v6  ;;  %v863_v13 = vmul.f32 0.5, %v853_v12 }
 0x4a1   :  { %2496 = vtanh.f32 %v854_v7 }
 0x4a2   :  { %2498 = vtanh.f32 %v858_v8 }
 0x4a3   :  { %2500 = vtanh.f32 %v852_v9 }
 0x4a4   :  { %2502 = vtanh.f32 %v863_v13 }
 0x4ab   :  { %v2497_v14 = vpop.eup %2496 }
 0x4ac   :  { %v2499_v15 = vpop.eup %2498  ;;  %v856_v29 = vmul.f32 0.5, %v2497_v14 }
 0x4ad   :  { %v860_v30 = vmul.f32 0.5, %v2499_v15  ;;  %v2501_v32 = vpop.eup %2500 }
 0x4ae   :  { %v857_v31 = vadd.f32 0.5, %v856_v29  ;;  %v2503_v39 = vpop.eup %2502 }
 0x4af   :  { %v861_v33 = vadd.f32 0.5, %v860_v30  ;;  %v865_v40 = vmul.f32 0.5, %v2503_v39 }
 0x4b0   :  { %v871_v35 = vmul.f32 %v2501_v32, %v857_v31 }
 0x4b1   :  { %v870_v36 = vmul.f32 %v868_v34, %v861_v33  ;;  %v866_v41 = vadd.f32 0.5, %v865_v40 }
 0x4b3   :  { %v3551_v38 = vadd.f32 %v871_v35, %v870_v36 }
 0x4b5   :  { %2504 = vtanh.f32 %v3551_v38  ;;  %v1063_v14 = vrot.slane %v3551_v38, 6 }
 0x4bf   :  { %v2505_v42 = vpop.eup %2504 }
 0x4c0   :  { %v874_v43 = vmul.f32 %v2505_v42, %v866_v41 }
 0x4c2   :  { %v876_v44 = vsel %vm875_vm4, %v874_v43, -inf  ;;  %v888_v45 = vrot.slane %v874_v43, 4 }
 0x4c3   :  { %v877_v46 = vrot.slane %v876_v44, 4 }
 0x4c4   :  { %2256 = vmatmul.mubr.msk.f32.vlgmr.msra.gmra.mrb[6].mxu0 %vm318_vm0, %v888_v45  ;;  %2257 = vmatmul.mubr.msk.f32.vlgmr.msra.gmra.mrb[6].mxu1 %vm318_vm0, %v888_v45 }
 0x4c5   :  { %v878_v37 = vmax.f32 %v876_v44, %v877_v46  ;;  %2380 = vmatpush1.bf16.msra.mxu0 %v3453_v21  ;;  %2388 = vmatpush1.bf16.msra.mxu1 %v3465_v24  ;;  %v1078_v46 = vld [vmem:[#allocation2 + $0x20] sm:$0x3] }
 0x4c6   :  { %2382 = vmatprep.subr.bf16.mxu0 %v3457_v22  ;;  %2390 = vmatprep.subr.bf16.mxu1 %v3469_v25 }
 0x4c7   :  { %v879_v47 = vrot.slane %v878_v37, 2  ;;  %1150 = vmatprep.mubr.f32.mxu0 %v3056_v26  ;;  %1221 = vmatprep.mubr.f32.mxu1 %v3056_v26 }
 0x4c9   :  { %v880_v48 = vmax.f32 %v878_v37, %v879_v47  ;;  %2384 = vmatpush1.bf16.msra.mxu0 %v3476_v27  ;;  %2392 = vmatpush1.bf16.msra.mxu1 %v3483_v28  ;;  %v1079_v37 = vld [vmem:[#allocation2 + $0x28] sm:$0x3] }
 0x4ca   :  { %1094 = vmatprep.subr.mxu0 %v3139_v17  ;;  %1165 = vmatprep.subr.mxu1 %v3145_v19 }
 0x4cb   :  { %v881_v49 = vrot.slane %v880_v48, 1 }
 0x4cd   :  { %v882_v50 = vmax.f32 %v880_v48, %v881_v49  ;;  %1095 = vmatpush1.msra.mxu0 %v3137_v16  ;;  %1166 = vmatpush1.msra.mxu1 %v3143_v18 }
 0x4ce   :  { %2394 = vmatprep.subr.bf16.mxu0 %v3449_v20  ;;  %2402 = vmatprep.subr.bf16.mxu1 %v3461_v23 }
 0x4cf   :  { %v3572_v51 = vsel %vm1843_vm5, %v3548_v58, %v882_v50  ;;  %v886_v58 = vld [vmem:[#allocation2 + $0x18] sm:$0xc0] }
 0x597   :  { %v957_v53 = vpop.f32.mrb[6].mxu0  ;;  %v1028_v54 = vpop.f32.mrb[6].mxu1 }
 0x598   :  { %v1037_v55 = vrot.slane %v957_v53, 2  ;;  %v959_v57 = vpop.f32.mrb[7].mxu0  ;;  %v1030_v59 = vpop.f32.mrb[7].mxu1  ;;  %v1039_v62 = vrot.slane %v1028_v54, 2  ;;  %v1080_v53 = vld [vmem:[#allocation2 + $0x30] sm:$0x3] }
 0x599   :  { %v1038_v60 = vrot.slane %v959_v57, 2  ;;  %v1040_v4 = vrot.slane %v1030_v59, 2  ;;  %v1081_v59 = vld [vmem:[#allocation2 + $0x38] sm:$0x3] }
 0x59a   :  { %v1045_v61 = vadd.f32 %v1037_v55, %v883_v52  ;;  %v1047_v3 = vadd.f32 %v1039_v62, %v885_v63 }
 0x59b   :  { %v1046_v0 = vadd.f32 %v1038_v60, %v884_v56  ;;  %v1048_v5 = vadd.f32 %v1040_v4, %v886_v58 }
 0x59c   :  { %v1049_v1 = vmul.f32 0.5, %v1045_v61 }
 0x59d   :  { %v1053_v2 = vmul.f32 0.5, %v1046_v0  ;;  %v1058_v6 = vmul.f32 0.5, %v1048_v5 }
 0x59e   :  { %2506 = vtanh.f32 %v1049_v1 }
 0x59f   :  { %2508 = vtanh.f32 %v1053_v2 }
 0x5a0   :  { %2510 = vtanh.f32 %v1047_v3 }
 0x5a1   :  { %2512 = vtanh.f32 %v1058_v6 }
 0x5a8   :  { %v2507_v7 = vpop.eup %2506 }
 0x5a9   :  { %v2509_v8 = vpop.eup %2508  ;;  %v1051_v9 = vmul.f32 0.5, %v2507_v7 }
 0x5aa   :  { %v1055_v10 = vmul.f32 0.5, %v2509_v8  ;;  %v2511_v12 = vpop.eup %2510 }
 0x5ab   :  { %v1052_v11 = vadd.f32 0.5, %v1051_v9  ;;  %v2513_v31 = vpop.eup %2512 }
 0x5ac   :  { %v1056_v13 = vadd.f32 0.5, %v1055_v10  ;;  %v1060_v32 = vmul.f32 0.5, %v2513_v31 }
 0x5ad   :  { %v1066_v15 = vmul.f32 %v2511_v12, %v1052_v11 }
 0x5ae   :  { %v1065_v29 = vmul.f32 %v1063_v14, %v1056_v13  ;;  %v1061_v33 = vadd.f32 0.5, %v1060_v32 }
 0x5b0   :  { %v3575_v30 = vadd.f32 %v1066_v15, %v1065_v29 }
 0x5b2   :  { %2514 = vtanh.f32 %v3575_v30  ;;  %v1246_v4 = vrot.slane %v3575_v30, 6 }
 0x5bc   :  { %v2515_v34 = vpop.eup %2514 }
 0x5bd   :  { %v1069_v35 = vmul.f32 %v2515_v34, %v1061_v33  ;;  %v1260_v33 = vld [vmem:[#allocation2 + $0x20] sm:$0xc] }
 0x5bf   :  { %v1071_v36 = vsel %vm1070_vm6, %v1069_v35, -inf  ;;  %v1083_v39 = vrot.slane %v1069_v35, 6 }
 0x5c0   :  { %v1072_v40 = vrot.slane %v1071_v36, 4 }
 0x5c1   :  { %2258 = vmatmul.mubr.msk.f32.vlgmr.msra.gmra.mrb[8].mxu0 %vm318_vm0, %v1083_v39  ;;  %2259 = vmatmul.mubr.msk.f32.vlgmr.msra.gmra.mrb[8].mxu1 %vm318_vm0, %v1083_v39  ;;  %v1261_v39 = vld [vmem:[#allocation2 + $0x28] sm:$0xc] }
 0x5c2   :  { %v1073_v38 = vmax.f32 %v1071_v36, %v1072_v40  ;;  %2396 = vmatpush1.bf16.msra.mxu0 %v3453_v21  ;;  %2404 = vmatpush1.bf16.msra.mxu1 %v3465_v24 }
 0x5c3   :  { %2398 = vmatprep.subr.bf16.mxu0 %v3457_v22  ;;  %2406 = vmatprep.subr.bf16.mxu1 %v3469_v25 }
 0x5c4   :  { %v1074_v41 = vrot.slane %v1073_v38, 2  ;;  %1331 = vmatprep.mubr.f32.mxu0 %v3056_v26  ;;  %1402 = vmatprep.mubr.f32.mxu1 %v3056_v26 }
 0x5c6   :  { %v1075_v42 = vmax.f32 %v1073_v38, %v1074_v41  ;;  %2400 = vmatpush1.bf16.msra.mxu0 %v3476_v27  ;;  %2408 = vmatpush1.bf16.msra.mxu1 %v3483_v28 }
 0x5c7   :  { %1275 = vmatprep.subr.mxu0 %v3139_v17  ;;  %1346 = vmatprep.subr.mxu1 %v3145_v19 }
 0x5c8   :  { %v1076_v43 = vrot.slane %v1075_v42, 1 }
 0x5ca   :  { %v1077_v44 = vmax.f32 %v1075_v42, %v1076_v43  ;;  %1276 = vmatpush1.msra.mxu0 %v3137_v16  ;;  %1347 = vmatpush1.msra.mxu1 %v3143_v18 }
 0x5cb   :  { %2410 = vmatprep.subr.bf16.mxu0 %v3449_v20  ;;  %2418 = vmatprep.subr.bf16.mxu1 %v3461_v23 }
 0x5cc   :  { %v1846_v45 = vsel %vm1845_vm7, %v3572_v51, %v1077_v44  ;;  %v1262_v44 = vld [vmem:[#allocation2 + $0x30] sm:$0xc] }
 0x694   :  { %v1152_v47 = vpop.f32.mrb[8].mxu0  ;;  %v1223_v48 = vpop.f32.mrb[8].mxu1 }
 0x695   :  { %v1228_v49 = vadd.f32 %v1152_v47, %v1078_v46  ;;  %v1154_v50 = vpop.f32.mrb[9].mxu0  ;;  %v1225_v52 = vpop.f32.mrb[9].mxu1  ;;  %v1230_v57 = vadd.f32 %v1223_v48, %v1080_v53 }
 0x696   :  { %v1229_v54 = vadd.f32 %v1154_v50, %v1079_v37  ;;  %v1231_v60 = vadd.f32 %v1225_v52, %v1081_v59 }
 0x697   :  { %v1232_v55 = vmul.f32 0.5, %v1228_v49 }
 0x698   :  { %v1236_v56 = vmul.f32 0.5, %v1229_v54  ;;  %v1241_v61 = vmul.f32 0.5, %v1231_v60 }
 0x699   :  { %2516 = vtanh.f32 %v1232_v55 }
 0x69a   :  { %2518 = vtanh.f32 %v1236_v56 }
 0x69b   :  { %2520 = vtanh.f32 %v1230_v57 }
 0x69c   :  { %2522 = vtanh.f32 %v1241_v61 }
 0x6a3   :  { %v2517_v62 = vpop.eup %2516 }
 0x6a4   :  { %v2519_v51 = vpop.eup %2518  ;;  %v1234_v63 = vmul.f32 0.5, %v2517_v62 }
 0x6a5   :  { %v1238_v0 = vmul.f32 0.5, %v2519_v51  ;;  %v2521_v2 = vpop.eup %2520 }
 0x6a6   :  { %v1235_v1 = vadd.f32 0.5, %v1234_v63  ;;  %v2523_v7 = vpop.eup %2522 }
 0x6a7   :  { %v1239_v3 = vadd.f32 0.5, %v1238_v0  ;;  %v1243_v8 = vmul.f32 0.5, %v2523_v7 }
 0x6a8   :  { %v1249_v58 = vmul.f32 %v2521_v2, %v1235_v1 }
 0x6a9   :  { %v1248_v5 = vmul.f32 %v1246_v4, %v1239_v3  ;;  %v1244_v9 = vadd.f32 0.5, %v1243_v8 }
 0x6ab   :  { %v3597_v6 = vadd.f32 %v1249_v58, %v1248_v5 }
 0x6ad   :  { %2524 = vtanh.f32 %v3597_v6  ;;  %v1439_v59 = vrot.slane %v3597_v6, 6 }
 0x6b7   :  { %v2525_v10 = vpop.eup %2524 }
 0x6b8   :  { %v1252_v11 = vmul.f32 %v2525_v10, %v1244_v9 }
 0x6ba   :  { %v1253_v12 = vsel %vm486_vm1, %v1252_v11, -inf  ;;  %2260 = vmatmul.mubr.msk.f32.vlgmr.msra.gmra.mrb[10].mxu0 %vm318_vm0, %v1252_v11  ;;  %2261 = vmatmul.mubr.msk.f32.vlgmr.msra.gmra.mrb[10].mxu1 %vm318_vm0, %v1252_v11 }
 0x6bb   :  { %v1254_v13 = vrot.slane %v1253_v12, 4  ;;  %2412 = vmatpush1.bf16.msra.mxu0 %v3453_v21  ;;  %2420 = vmatpush1.bf16.msra.mxu1 %v3465_v24 }
 0x6bc   :  { %2414 = vmatprep.subr.bf16.mxu0 %v3457_v22  ;;  %2422 = vmatprep.subr.bf16.mxu1 %v3469_v25 }
 0x6bd   :  { %v1255_v14 = vmax.f32 %v1253_v12, %v1254_v13  ;;  %1525 = vmatprep.mubr.f32.mxu0 %v3056_v26  ;;  %1596 = vmatprep.mubr.f32.mxu1 %v3056_v26 }
 0x6bf   :  { %v1256_v15 = vrot.slane %v1255_v14, 2  ;;  %2416 = vmatpush1.bf16.msra.mxu0 %v3476_v27  ;;  %2424 = vmatpush1.bf16.msra.mxu1 %v3483_v28 }
 0x6c0   :  { %1469 = vmatprep.subr.mxu0 %v3139_v17  ;;  %1540 = vmatprep.subr.mxu1 %v3145_v19 }
 0x6c1   :  { %v1257_v29 = vmax.f32 %v1255_v14, %v1256_v15 }
 0x6c3   :  { %v1258_v30 = vrot.slane %v1257_v29, 1  ;;  %1470 = vmatpush1.msra.mxu0 %v3137_v16  ;;  %1541 = vmatpush1.msra.mxu1 %v3143_v18 }
 0x6c4   :  { %2426 = vmatprep.subr.bf16.mxu0 %v3449_v20  ;;  %2434 = vmatprep.subr.bf16.mxu1 %v3461_v23 }
 0x6c5   :  { %v1259_v31 = vmax.f32 %v1257_v29, %v1258_v30  ;;  %v1456_v30 = vld [vmem:[#allocation2 + $0x38] sm:$0x30] }
 0x6c7   :  { %v3617_v32 = vsel %vm1847_vm8, %v1846_v45, %v1259_v31  ;;  %v1263_v45 = vld [vmem:[#allocation2 + $0x38] sm:$0xc] }
 0x78d   :  { %v1333_v34 = vpop.f32.mrb[10].mxu0  ;;  %v1404_v35 = vpop.f32.mrb[10].mxu1 }
 0x78e   :  { %v1413_v36 = vrot.slane %v1333_v34, 6  ;;  %v1335_v40 = vpop.f32.mrb[11].mxu0  ;;  %v1406_v38 = vpop.f32.mrb[11].mxu1  ;;  %v1415_v43 = vrot.slane %v1404_v35, 6 }
 0x78f   :  { %v1414_v41 = vrot.slane %v1335_v40, 6  ;;  %v1416_v47 = vrot.slane %v1406_v38, 6 }
 0x790   :  { %v1421_v42 = vadd.f32 %v1413_v36, %v1260_v33  ;;  %v1423_v23 = vadd.f32 %v1415_v43, %v1262_v44 }
 0x791   :  { %v1422_v46 = vadd.f32 %v1414_v41, %v1261_v39  ;;  %v1424_v48 = vadd.f32 %v1416_v47, %v1263_v45 }
 0x792   :  { %v1425_v37 = vmul.f32 0.5, %v1421_v42 }
 0x793   :  { %v1429_v20 = vmul.f32 0.5, %v1422_v46  ;;  %v1434_v49 = vmul.f32 0.5, %v1424_v48 }
 0x794   :  { %2526 = vtanh.f32 %v1425_v37 }
 0x795   :  { %2528 = vtanh.f32 %v1429_v20 }
 0x796   :  { %2530 = vtanh.f32 %v1423_v23 }
 0x797   :  { %2532 = vtanh.f32 %v1434_v49 }
 0x79e   :  { %v2527_v50 = vpop.eup %2526 }
 0x79f   :  { %v2529_v52 = vpop.eup %2528  ;;  %v1427_v53 = vmul.f32 0.5, %v2527_v50 }
 0x7a0   :  { %v1431_v54 = vmul.f32 0.5, %v2529_v52  ;;  %v2531_v56 = vpop.eup %2530 }
 0x7a1   :  { %v1428_v55 = vadd.f32 0.5, %v1427_v53  ;;  %v2533_v51 = vpop.eup %2532 }
 0x7a2   :  { %v1432_v57 = vadd.f32 0.5, %v1431_v54  ;;  %v1436_v63 = vmul.f32 0.5, %v2533_v51  ;;  %v1858_v51 = vld [vmem:[#allocation8 + $0x100] sm:$0xff] }
 0x7a3   :  { %v1442_v60 = vmul.f32 %v2531_v56, %v1428_v55 }
 0x7a4   :  { %v1441_v61 = vmul.f32 %v1439_v59, %v1432_v57  ;;  %v1437_v0 = vadd.f32 0.5, %v1436_v63  ;;  %v1855_v57 = vld [vmem:[#allocation8 + $0xa0] sm:$0xff] }
 0x7a5   :  { %v1856_v59 = vld [vmem:[#allocation8 + $0xc0] sm:$0xff] }
 0x7a6   :  { %v3620_v62 = vadd.f32 %v1442_v60, %v1441_v61  ;;  %v2442_v60 = vpack.c.bf16 %v1856_v59, %v1855_v57  ;;  %v3057_v61 = vmov 0.0|0.0  }
 0x7a8   :  { %2534 = vtanh.f32 %v3620_v62  ;;  %v1633_v41 = vrot.slane %v3620_v62, 6  ;;  %v1857_v62 = vld [vmem:[#allocation8 + $0xe0] sm:$0xff] }
 0x7a9   :  { %v2445_v63 = vpack.c.bf16 %v1858_v51, %v1857_v62 }
 0x7b2   :  { %v2535_v1 = vpop.eup %2534 }
 0x7b3   :  { %v1445_v2 = vmul.f32 %v2535_v1, %v1437_v0  ;;  %v1859_v0 = vld [vmem:[#allocation8 + $0x120] sm:$0xff] }
 0x7b4   :  { %v1647_v1 = vld [vmem:[#allocation2 + $0x20] sm:$0xc0] }
 0x7b5   :  { %v1446_v3 = vsel %vm680_vm2, %v1445_v2, -inf  ;;  %v1458_v4 = vrot.slane %v1445_v2, 2 }
 0x7b6   :  { %v1447_v58 = vrot.slane %v1446_v3, 4 }
 0x7b7   :  { %2262 = vmatmul.mubr.msk.f32.vlgmr.msra.gmra.mrb[12].mxu0 %vm318_vm0, %v1458_v4  ;;  %2263 = vmatmul.mubr.msk.f32.vlgmr.msra.gmra.mrb[12].mxu1 %vm318_vm0, %v1458_v4 }
 0x7b8   :  { %v1448_v5 = vmax.f32 %v1446_v3, %v1447_v58  ;;  %2428 = vmatpush1.bf16.msra.mxu0 %v3453_v21  ;;  %2436 = vmatpush1.bf16.msra.mxu1 %v3465_v24  ;;  %v1648_v58 = vld [vmem:[#allocation2 + $0x28] sm:$0xc0] }
 0x7b9   :  { %2430 = vmatprep.subr.bf16.mxu0 %v3457_v22  ;;  %2438 = vmatprep.subr.bf16.mxu1 %v3469_v25  ;;  %v1453_v25 = vld [vmem:[#allocation2 + $0x20] sm:$0x30] }
 0x7ba   :  { %v1449_v6 = vrot.slane %v1448_v5, 2  ;;  %1719 = vmatprep.mubr.f32.mxu0 %v3056_v26  ;;  %1790 = vmatprep.mubr.f32.mxu1 %v3056_v26 }
 0x7bc   :  { %v1450_v7 = vmax.f32 %v1448_v5, %v1449_v6  ;;  %2432 = vmatpush1.bf16.msra.mxu0 %v3476_v27  ;;  %2440 = vmatpush1.bf16.msra.mxu1 %v3483_v28  ;;  %v1454_v27 = vld [vmem:[#allocation2 + $0x28] sm:$0x30] }
 0x7bd   :  { %1663 = vmatprep.subr.mxu0 %v3139_v17  ;;  %1734 = vmatprep.subr.mxu1 %v3145_v19  ;;  %v1455_v19 = vld [vmem:[#allocation2 + $0x30] sm:$0x30] }
 0x7be   :  { %v1451_v21 = vrot.slane %v1450_v7, 1 }
 0x7c0   :  { %1664 = vmatpush1.msra.mxu0 %v3137_v16  ;;  %1735 = vmatpush1.msra.mxu1 %v3143_v18  ;;  %v1452_v22 = vmax.f32 %v1450_v7, %v1451_v21 }
 0x7c1   :  { %2441 = vmatprep.subr.bf16.mxu0 %v3057_v61  ;;  %2447 = vmatprep.subr.bf16.mxu1 %v3057_v61 }
 0x7c2   :  { %v1850_v24 = vsel %vm1849_vm9, %v3617_v32, %v1452_v22 }
 0x88a   :  { %v1527_v8 = vpop.f32.mrb[12].mxu0  ;;  %v1598_v9 = vpop.f32.mrb[12].mxu1 }
 0x88b   :  { %v1607_v10 = vrot.slane %v1527_v8, 4  ;;  %v1529_v11 = vpop.f32.mrb[13].mxu0  ;;  %v1600_v28 = vpop.f32.mrb[13].mxu1  ;;  %v1609_v13 = vrot.slane %v1598_v9, 4 }
 0x88c   :  { %v1608_v12 = vrot.slane %v1529_v11, 4  ;;  %v1610_v18 = vrot.slane %v1600_v28, 4 }
 0x88d   :  { %v1615_v17 = vadd.f32 %v1607_v10, %v1453_v25  ;;  %v1617_v16 = vadd.f32 %v1609_v13, %v1455_v19 }
 0x88e   :  { %v1616_v14 = vadd.f32 %v1608_v12, %v1454_v27  ;;  %v1618_v31 = vadd.f32 %v1610_v18, %v1456_v30 }
 0x88f   :  { %v1619_v15 = vmul.f32 0.5, %v1615_v17 }
 0x890   :  { %v1623_v29 = vmul.f32 0.5, %v1616_v14  ;;  %v1628_v32 = vmul.f32 0.5, %v1618_v31 }
 0x891   :  { %2536 = vtanh.f32 %v1619_v15 }
 0x892   :  { %2538 = vtanh.f32 %v1623_v29 }
 0x893   :  { %2540 = vtanh.f32 %v1617_v16 }
 0x894   :  { %2542 = vtanh.f32 %v1628_v32 }
 0x89b   :  { %v2537_v33 = vpop.eup %2536 }
 0x89c   :  { %v2539_v34 = vpop.eup %2538  ;;  %v1621_v35 = vmul.f32 0.5, %v2537_v33 }
 0x89d   :  { %v1625_v36 = vmul.f32 0.5, %v2539_v34  ;;  %v2541_v40 = vpop.eup %2540 }
 0x89e   :  { %v1622_v39 = vadd.f32 0.5, %v1621_v35  ;;  %v2543_v46 = vpop.eup %2542 }
 0x89f   :  { %v1626_v38 = vadd.f32 0.5, %v1625_v36  ;;  %v1630_v37 = vmul.f32 0.5, %v2543_v46 }
 0x8a0   :  { %v1636_v42 = vmul.f32 %v2541_v40, %v1622_v39 }
 0x8a1   :  { %v1635_v43 = vmul.f32 %v1633_v41, %v1626_v38  ;;  %v1631_v20 = vadd.f32 0.5, %v1630_v37  ;;  %v1861_v37 = vld [vmem:[#allocation8 + $0x160] sm:$0xff] }
 0x8a3   :  { %v3640_v44 = vadd.f32 %v1636_v42, %v1635_v43 }
 0x8a5   :  { %2544 = vtanh.f32 %v3640_v44  ;;  %v1827_v16 = vrot.slane %v3640_v44, 6 }
 0x8af   :  { %v2545_v23 = vpop.eup %2544 }
 0x8b0   :  { %v1639_v47 = vmul.f32 %v2545_v23, %v1631_v20  ;;  %v1862_v20 = vld [vmem:[#allocation8 + $0x180] sm:$0xff] }
 0x8b1   :  { %v2448_v23 = vpack.c.bf16 %v1862_v20, %v1861_v37 }
 0x8b2   :  { %v1640_v45 = vsel %vm875_vm4, %v1639_v47, -inf  ;;  %v1652_v48 = vrot.slane %v1639_v47, 4  ;;  %v1860_v47 = vld [vmem:[#allocation8 + $0x140] ss:$0 sm:$0xff] }
 0x8b3   :  { %v1641_v49 = vrot.slane %v1640_v45, 4 }
 0x8b4   :  { %2264 = vmatmul.mubr.msk.f32.vlgmr.msra.gmra.mrb[14].mxu0 %vm318_vm0, %v1652_v48  ;;  %2265 = vmatmul.mubr.msk.f32.vlgmr.msra.gmra.mrb[14].mxu1 %vm318_vm0, %v1652_v48 }
 0x8b5   :  { %v1642_v50 = vmax.f32 %v1640_v45, %v1641_v49  ;;  %2443 = vmatpush3.bf16.msra.mxu0 %v2442_v60  ;;  %2303 = vmatprep.mubr.msk.f32.mxu0 %vm3058_vm11, %v3056_v26 }
 0x8b6   :  { %2444 = vmatprep.subr.bf16.mxu0 %v3057_v61  ;;  %2310 = vmatprep.mubr.msk.f32.mxu1 %vm3058_vm11, %v3056_v26 }
 0x8b7   :  { %v1643_v52 = vrot.slane %v1642_v50, 2  ;;  %2449 = vmatpush3.bf16.msra.mxu1 %v2448_v23 }
 0x8b9   :  { %v1644_v53 = vmax.f32 %v1642_v50, %v1643_v52  ;;  %2446 = vmatpush3.bf16.msra.mxu0 %v2445_v63  ;;  %v1863_v52 = vld [vmem:[#allocation8 + $0x1a0] ss:$0 sm:$0xff] }
 0x8ba   :  { %2301 = vmatprep.subr.mxu0 %v3056_v26  ;;  %v1650_v26 = vld [vmem:[#allocation2 + $0x38] sm:$0xc0] }
 0x8bb   :  { %v1645_v54 = vrot.slane %v1644_v53, 1 }
 0x8bd   :  { %v1646_v55 = vmax.f32 %v1644_v53, %v1645_v54  ;;  %2302 = vmatpush3.msra.mxu0 %v1859_v0 }
 0x8bf   :  { %v3646_v56 = vsel %vm1851_vm10, %v1850_v24, %v1646_v55  ;;  %v1649_v24 = vld [vmem:[#allocation2 + $0x30] sm:$0xc0] }
 0x987   :  { %v1721_v2 = vpop.f32.mrb[14].mxu0  ;;  %v1792_v3 = vpop.f32.mrb[14].mxu1 }
 0x988   :  { %v1801_v4 = vrot.slane %v1721_v2, 2  ;;  %v1723_v5 = vpop.f32.mrb[15].mxu0  ;;  %v1794_v6 = vpop.f32.mrb[15].mxu1  ;;  %v1803_v22 = vrot.slane %v1792_v3, 2 }
 0x989   :  { %v1802_v7 = vrot.slane %v1723_v5, 2  ;;  %v1804_v27 = vrot.slane %v1794_v6, 2 }
 0x98a   :  { %v1809_v21 = vadd.f32 %v1801_v4, %v1647_v1  ;;  %v1811_v10 = vadd.f32 %v1803_v22, %v1649_v24 }
 0x98b   :  { %v1810_v25 = vadd.f32 %v1802_v7, %v1648_v58  ;;  %v1812_v11 = vadd.f32 %v1804_v27, %v1650_v26 }
 0x98c   :  { %v1813_v8 = vmul.f32 0.5, %v1809_v21 }
 0x98d   :  { %v1817_v9 = vmul.f32 0.5, %v1810_v25  ;;  %v1822_v28 = vmul.f32 0.5, %v1812_v11 }
 0x98e   :  { %2546 = vtanh.f32 %v1813_v8 }
 0x98f   :  { %2548 = vtanh.f32 %v1817_v9 }
 0x990   :  { %2550 = vtanh.f32 %v1811_v10 }
 0x991   :  { %2552 = vtanh.f32 %v1822_v28 }
 0x998   :  { %v2547_v12 = vpop.eup %2546 }
 0x999   :  { %v2549_v17 = vpop.eup %2548  ;;  %v1815_v13 = vmul.f32 0.5, %v2547_v12 }
 0x99a   :  { %v1819_v19 = vmul.f32 0.5, %v2549_v17  ;;  %v2551_v15 = vpop.eup %2550 }
 0x99b   :  { %v1816_v14 = vadd.f32 0.5, %v1815_v13  ;;  %v2553_v32 = vpop.eup %2552 }
 0x99c   :  { %v1820_v29 = vadd.f32 0.5, %v1819_v19  ;;  %v1824_v33 = vmul.f32 0.5, %v2553_v32 }
 0x99d   :  { %v1830_v18 = vmul.f32 %v2551_v15, %v1816_v14 }
 0x99e   :  { %v1829_v30 = vmul.f32 %v1827_v16, %v1820_v29  ;;  %v1825_v34 = vadd.f32 0.5, %v1824_v33 }
 0x9a0   :  { %v1831_v31 = vadd.f32 %v1830_v18, %v1829_v30 }
 0x9a2   :  { %2554 = vtanh.f32 %v1831_v31 }
 0x9ac   :  { %v2555_v35 = vpop.eup %2554 }
 0x9ad   :  { %v1833_v36 = vmul.f32 %v2555_v35, %v1825_v34 }
 0x9af   :  { %v1834_v39 = vsel %vm1070_vm6, %v1833_v36, -inf }
 0x9b0   :  { %v1835_v40 = vrot.slane %v1834_v39, 4 }
 0x9b2   :  { %v1836_v38 = vmax.f32 %v1834_v39, %v1835_v40 }
 0x9b4   :  { %v1837_v41 = vrot.slane %v1836_v38, 2 }
 0x9b6   :  { %v1838_v42 = vmax.f32 %v1836_v38, %v1837_v41 }
 0x9b8   :  { %v1839_v43 = vrot.slane %v1838_v42, 1 }
 0x9ba   :  { %v1840_v46 = vmax.f32 %v1838_v42, %v1839_v43 }
 0x9bc   :  { %v1854_v44 = vsel %vm1853_vm12, %v3646_v56, %v1840_v46 }
 0x9bd   :  { %2304 = vmatmul.mubr.msk.f32.vlgmr.msra.gmra.mrb[16].mxu0 %vm318_vm0, %v1854_v44 }
 0xa90   :  { %v1933_v45 = vpop.f32.mrb[16].mxu0 }
 0xa91   :  { %v1934_v48 = vadd.f32 %v1933_v45, %v1860_v47  ;;  %v2305_v49 = vpop.f32.mrb[17].mxu0 }
 0xa93   :  { %v1937_v50 = vmax.f32 %v1934_v48, 0.0 }
 0xa95   :  { %2311 = vmatmul.mubr.msk.f32.vlgmr.msra.gmra.mrb[16].mxu1 %vm1938_vm13, %v1937_v50 }
 0xb68   :  { %v2008_v53 = vpop.f32.mrb[16].mxu1 }
 0xb69   :  { %v2009_v54 = vadd.f32 %v2008_v53, %v1863_v52  ;;  %v2312_v55 = vpop.f32.mrb[17].mxu1 }
 0xb6b   :  { %2013 = vst.msk [vmem:[#allocation9] sm:$0xff] %vm2012_vm14, %v2009_v54 }
 0xb6c   :  { %2985 = shalt.err (!%p2982_p13)
}
 0xb6d   :  { %s2986_s29 = scalar_lea.hbm %s3670_s3, 128 }
 0xb6e   :  { %p2987_p0 = scmp.ne.s32.totalorder %s3670_s3, %s2986_s29  ;;  %p2990_p1 = scmp.lt.u32.totalorder %s2986_s29, %s3670_s3 }
 0xb70   :  { %p2992_p2 = pnand %p2990_p1, %p2987_p0 }
 0xb72   :  { %2995 = shalt.err (!%p2992_p2)
}
 0xb73   :  { %2023 = dma.vmem_to_hbm [thread:$0]  %s2021_s5, 128, %s3670_s3, [#allocation6]  }
 0xb74   :  { %3032 = dma.done.wait [#allocation6], 128  }
 0xb75   :  { %3033 = vsyncadd [#allocation6], 4294967168 }
 0xb76   :  { %2027 = vsyncpa [#allocation5], 1 }
 0xb77   :  { %2028 = vsyncpa [#allocation6], 1 }
 0xb78   :  { %2029 = vsyncpa [#allocation7], 1 }
 0xb79   :  { %2030 = vsyncmov [#allocation3] }
 0xb7c   :  { %s2031_s22 = vpop.sfrf %2030 }
 0xb7d   :  { %p2268_p3 = scmp.ne.s32.totalorder %s2031_s22, 0 }
 0xb7f   :  { %2035 = shalt.err (%p2268_p3)  }
 0xb80   :  { %2037 = vsyncmov [#allocation3 + $0x1] }
 0xb83   :  { %s2038_s25 = vpop.sfrf %2037 }
 0xb84   :  { %p2269_p4 = scmp.ne.s32.totalorder %s2038_s25, 0 }
 0xb86   :  { %2042 = shalt.err (%p2269_p4)  }
 0xb87   :  { %2044 = vsyncmov [#allocation3 + $0x2] }
 0xb8a   :  { %s2045_s20 = vpop.sfrf %2044 }
 0xb8b   :  { %p2270_p5 = scmp.ne.s32.totalorder %s2045_s20, 0 }
 0xb8d   :  { %2049 = shalt.err (%p2270_p5)  }
 0xb8e   :  { %2051 = vsyncmov [#allocation3 + $0x3] }
 0xb91   :  { %s2052_s19 = vpop.sfrf %2051 }
 0xb92   :  { %p2271_p6 = scmp.ne.s32.totalorder %s2052_s19, 0 }
 0xb94   :  { %2056 = shalt.err (%p2271_p6)  }
 0xb95   :  { %2058 = vsyncmov [#allocation3 + $0x4] }
 0xb98   :  { %s2059_s3 = vpop.sfrf %2058 }
 0xb99   :  { %p2272_p7 = scmp.ne.s32.totalorder %s2059_s3, 0 }
 0xb9b   :  { %2063 = shalt.err (%p2272_p7)  }
 0xb9c   :  { %2065 = vsyncmov [#allocation3 + $0x5] }
 0xb9f   :  { %s2066_s24 = vpop.sfrf %2065 }
 0xba0   :  { %p2273_p8 = scmp.ne.s32.totalorder %s2066_s24, 0 }
 0xba2   :  { %2070 = shalt.err (%p2273_p8)  }
 0xba3   :  { %2072 = vsyncmov [#allocation3 + $0x6] }
 0xba6   :  { %s2073_s7 = vpop.sfrf %2072 }
 0xba7   :  { %p2274_p9 = scmp.ne.s32.totalorder %s2073_s7, 0 }
 0xba9   :  { %2077 = shalt.err (%p2274_p9)  }
 0xbaa   :  { %2079 = vsyncmov [#allocation3 + $0x7] }
 0xbad   :  { %s2080_s2 = vpop.sfrf %2079 }
 0xbae   :  { %p2275_p10 = scmp.ne.s32.totalorder %s2080_s2, 0 }
 0xbb0   :  { %2084 = shalt.err (%p2275_p10)  }
 0xbb1   :  { %2086 = vsyncmov [#allocation3 + $0x8] }
 0xbb4   :  { %s2087_s14 = vpop.sfrf %2086 }
 0xbb5   :  { %p2276_p11 = scmp.ne.s32.totalorder %s2087_s14, 0 }
 0xbb7   :  { %2091 = shalt.err (%p2276_p11)  }
 0xbb8   :  { %2093 = vsyncmov [#allocation3 + $0x9] }
 0xbbb   :  { %s2094_s30 = vpop.sfrf %2093 }
 0xbbc   :  { %p2277_p12 = scmp.ne.s32.totalorder %s2094_s30, 0 }
 0xbbe   :  { %2098 = shalt.err (%p2277_p12)  }
 0xbbf   :  { %2100 = vsyncmov [#allocation3 + $0xa] }
 0xbc2   :  { %s2101_s11 = vpop.sfrf %2100 }
 0xbc3   :  { %p2278_p13 = scmp.ne.s32.totalorder %s2101_s11, 0 }
 0xbc5   :  { %2105 = shalt.err (%p2278_p13)  }
 0xbc6   :  { %2107 = vsyncmov [#allocation3 + $0xb] }
 0xbc9   :  { %s2108_s8 = vpop.sfrf %2107 }
 0xbca   :  { %p2279_p0 = scmp.ne.s32.totalorder %s2108_s8, 0 }
 0xbcc   :  { %2112 = shalt.err (%p2279_p0)  }
 0xbcd   :  { %2114 = vsyncmov [#allocation3 + $0xc] }
 0xbd0   :  { %s2115_s9 = vpop.sfrf %2114 }
 0xbd1   :  { %p2280_p1 = scmp.ne.s32.totalorder %s2115_s9, 0 }
 0xbd3   :  { %2119 = shalt.err (%p2280_p1)  }
 0xbd4   :  { %2121 = vsyncmov [#allocation3 + $0xd] }
 0xbd7   :  { %s2122_s23 = vpop.sfrf %2121 }
 0xbd8   :  { %p2281_p2 = scmp.ne.s32.totalorder %s2122_s23, 0 }
 0xbda   :  { %2126 = shalt.err (%p2281_p2)  }
 0xbdb   :  { %2128 = vsyncmov [#allocation3 + $0xe] }
 0xbde   :  { %s2129_s15 = vpop.sfrf %2128 }
 0xbdf   :  { %p2282_p3 = scmp.ne.s32.totalorder %s2129_s15, 0 }
 0xbe1   :  { %2133 = shalt.err (%p2282_p3)  }
 0xbe2   :  { %2135 = vsyncmov [#allocation3 + $0xf] }
 0xbe5   :  { %s2136_s13 = vpop.sfrf %2135 }
 0xbe6   :  { %p2283_p4 = scmp.ne.s32.totalorder %s2136_s13, 0 }
 0xbe8   :  { %2140 = shalt.err (%p2283_p4)  }

</bundles_post_ra>
